<compile_context>
chip_gen: v7x
topology: tpu7x:2x2x1
jax: 0.10.0
libtpu: 0.0.40
codegen_flags: <defaults>
</compile_context>

<pallas_src>
import math
import functools

import jax
import jax.numpy as jnp
from jax.experimental import pallas as pl
from jax.experimental.pallas import tpu as pltpu


# ----------------------------- in-kernel helpers -----------------------------

def _dot(a, b):
    return jnp.dot(a, b, preferred_element_type=jnp.float32)


def _dot_nt(a, b):
    # a: [M, K], b: [N, K] -> [M, N]  (contract last axes, no transpose copy)
    return jax.lax.dot_general(a, b, (((1,), (1,)), ((), ())),
                               preferred_element_type=jnp.float32)


def _layernorm(x, gamma, beta, eps=1e-5):
    # two-pass statistics in f32 (numerically safer than E[x^2] - mean^2)
    mean = jnp.mean(x, axis=-1, keepdims=True)
    xc = x - mean
    var = jnp.mean(xc * xc, axis=-1, keepdims=True)
    return xc * jax.lax.rsqrt(var + eps) * gamma + beta


def _mha(xq, xkv, bias, w_q_ref, b_q_ref, w_kv_ref, b_kv_ref, w_o_ref, b_o_ref,
         num_heads):
    """Multi-head attention with fused, lane-dense projections.

    xq:   [Tq, E] bf16      xkv: [Tk, E] bf16
    bias: [Tq, Tk] f32 additive mask (0 / -1e9), shared by all heads
    w_q_ref:  [E, E]  bf16 (softmax scale folded in)   b_q_ref:  [1, E]  f32
    w_kv_ref: [E, 2E] bf16                             b_kv_ref: [1, 2E] f32
    w_o_ref:  [E, E]  bf16                             b_o_ref:  [1, E]  f32
    """
    E = xq.shape[-1]
    dh = E // num_heads

    # Fused projections: one MXU-filling matmul each for Q and K|V.
    q_all = (_dot(xq, w_q_ref[...]) + b_q_ref[...]).astype(jnp.bfloat16)   # [Tq, E]
    kv_all = _dot(xkv, w_kv_ref[...]) + b_kv_ref[...]                      # [Tk, 2E] f32
    k_all = kv_all[:, :E].astype(jnp.bfloat16)
    v_all = kv_all[:, E:].astype(jnp.bfloat16)

    # Per-head score / softmax / PV (only these keep the dh-sized axes).
    pv_heads = []
    for h in range(num_heads):                     # static unroll
        sl = slice(h * dh, (h + 1) * dh)
        s = _dot_nt(q_all[:, sl], k_all[:, sl]) + bias        # [Tq, Tk] f32
        m = jnp.max(s, axis=-1, keepdims=True)
        p = jnp.exp(s - m)
        p = p * pl.reciprocal(jnp.sum(p, axis=-1, keepdims=True), approx=True)
        pv_heads.append(_dot(p.astype(jnp.bfloat16), v_all[:, sl])
                        .astype(jnp.bfloat16))                # [Tq, dh]

    # Fused output projection: single full-K matmul over the concatenated heads.
    pv = jnp.concatenate(pv_heads, axis=-1)                   # [Tq, E] bf16
    return _dot(pv, w_o_ref[...]) + b_o_ref[...]              # [Tq, E] f32


# ----------------------------- fused block kernel -----------------------------

def decoder_block_kernel(trg_len_ref, src_len_ref,            # scalar prefetch (SMEM)
                         x_ref, enc_ref,
                         w_sq_ref, b_sq_ref, w_skv_ref, b_skv_ref, w_so_ref, b_so_ref,
                         w_cq_ref, b_cq_ref, w_ckv_ref, b_ckv_ref, w_co_ref, b_co_ref,
                         ln_g_ref, ln_b_ref,
                         ff_w1_ref, ff_b1_ref, ff_w2_ref, ff_b2_ref,
                         out_ref, *, num_heads):
    b = pl.program_id(0)

    x = x_ref[0]            # [St, E] bf16
    enc = enc_ref[0]        # [Ss, E] bf16
    St = x.shape[0]
    Ss = enc.shape[0]

    # Additive attention biases rebuilt in-kernel (causal + key padding).
    t_len = trg_len_ref[b]
    s_len = src_len_ref[b]
    qrow = jax.lax.broadcasted_iota(jnp.int32, (St, St), 0)
    kcol = jax.lax.broadcasted_iota(jnp.int32, (St, St), 1)
    self_bias = jnp.where((kcol <= qrow) & (kcol < t_len), 0.0, -1e9).astype(jnp.float32)
    ccol = jax.lax.broadcasted_iota(jnp.int32, (St, Ss), 1)
    cross_bias = jnp.where(ccol < s_len, 0.0, -1e9).astype(jnp.float32)

    x_f32 = x.astype(jnp.float32)

    # masked self-attention + residual + layernorm    (dropout1 = identity, eval)
    att1 = _mha(x, x, self_bias, w_sq_ref, b_sq_ref, w_skv_ref, b_skv_ref,
                w_so_ref, b_so_ref, num_heads)
    h1 = _layernorm(x_f32 + att1, ln_g_ref[0], ln_b_ref[0])

    # cross-attention over encoder output             (dropout2 = identity, eval)
    att2 = _mha(h1.astype(jnp.bfloat16), enc, cross_bias,
                w_cq_ref, b_cq_ref, w_ckv_ref, b_ckv_ref, w_co_ref, b_co_ref,
                num_heads)
    h2 = _layernorm(h1 + att2, ln_g_ref[1], ln_b_ref[1])

    # pointwise feed-forward                          (dropout3 = identity, eval)
    ff = jnp.maximum(_dot(h2.astype(jnp.bfloat16), ff_w1_ref[...]) + ff_b1_ref[...], 0.0)
    ff = _dot(ff.astype(jnp.bfloat16), ff_w2_ref[...]) + ff_b2_ref[...]
    out_ref[0] = _layernorm(h2 + ff, ln_g_ref[2], ln_b_ref[2]).astype(out_ref.dtype)


def decoder_block(x, src_enc, trg_len, src_len, p, num_heads):
    B, St, E = x.shape
    Ss = src_enc.shape[1]
    Hd = p["ff_w1"].shape[1]
    H = num_heads

    def const_spec(arr):
        nd = arr.ndim
        return pl.BlockSpec(arr.shape, lambda *_, _n=nd: (0,) * _n)

    weights = (p["w_self_q"], p["b_self_q"], p["w_self_kv"], p["b_self_kv"],
               p["w_self_o"], p["b_self_o"],
               p["w_cross_q"], p["b_cross_q"], p["w_cross_kv"], p["b_cross_kv"],
               p["w_cross_o"], p["b_cross_o"],
               p["ln_g"], p["ln_b"], p["ff_w1"], p["ff_b1"], p["ff_w2"], p["ff_b2"])

    grid_spec = pltpu.PrefetchScalarGridSpec(
        num_scalar_prefetch=2,
        grid=(B,),
        in_specs=[
            pl.BlockSpec((1, St, E), lambda b, *_: (b, 0, 0)),   # x (full sequence)
            pl.BlockSpec((1, Ss, E), lambda b, *_: (b, 0, 0)),   # encoder output
        ] + [const_spec(w) for w in weights],
        out_specs=pl.BlockSpec((1, St, E), lambda b, *_: (b, 0, 0)),
    )

    # Advisory cost hint (K/V projected once per batch, no recompute).
    self_flops = 8 * St * E * E + 4 * St * St * E
    cross_flops = 4 * St * E * E + 4 * Ss * E * E + 4 * St * Ss * E
    ff_flops = 4 * St * E * Hd
    flops = B * (self_flops + cross_flops + ff_flops)
    transcendentals = B * H * (St * St + St * Ss)
    bytes_accessed = (2 * (2 * B * St * E + B * Ss * E)             # bf16 activations
                      + 2 * (2 * 4 * E * E + 2 * E * Hd)            # bf16 weights
                      + 4 * (2 * 4 * E + Hd + E + 6 * E))           # f32 biases + LN

    kernel = functools.partial(decoder_block_kernel, num_heads=num_heads)
    return pl.pallas_call(
        kernel,
        out_shape=jax.ShapeDtypeStruct((B, St, E), x.dtype),
        grid_spec=grid_spec,
        compiler_params=pltpu.CompilerParams(
            dimension_semantics=("parallel",),
            # 48 MiB keeps headroom on v7x (64 MiB physical); raise toward
            # ~100 MiB on v5e/v6e when scaling St/E/Hd.
            vmem_limit_bytes=48 * 1024 * 1024),
        cost_estimate=pl.CostEstimate(flops=flops,
                                      transcendentals=transcendentals,
                                      bytes_accessed=bytes_accessed),
    )(trg_len, src_len, x, src_enc, *weights)


# ----------------------------- parameter prep (hoisted to init) -----------------------------

def prep_block_params(blk, num_heads):
    """One-time layout/dtype prep: fused [E,E]/[E,2E] bf16 weights, scale folded into W_q."""
    E = blk["w_self"].shape[-1]
    dh = E // num_heads
    scale = 1.0 / math.sqrt(dh)

    def split(w, b):          # w: [4, E, E] (Wq, Wk, Wv, Wo), b: [4, E]
        w_q = (w[0] * scale).astype(jnp.bfloat16)                         # [E, E]
        b_q = (b[0] * scale).reshape(1, E).astype(jnp.float32)
        w_kv = jnp.concatenate([w[1], w[2]], axis=-1).astype(jnp.bfloat16)  # [E, 2E]
        b_kv = jnp.concatenate([b[1], b[2]], axis=0).reshape(1, 2 * E).astype(jnp.float32)
        w_o = w[3].astype(jnp.bfloat16)                                   # [E, E]
        b_o = b[3].reshape(1, E).astype(jnp.float32)
        return w_q, b_q, w_kv, b_kv, w_o, b_o

    w_sq, b_sq, w_skv, b_skv, w_so, b_so = split(blk["w_self"], blk["b_self"])
    w_cq, b_cq, w_ckv, b_ckv, w_co, b_co = split(blk["w_cross"], blk["b_cross"])
    return {
        "w_self_q": w_sq, "b_self_q": b_sq, "w_self_kv": w_skv, "b_self_kv": b_skv,
        "w_self_o": w_so, "b_self_o": b_so,
        "w_cross_q": w_cq, "b_cross_q": b_cq, "w_cross_kv": w_ckv, "b_cross_kv": b_ckv,
        "w_cross_o": w_co, "b_cross_o": b_co,
        "ln_g": blk["ln_g"].reshape(3, 1, E).astype(jnp.float32),
        "ln_b": blk["ln_b"].reshape(3, 1, E).astype(jnp.float32),
        "ff_w1": blk["ff_w1"].astype(jnp.bfloat16),
        "ff_b1": blk["ff_b1"].astype(jnp.float32),
        "ff_w2": blk["ff_w2"].astype(jnp.bfloat16),
        "ff_b2": blk["ff_b2"].astype(jnp.float32),
    }


def prep_decoder_params(params, num_heads):
    return {
        "tok_emb": params["tok_emb"].astype(jnp.float32),
        "blocks": [prep_block_params(blk, num_heads) for blk in params["blocks"]],
    }


# ----------------------------- glue (embedding, pos-enc, lengths) -----------------------------

def positional_encoding(seq_len, embed_dim):
    pos = jnp.arange(seq_len, dtype=jnp.float32)[:, None]
    i = jnp.arange(0, embed_dim, 2, dtype=jnp.float32)
    angle = pos / jnp.power(10000.0, i / embed_dim)
    pe = jnp.zeros((seq_len, embed_dim), jnp.float32)
    pe = pe.at[:, 0::2].set(jnp.sin(angle))
    pe = pe.at[:, 1::2].set(jnp.cos(angle))
    return pe


def decoder_forward(trg_tokens, src_enc, trg_mask, subsq_mask, src_trg_mask,
                    prepped, num_heads):
    del subsq_mask
    # TODO(synk): subsq_mask is assumed to be the standard lower-triangular causal
    # mask (rebuilt in-kernel via iota) and trg_mask/src_trg_mask are assumed to be
    # contiguous padding masks (reduced to per-batch lengths for scalar prefetch).
    x = prepped["tok_emb"][trg_tokens]                       # [B, St, E] gather (plain JAX)
    B, St, E = x.shape
    x = (x + positional_encoding(St, E)[None, :, :]).astype(jnp.bfloat16)
    src_enc = src_enc.astype(jnp.bfloat16)

    trg_len = jnp.sum((trg_mask > 0).astype(jnp.int32), axis=1).astype(jnp.int32)
    src_len = jnp.sum((src_trg_mask > 0).astype(jnp.int32), axis=1).astype(jnp.int32)

    for blk in prepped["blocks"]:
        x = decoder_block(x, src_enc, trg_len, src_len, blk, num_heads)
    return x


# ----------------------------- deterministic parameter init -----------------------------

def init_params(key, embed_dim, vocab, hidden_dim, n_blocks):
    keys = jax.random.split(key, 1 + n_blocks)

    def block_params(k):
        ks = jax.random.split(k, 4)
        s = 0.02
        return {
            "w_self": jax.random.normal(ks[0], (4, embed_dim, embed_dim), jnp.float32) * s,
            "b_self": jnp.zeros((4, embed_dim), jnp.float32),
            "w_cross": jax.random.normal(ks[1], (4, embed_dim, embed_dim), jnp.float32) * s,
            "b_cross": jnp.zeros((4, embed_dim), jnp.float32),
            "ln_g": jnp.ones((3, embed_dim), jnp.float32),
            "ln_b": jnp.zeros((3, embed_dim), jnp.float32),
            "ff_w1": jax.random.normal(ks[2], (embed_dim, hidden_dim), jnp.float32) * s,
            "ff_b1": jnp.zeros((1, hidden_dim), jnp.float32),
            "ff_w2": jax.random.normal(ks[3], (hidden_dim, embed_dim), jnp.float32) * s,
            "ff_b2": jnp.zeros((1, embed_dim), jnp.float32),
        }

    return {
        "tok_emb": jax.random.normal(keys[0], (vocab, embed_dim), jnp.float32) * 0.02,
        "blocks": [block_params(k) for k in keys[1:]],
    }


# ----------------------------- main -----------------------------

if __name__ == "__main__":
    # Small but lane-dense shapes: E multiple of 128, seq multiple of 16 (bf16 sublanes).
    B, St, Ss = 2, 32, 32
    embed_dim, hidden_dim, num_heads, vocab, N = 128, 256, 4, 64, 2

    key = jax.random.PRNGKey(0)
    k_par, k_tok, k_enc = jax.random.split(key, 3)

    params = init_params(k_par, embed_dim, vocab, hidden_dim, N)
    prepped = prep_decoder_params(params, num_heads)          # one-time weight prep

    trg_tokens = jax.random.randint(k_tok, (B, St), 0, vocab, dtype=jnp.int32)
    src_enc = jax.random.normal(k_enc, (B, Ss, embed_dim), jnp.float32)

    trg_mask = jnp.ones((B, St), jnp.float32).at[1, St - 5:].set(0.0)      # pad tail of batch 1
    subsq_mask = jnp.tril(jnp.ones((St, St), jnp.float32))                  # causal
    src_trg_mask = jnp.ones((B, Ss), jnp.float32).at[0, Ss - 2:].set(0.0)   # pad tail of batch 0

    out = decoder_forward(trg_tokens, src_enc, trg_mask, subsq_mask,
                          src_trg_mask, prepped, num_heads)
    out = jax.block_until_ready(out)
    assert out.shape == (B, St, embed_dim)
    assert bool(jnp.all(jnp.isfinite(out.astype(jnp.float32))))
    print("KERNEL_OK")
</pallas_src>

<mosaic_0001>
module attributes {stable_mosaic.version = 11 : i64} {
  func.func @decoder_block_kernel(%arg0: i32, %arg1: memref<2xi32, #tpu.memory_space<smem>>, %arg2: memref<2xi32, #tpu.memory_space<smem>>, %arg3: memref<1x32x128xbf16, #tpu.memory_space<vmem>>, %arg4: memref<1x32x128xbf16, #tpu.memory_space<vmem>>, %arg5: memref<128x128xbf16, #tpu.memory_space<vmem>>, %arg6: memref<1x128xf32, #tpu.memory_space<vmem>>, %arg7: memref<128x256xbf16, #tpu.memory_space<vmem>>, %arg8: memref<1x256xf32, #tpu.memory_space<vmem>>, %arg9: memref<128x128xbf16, #tpu.memory_space<vmem>>, %arg10: memref<1x128xf32, #tpu.memory_space<vmem>>, %arg11: memref<128x128xbf16, #tpu.memory_space<vmem>>, %arg12: memref<1x128xf32, #tpu.memory_space<vmem>>, %arg13: memref<128x256xbf16, #tpu.memory_space<vmem>>, %arg14: memref<1x256xf32, #tpu.memory_space<vmem>>, %arg15: memref<128x128xbf16, #tpu.memory_space<vmem>>, %arg16: memref<1x128xf32, #tpu.memory_space<vmem>>, %arg17: memref<3x1x128xf32, #tpu.memory_space<vmem>>, %arg18: memref<3x1x128xf32, #tpu.memory_space<vmem>>, %arg19: memref<128x256xbf16, #tpu.memory_space<vmem>>, %arg20: memref<1x256xf32, #tpu.memory_space<vmem>>, %arg21: memref<256x128xbf16, #tpu.memory_space<vmem>>, %arg22: memref<1x128xf32, #tpu.memory_space<vmem>>, %arg23: memref<1x32x128xbf16, #tpu.memory_space<vmem>>) attributes {dimension_semantics = [#tpu.dimension_semantics<parallel>], iteration_bounds = array<i64: 2>, scalar_prefetch = 2 : i64, scratch_operands = 0 : i64, tpu.core_type = #tpu.core_type<tc>, window_params = [{transform_indices = @transform_0, window_bounds = array<i64: 1, 32, 128>}, {transform_indices = @transform_1, window_bounds = array<i64: 1, 32, 128>}, {pipeline_mode = #tpu.pipeline_mode<synchronous>, transform_indices = @transform_2, window_bounds = array<i64: 128, 128>}, {pipeline_mode = #tpu.pipeline_mode<synchronous>, transform_indices = @transform_3, window_bounds = array<i64: 1, 128>}, {pipeline_mode = #tpu.pipeline_mode<synchronous>, transform_indices = @transform_4, window_bounds = array<i64: 128, 256>}, {pipeline_mode = #tpu.pipeline_mode<synchronous>, transform_indices = @transform_5, window_bounds = array<i64: 1, 256>}, {pipeline_mode = #tpu.pipeline_mode<synchronous>, transform_indices = @transform_6, window_bounds = array<i64: 128, 128>}, {pipeline_mode = #tpu.pipeline_mode<synchronous>, transform_indices = @transform_7, window_bounds = array<i64: 1, 128>}, {pipeline_mode = #tpu.pipeline_mode<synchronous>, transform_indices = @transform_8, window_bounds = array<i64: 128, 128>}, {pipeline_mode = #tpu.pipeline_mode<synchronous>, transform_indices = @transform_9, window_bounds = array<i64: 1, 128>}, {pipeline_mode = #tpu.pipeline_mode<synchronous>, transform_indices = @transform_10, window_bounds = array<i64: 128, 256>}, {pipeline_mode = #tpu.pipeline_mode<synchronous>, transform_indices = @transform_11, window_bounds = array<i64: 1, 256>}, {pipeline_mode = #tpu.pipeline_mode<synchronous>, transform_indices = @transform_12, window_bounds = array<i64: 128, 128>}, {pipeline_mode = #tpu.pipeline_mode<synchronous>, transform_indices = @transform_13, window_bounds = array<i64: 1, 128>}, {pipeline_mode = #tpu.pipeline_mode<synchronous>, transform_indices = @transform_14, window_bounds = array<i64: 3, 1, 128>}, {pipeline_mode = #tpu.pipeline_mode<synchronous>, transform_indices = @transform_15, window_bounds = array<i64: 3, 1, 128>}, {pipeline_mode = #tpu.pipeline_mode<synchronous>, transform_indices = @transform_16, window_bounds = array<i64: 128, 256>}, {pipeline_mode = #tpu.pipeline_mode<synchronous>, transform_indices = @transform_17, window_bounds = array<i64: 1, 256>}, {pipeline_mode = #tpu.pipeline_mode<synchronous>, transform_indices = @transform_18, window_bounds = array<i64: 256, 128>}, {pipeline_mode = #tpu.pipeline_mode<synchronous>, transform_indices = @transform_19, window_bounds = array<i64: 1, 128>}, {transform_indices = @transform_20, window_bounds = array<i64: 1, 32, 128>}]} {
    %c0 = arith.constant 0 : index
    %c0_0 = arith.constant 0 : index
    %c0_1 = arith.constant 0 : index
    %0 = vector.load %arg3[%c0, %c0_0, %c0_1] : memref<1x32x128xbf16, #tpu.memory_space<vmem>>, vector<1x32x128xbf16>
    %1 = vector.shape_cast %0 : vector<1x32x128xbf16> to vector<32x128xbf16>
    %c0_2 = arith.constant 0 : index
    %c0_3 = arith.constant 0 : index
    %c0_4 = arith.constant 0 : index
    %2 = vector.load %arg4[%c0_2, %c0_3, %c0_4] : memref<1x32x128xbf16, #tpu.memory_space<vmem>>, vector<1x32x128xbf16>
    %3 = vector.shape_cast %2 : vector<1x32x128xbf16> to vector<32x128xbf16>
    %4 = arith.index_cast %arg0 : i32 to index
    %5 = memref.load %arg1[%4] : memref<2xi32, #tpu.memory_space<smem>>
    %6 = arith.index_cast %arg0 : i32 to index
    %7 = memref.load %arg2[%6] : memref<2xi32, #tpu.memory_space<smem>>
    %8 = tpu.iota {dimensions = array<i32: 0>} : vector<32x32xi32>
    %9 = tpu.iota {dimensions = array<i32: 1>} : vector<32x32xi32>
    %10 = arith.cmpi sle, %9, %8 : vector<32x32xi32>
    %11 = vector.broadcast %5 : i32 to vector<32x32xi32>
    %12 = arith.cmpi slt, %9, %11 : vector<32x32xi32>
    %13 = arith.andi %10, %12 : vector<32x32xi1>
    %cst = arith.constant 0.000000e+00 : f32
    %cst_5 = arith.constant -1.000000e+09 : f32
    %14 = vector.broadcast %cst : f32 to vector<32x32xf32>
    %15 = vector.broadcast %cst_5 : f32 to vector<32x32xf32>
    %16 = arith.select %13, %14, %15 : vector<32x32xi1>, vector<32x32xf32>
    %17 = tpu.iota {dimensions = array<i32: 1>} : vector<32x32xi32>
    %18 = vector.broadcast %7 : i32 to vector<32x32xi32>
    %19 = arith.cmpi slt, %17, %18 : vector<32x32xi32>
    %cst_6 = arith.constant 0.000000e+00 : f32
    %cst_7 = arith.constant -1.000000e+09 : f32
    %20 = vector.broadcast %cst_6 : f32 to vector<32x32xf32>
    %21 = vector.broadcast %cst_7 : f32 to vector<32x32xf32>
    %22 = arith.select %19, %20, %21 : vector<32x32xi1>, vector<32x32xf32>
    %23 = arith.extf %1 : vector<32x128xbf16> to vector<32x128xf32>
    %c0_8 = arith.constant 0 : index
    %c0_9 = arith.constant 0 : index
    %24 = vector.load %arg5[%c0_8, %c0_9] : memref<128x128xbf16, #tpu.memory_space<vmem>>, vector<128x128xbf16>
    %cst_10 = arith.constant dense<0.000000e+00> : vector<32x128xf32>
    %25 = tpu.matmul %1, %24, %cst_10 {dimension_numbers = #tpu.dot_dimension_numbers<[1], [0], [0], [1], [0, 0, 1, 1], [], []>} : vector<32x128xbf16>, vector<128x128xbf16>, vector<32x128xf32> -> vector<32x128xf32>
    %c0_11 = arith.constant 0 : index
    %c0_12 = arith.constant 0 : index
    %26 = vector.load %arg6[%c0_11, %c0_12] : memref<1x128xf32, #tpu.memory_space<vmem>>, vector<1x128xf32>
    %27 = vector.broadcast %26 : vector<1x128xf32> to vector<32x128xf32>
    %28 = arith.addf %25, %27 : vector<32x128xf32>
    %29 = arith.truncf %28 : vector<32x128xf32> to vector<32x128xbf16>
    %c0_13 = arith.constant 0 : index
    %c0_14 = arith.constant 0 : index
    %30 = vector.load %arg7[%c0_13, %c0_14] : memref<128x256xbf16, #tpu.memory_space<vmem>>, vector<128x256xbf16>
    %cst_15 = arith.constant dense<0.000000e+00> : vector<32x256xf32>
    %31 = tpu.matmul %1, %30, %cst_15 {dimension_numbers = #tpu.dot_dimension_numbers<[1], [0], [0], [1], [0, 0, 1, 1], [], []>} : vector<32x128xbf16>, vector<128x256xbf16>, vector<32x256xf32> -> vector<32x256xf32>
    %c0_16 = arith.constant 0 : index
    %c0_17 = arith.constant 0 : index
    %32 = vector.load %arg8[%c0_16, %c0_17] : memref<1x256xf32, #tpu.memory_space<vmem>>, vector<1x256xf32>
    %33 = vector.broadcast %32 : vector<1x256xf32> to vector<32x256xf32>
    %34 = arith.addf %31, %33 : vector<32x256xf32>
    %35 = vector.extract_strided_slice %34 {offsets = [0, 0], sizes = [32, 128], strides = [1, 1]} : vector<32x256xf32> to vector<32x128xf32>
    %36 = arith.truncf %35 : vector<32x128xf32> to vector<32x128xbf16>
    %37 = vector.extract_strided_slice %34 {offsets = [0, 128], sizes = [32, 128], strides = [1, 1]} : vector<32x256xf32> to vector<32x128xf32>
    %38 = arith.truncf %37 : vector<32x128xf32> to vector<32x128xbf16>
    %39 = vector.extract_strided_slice %29 {offsets = [0, 0], sizes = [32, 32], strides = [1, 1]} : vector<32x128xbf16> to vector<32x32xbf16>
    %40 = vector.extract_strided_slice %36 {offsets = [0, 0], sizes = [32, 32], strides = [1, 1]} : vector<32x128xbf16> to vector<32x32xbf16>
    %cst_18 = arith.constant dense<0.000000e+00> : vector<32x32xf32>
    %41 = tpu.matmul %39, %40, %cst_18 {dimension_numbers = #tpu.dot_dimension_numbers<[1], [1], [0], [0], [0, 0, 1, 0], [], []>} : vector<32x32xbf16>, vector<32x32xbf16>, vector<32x32xf32> -> vector<32x32xf32>
    %42 = arith.addf %41, %16 : vector<32x32xf32>
    %cst_19 = arith.constant dense<0xFF800000> : vector<32xf32>
    %43 = vector.multi_reduction <maximumf>, %42, %cst_19 [1] : vector<32x32xf32> to vector<32xf32>
    %44 = vector.shape_cast %43 : vector<32xf32> to vector<32x1xf32>
    %45 = vector.broadcast %44 : vector<32x1xf32> to vector<32x32xf32>
    %46 = arith.subf %42, %45 : vector<32x32xf32>
    %47 = math.exp %46 : vector<32x32xf32>
    %cst_20 = arith.constant dense<0.000000e+00> : vector<32xf32>
    %48 = vector.multi_reduction <add>, %47, %cst_20 [1] : vector<32x32xf32> to vector<32xf32>
    %49 = vector.shape_cast %48 : vector<32xf32> to vector<32x1xf32>
    %50 = tpu.reciprocal %49 {approx = true} : vector<32x1xf32> -> vector<32x1xf32>
    %51 = vector.broadcast %50 : vector<32x1xf32> to vector<32x32xf32>
    %52 = arith.mulf %47, %51 : vector<32x32xf32>
    %53 = arith.truncf %52 : vector<32x32xf32> to vector<32x32xbf16>
    %54 = vector.extract_strided_slice %38 {offsets = [0, 0], sizes = [32, 32], strides = [1, 1]} : vector<32x128xbf16> to vector<32x32xbf16>
    %cst_21 = arith.constant dense<0.000000e+00> : vector<32x32xf32>
    %55 = tpu.matmul %53, %54, %cst_21 {dimension_numbers = #tpu.dot_dimension_numbers<[1], [0], [0], [1], [0, 0, 1, 1], [], []>} : vector<32x32xbf16>, vector<32x32xbf16>, vector<32x32xf32> -> vector<32x32xf32>
    %56 = arith.truncf %55 : vector<32x32xf32> to vector<32x32xbf16>
    %57 = vector.extract_strided_slice %29 {offsets = [0, 32], sizes = [32, 32], strides = [1, 1]} : vector<32x128xbf16> to vector<32x32xbf16>
    %58 = vector.extract_strided_slice %36 {offsets = [0, 32], sizes = [32, 32], strides = [1, 1]} : vector<32x128xbf16> to vector<32x32xbf16>
    %cst_22 = arith.constant dense<0.000000e+00> : vector<32x32xf32>
    %59 = tpu.matmul %57, %58, %cst_22 {dimension_numbers = #tpu.dot_dimension_numbers<[1], [1], [0], [0], [0, 0, 1, 0], [], []>} : vector<32x32xbf16>, vector<32x32xbf16>, vector<32x32xf32> -> vector<32x32xf32>
    %60 = arith.addf %59, %16 : vector<32x32xf32>
    %cst_23 = arith.constant dense<0xFF800000> : vector<32xf32>
    %61 = vector.multi_reduction <maximumf>, %60, %cst_23 [1] : vector<32x32xf32> to vector<32xf32>
    %62 = vector.shape_cast %61 : vector<32xf32> to vector<32x1xf32>
    %63 = vector.broadcast %62 : vector<32x1xf32> to vector<32x32xf32>
    %64 = arith.subf %60, %63 : vector<32x32xf32>
    %65 = math.exp %64 : vector<32x32xf32>
    %cst_24 = arith.constant dense<0.000000e+00> : vector<32xf32>
    %66 = vector.multi_reduction <add>, %65, %cst_24 [1] : vector<32x32xf32> to vector<32xf32>
    %67 = vector.shape_cast %66 : vector<32xf32> to vector<32x1xf32>
    %68 = tpu.reciprocal %67 {approx = true} : vector<32x1xf32> -> vector<32x1xf32>
    %69 = vector.broadcast %68 : vector<32x1xf32> to vector<32x32xf32>
    %70 = arith.mulf %65, %69 : vector<32x32xf32>
    %71 = arith.truncf %70 : vector<32x32xf32> to vector<32x32xbf16>
    %72 = vector.extract_strided_slice %38 {offsets = [0, 32], sizes = [32, 32], strides = [1, 1]} : vector<32x128xbf16> to vector<32x32xbf16>
    %cst_25 = arith.constant dense<0.000000e+00> : vector<32x32xf32>
    %73 = tpu.matmul %71, %72, %cst_25 {dimension_numbers = #tpu.dot_dimension_numbers<[1], [0], [0], [1], [0, 0, 1, 1], [], []>} : vector<32x32xbf16>, vector<32x32xbf16>, vector<32x32xf32> -> vector<32x32xf32>
    %74 = arith.truncf %73 : vector<32x32xf32> to vector<32x32xbf16>
    %75 = vector.extract_strided_slice %29 {offsets = [0, 64], sizes = [32, 32], strides = [1, 1]} : vector<32x128xbf16> to vector<32x32xbf16>
    %76 = vector.extract_strided_slice %36 {offsets = [0, 64], sizes = [32, 32], strides = [1, 1]} : vector<32x128xbf16> to vector<32x32xbf16>
    %cst_26 = arith.constant dense<0.000000e+00> : vector<32x32xf32>
    %77 = tpu.matmul %75, %76, %cst_26 {dimension_numbers = #tpu.dot_dimension_numbers<[1], [1], [0], [0], [0, 0, 1, 0], [], []>} : vector<32x32xbf16>, vector<32x32xbf16>, vector<32x32xf32> -> vector<32x32xf32>
    %78 = arith.addf %77, %16 : vector<32x32xf32>
    %cst_27 = arith.constant dense<0xFF800000> : vector<32xf32>
    %79 = vector.multi_reduction <maximumf>, %78, %cst_27 [1] : vector<32x32xf32> to vector<32xf32>
    %80 = vector.shape_cast %79 : vector<32xf32> to vector<32x1xf32>
    %81 = vector.broadcast %80 : vector<32x1xf32> to vector<32x32xf32>
    %82 = arith.subf %78, %81 : vector<32x32xf32>
    %83 = math.exp %82 : vector<32x32xf32>
    %cst_28 = arith.constant dense<0.000000e+00> : vector<32xf32>
    %84 = vector.multi_reduction <add>, %83, %cst_28 [1] : vector<32x32xf32> to vector<32xf32>
    %85 = vector.shape_cast %84 : vector<32xf32> to vector<32x1xf32>
    %86 = tpu.reciprocal %85 {approx = true} : vector<32x1xf32> -> vector<32x1xf32>
    %87 = vector.broadcast %86 : vector<32x1xf32> to vector<32x32xf32>
    %88 = arith.mulf %83, %87 : vector<32x32xf32>
    %89 = arith.truncf %88 : vector<32x32xf32> to vector<32x32xbf16>
    %90 = vector.extract_strided_slice %38 {offsets = [0, 64], sizes = [32, 32], strides = [1, 1]} : vector<32x128xbf16> to vector<32x32xbf16>
    %cst_29 = arith.constant dense<0.000000e+00> : vector<32x32xf32>
    %91 = tpu.matmul %89, %90, %cst_29 {dimension_numbers = #tpu.dot_dimension_numbers<[1], [0], [0], [1], [0, 0, 1, 1], [], []>} : vector<32x32xbf16>, vector<32x32xbf16>, vector<32x32xf32> -> vector<32x32xf32>
    %92 = arith.truncf %91 : vector<32x32xf32> to vector<32x32xbf16>
    %93 = vector.extract_strided_slice %29 {offsets = [0, 96], sizes = [32, 32], strides = [1, 1]} : vector<32x128xbf16> to vector<32x32xbf16>
    %94 = vector.extract_strided_slice %36 {offsets = [0, 96], sizes = [32, 32], strides = [1, 1]} : vector<32x128xbf16> to vector<32x32xbf16>
    %cst_30 = arith.constant dense<0.000000e+00> : vector<32x32xf32>
    %95 = tpu.matmul %93, %94, %cst_30 {dimension_numbers = #tpu.dot_dimension_numbers<[1], [1], [0], [0], [0, 0, 1, 0], [], []>} : vector<32x32xbf16>, vector<32x32xbf16>, vector<32x32xf32> -> vector<32x32xf32>
    %96 = arith.addf %95, %16 : vector<32x32xf32>
    %cst_31 = arith.constant dense<0xFF800000> : vector<32xf32>
    %97 = vector.multi_reduction <maximumf>, %96, %cst_31 [1] : vector<32x32xf32> to vector<32xf32>
    %98 = vector.shape_cast %97 : vector<32xf32> to vector<32x1xf32>
    %99 = vector.broadcast %98 : vector<32x1xf32> to vector<32x32xf32>
    %100 = arith.subf %96, %99 : vector<32x32xf32>
    %101 = math.exp %100 : vector<32x32xf32>
    %cst_32 = arith.constant dense<0.000000e+00> : vector<32xf32>
    %102 = vector.multi_reduction <add>, %101, %cst_32 [1] : vector<32x32xf32> to vector<32xf32>
    %103 = vector.shape_cast %102 : vector<32xf32> to vector<32x1xf32>
    %104 = tpu.reciprocal %103 {approx = true} : vector<32x1xf32> -> vector<32x1xf32>
    %105 = vector.broadcast %104 : vector<32x1xf32> to vector<32x32xf32>
    %106 = arith.mulf %101, %105 : vector<32x32xf32>
    %107 = arith.truncf %106 : vector<32x32xf32> to vector<32x32xbf16>
    %108 = vector.extract_strided_slice %38 {offsets = [0, 96], sizes = [32, 32], strides = [1, 1]} : vector<32x128xbf16> to vector<32x32xbf16>
    %cst_33 = arith.constant dense<0.000000e+00> : vector<32x32xf32>
    %109 = tpu.matmul %107, %108, %cst_33 {dimension_numbers = #tpu.dot_dimension_numbers<[1], [0], [0], [1], [0, 0, 1, 1], [], []>} : vector<32x32xbf16>, vector<32x32xbf16>, vector<32x32xf32> -> vector<32x32xf32>
    %110 = arith.truncf %109 : vector<32x32xf32> to vector<32x32xbf16>
    %111 = tpu.concatenate %56, %74, %92, %110 in 1 : vector<32x32xbf16>, vector<32x32xbf16>, vector<32x32xbf16>, vector<32x32xbf16> -> vector<32x128xbf16>
    %c0_34 = arith.constant 0 : index
    %c0_35 = arith.constant 0 : index
    %112 = vector.load %arg9[%c0_34, %c0_35] : memref<128x128xbf16, #tpu.memory_space<vmem>>, vector<128x128xbf16>
    %cst_36 = arith.constant dense<0.000000e+00> : vector<32x128xf32>
    %113 = tpu.matmul %111, %112, %cst_36 {dimension_numbers = #tpu.dot_dimension_numbers<[1], [0], [0], [1], [0, 0, 1, 1], [], []>} : vector<32x128xbf16>, vector<128x128xbf16>, vector<32x128xf32> -> vector<32x128xf32>
    %c0_37 = arith.constant 0 : index
    %c0_38 = arith.constant 0 : index
    %114 = vector.load %arg10[%c0_37, %c0_38] : memref<1x128xf32, #tpu.memory_space<vmem>>, vector<1x128xf32>
    %115 = vector.broadcast %114 : vector<1x128xf32> to vector<32x128xf32>
    %116 = arith.addf %113, %115 : vector<32x128xf32>
    %117 = arith.addf %23, %116 : vector<32x128xf32>
    %c0_39 = arith.constant 0 : index
    %c0_40 = arith.constant 0 : index
    %c0_41 = arith.constant 0 : index
    %118 = vector.load %arg17[%c0_39, %c0_40, %c0_41] : memref<3x1x128xf32, #tpu.memory_space<vmem>>, vector<1x1x128xf32>
    %119 = vector.shape_cast %118 : vector<1x1x128xf32> to vector<1x128xf32>
    %c0_42 = arith.constant 0 : index
    %c0_43 = arith.constant 0 : index
    %c0_44 = arith.constant 0 : index
    %120 = vector.load %arg18[%c0_42, %c0_43, %c0_44] : memref<3x1x128xf32, #tpu.memory_space<vmem>>, vector<1x1x128xf32>
    %121 = vector.shape_cast %120 : vector<1x1x128xf32> to vector<1x128xf32>
    %cst_45 = arith.constant dense<0.000000e+00> : vector<32xf32>
    %122 = vector.multi_reduction <add>, %117, %cst_45 [1] : vector<32x128xf32> to vector<32xf32>
    %123 = vector.shape_cast %122 : vector<32xf32> to vector<32x1xf32>
    %cst_46 = arith.constant 1.280000e+02 : f32
    %124 = vector.broadcast %cst_46 : f32 to vector<32x1xf32>
    %125 = arith.divf %123, %124 : vector<32x1xf32>
    %126 = vector.broadcast %125 : vector<32x1xf32> to vector<32x128xf32>
    %127 = arith.subf %117, %126 : vector<32x128xf32>
    %128 = arith.mulf %127, %127 : vector<32x128xf32>
    %cst_47 = arith.constant dense<0.000000e+00> : vector<32xf32>
    %129 = vector.multi_reduction <add>, %128, %cst_47 [1] : vector<32x128xf32> to vector<32xf32>
    %130 = vector.shape_cast %129 : vector<32xf32> to vector<32x1xf32>
    %cst_48 = arith.constant 1.280000e+02 : f32
    %131 = vector.broadcast %cst_48 : f32 to vector<32x1xf32>
    %132 = arith.divf %130, %131 : vector<32x1xf32>
    %cst_49 = arith.constant 9.99999974E-6 : f32
    %133 = vector.broadcast %cst_49 : f32 to vector<32x1xf32>
    %134 = arith.addf %132, %133 : vector<32x1xf32>
    %135 = math.rsqrt %134 : vector<32x1xf32>
    %136 = vector.broadcast %135 : vector<32x1xf32> to vector<32x128xf32>
    %137 = arith.mulf %127, %136 : vector<32x128xf32>
    %138 = vector.broadcast %119 : vector<1x128xf32> to vector<32x128xf32>
    %139 = arith.mulf %137, %138 : vector<32x128xf32>
    %140 = vector.broadcast %121 : vector<1x128xf32> to vector<32x128xf32>
    %141 = arith.addf %139, %140 : vector<32x128xf32>
    %142 = arith.truncf %141 : vector<32x128xf32> to vector<32x128xbf16>
    %c0_50 = arith.constant 0 : index
    %c0_51 = arith.constant 0 : index
    %143 = vector.load %arg11[%c0_50, %c0_51] : memref<128x128xbf16, #tpu.memory_space<vmem>>, vector<128x128xbf16>
    %cst_52 = arith.constant dense<0.000000e+00> : vector<32x128xf32>
    %144 = tpu.matmul %142, %143, %cst_52 {dimension_numbers = #tpu.dot_dimension_numbers<[1], [0], [0], [1], [0, 0, 1, 1], [], []>} : vector<32x128xbf16>, vector<128x128xbf16>, vector<32x128xf32> -> vector<32x128xf32>
    %c0_53 = arith.constant 0 : index
    %c0_54 = arith.constant 0 : index
    %145 = vector.load %arg12[%c0_53, %c0_54] : memref<1x128xf32, #tpu.memory_space<vmem>>, vector<1x128xf32>
    %146 = vector.broadcast %145 : vector<1x128xf32> to vector<32x128xf32>
    %147 = arith.addf %144, %146 : vector<32x128xf32>
    %148 = arith.truncf %147 : vector<32x128xf32> to vector<32x128xbf16>
    %c0_55 = arith.constant 0 : index
    %c0_56 = arith.constant 0 : index
    %149 = vector.load %arg13[%c0_55, %c0_56] : memref<128x256xbf16, #tpu.memory_space<vmem>>, vector<128x256xbf16>
    %cst_57 = arith.constant dense<0.000000e+00> : vector<32x256xf32>
    %150 = tpu.matmul %3, %149, %cst_57 {dimension_numbers = #tpu.dot_dimension_numbers<[1], [0], [0], [1], [0, 0, 1, 1], [], []>} : vector<32x128xbf16>, vector<128x256xbf16>, vector<32x256xf32> -> vector<32x256xf32>
    %c0_58 = arith.constant 0 : index
    %c0_59 = arith.constant 0 : index
    %151 = vector.load %arg14[%c0_58, %c0_59] : memref<1x256xf32, #tpu.memory_space<vmem>>, vector<1x256xf32>
    %152 = vector.broadcast %151 : vector<1x256xf32> to vector<32x256xf32>
    %153 = arith.addf %150, %152 : vector<32x256xf32>
    %154 = vector.extract_strided_slice %153 {offsets = [0, 0], sizes = [32, 128], strides = [1, 1]} : vector<32x256xf32> to vector<32x128xf32>
    %155 = arith.truncf %154 : vector<32x128xf32> to vector<32x128xbf16>
    %156 = vector.extract_strided_slice %153 {offsets = [0, 128], sizes = [32, 128], strides = [1, 1]} : vector<32x256xf32> to vector<32x128xf32>
    %157 = arith.truncf %156 : vector<32x128xf32> to vector<32x128xbf16>
    %158 = vector.extract_strided_slice %148 {offsets = [0, 0], sizes = [32, 32], strides = [1, 1]} : vector<32x128xbf16> to vector<32x32xbf16>
    %159 = vector.extract_strided_slice %155 {offsets = [0, 0], sizes = [32, 32], strides = [1, 1]} : vector<32x128xbf16> to vector<32x32xbf16>
    %cst_60 = arith.constant dense<0.000000e+00> : vector<32x32xf32>
    %160 = tpu.matmul %158, %159, %cst_60 {dimension_numbers = #tpu.dot_dimension_numbers<[1], [1], [0], [0], [0, 0, 1, 0], [], []>} : vector<32x32xbf16>, vector<32x32xbf16>, vector<32x32xf32> -> vector<32x32xf32>
    %161 = arith.addf %160, %22 : vector<32x32xf32>
    %cst_61 = arith.constant dense<0xFF800000> : vector<32xf32>
    %162 = vector.multi_reduction <maximumf>, %161, %cst_61 [1] : vector<32x32xf32> to vector<32xf32>
    %163 = vector.shape_cast %162 : vector<32xf32> to vector<32x1xf32>
    %164 = vector.broadcast %163 : vector<32x1xf32> to vector<32x32xf32>
    %165 = arith.subf %161, %164 : vector<32x32xf32>
    %166 = math.exp %165 : vector<32x32xf32>
    %cst_62 = arith.constant dense<0.000000e+00> : vector<32xf32>
    %167 = vector.multi_reduction <add>, %166, %cst_62 [1] : vector<32x32xf32> to vector<32xf32>
    %168 = vector.shape_cast %167 : vector<32xf32> to vector<32x1xf32>
    %169 = tpu.reciprocal %168 {approx = true} : vector<32x1xf32> -> vector<32x1xf32>
    %170 = vector.broadcast %169 : vector<32x1xf32> to vector<32x32xf32>
    %171 = arith.mulf %166, %170 : vector<32x32xf32>
    %172 = arith.truncf %171 : vector<32x32xf32> to vector<32x32xbf16>
    %173 = vector.extract_strided_slice %157 {offsets = [0, 0], sizes = [32, 32], strides = [1, 1]} : vector<32x128xbf16> to vector<32x32xbf16>
    %cst_63 = arith.constant dense<0.000000e+00> : vector<32x32xf32>
    %174 = tpu.matmul %172, %173, %cst_63 {dimension_numbers = #tpu.dot_dimension_numbers<[1], [0], [0], [1], [0, 0, 1, 1], [], []>} : vector<32x32xbf16>, vector<32x32xbf16>, vector<32x32xf32> -> vector<32x32xf32>
    %175 = arith.truncf %174 : vector<32x32xf32> to vector<32x32xbf16>
    %176 = vector.extract_strided_slice %148 {offsets = [0, 32], sizes = [32, 32], strides = [1, 1]} : vector<32x128xbf16> to vector<32x32xbf16>
    %177 = vector.extract_strided_slice %155 {offsets = [0, 32], sizes = [32, 32], strides = [1, 1]} : vector<32x128xbf16> to vector<32x32xbf16>
    %cst_64 = arith.constant dense<0.000000e+00> : vector<32x32xf32>
    %178 = tpu.matmul %176, %177, %cst_64 {dimension_numbers = #tpu.dot_dimension_numbers<[1], [1], [0], [0], [0, 0, 1, 0], [], []>} : vector<32x32xbf16>, vector<32x32xbf16>, vector<32x32xf32> -> vector<32x32xf32>
    %179 = arith.addf %178, %22 : vector<32x32xf32>
    %cst_65 = arith.constant dense<0xFF800000> : vector<32xf32>
    %180 = vector.multi_reduction <maximumf>, %179, %cst_65 [1] : vector<32x32xf32> to vector<32xf32>
    %181 = vector.shape_cast %180 : vector<32xf32> to vector<32x1xf32>
    %182 = vector.broadcast %181 : vector<32x1xf32> to vector<32x32xf32>
    %183 = arith.subf %179, %182 : vector<32x32xf32>
    %184 = math.exp %183 : vector<32x32xf32>
    %cst_66 = arith.constant dense<0.000000e+00> : vector<32xf32>
    %185 = vector.multi_reduction <add>, %184, %cst_66 [1] : vector<32x32xf32> to vector<32xf32>
    %186 = vector.shape_cast %185 : vector<32xf32> to vector<32x1xf32>
    %187 = tpu.reciprocal %186 {approx = true} : vector<32x1xf32> -> vector<32x1xf32>
    %188 = vector.broadcast %187 : vector<32x1xf32> to vector<32x32xf32>
    %189 = arith.mulf %184, %188 : vector<32x32xf32>
    %190 = arith.truncf %189 : vector<32x32xf32> to vector<32x32xbf16>
    %191 = vector.extract_strided_slice %157 {offsets = [0, 32], sizes = [32, 32], strides = [1, 1]} : vector<32x128xbf16> to vector<32x32xbf16>
    %cst_67 = arith.constant dense<0.000000e+00> : vector<32x32xf32>
    %192 = tpu.matmul %190, %191, %cst_67 {dimension_numbers = #tpu.dot_dimension_numbers<[1], [0], [0], [1], [0, 0, 1, 1], [], []>} : vector<32x32xbf16>, vector<32x32xbf16>, vector<32x32xf32> -> vector<32x32xf32>
    %193 = arith.truncf %192 : vector<32x32xf32> to vector<32x32xbf16>
    %194 = vector.extract_strided_slice %148 {offsets = [0, 64], sizes = [32, 32], strides = [1, 1]} : vector<32x128xbf16> to vector<32x32xbf16>
    %195 = vector.extract_strided_slice %155 {offsets = [0, 64], sizes = [32, 32], strides = [1, 1]} : vector<32x128xbf16> to vector<32x32xbf16>
    %cst_68 = arith.constant dense<0.000000e+00> : vector<32x32xf32>
    %196 = tpu.matmul %194, %195, %cst_68 {dimension_numbers = #tpu.dot_dimension_numbers<[1], [1], [0], [0], [0, 0, 1, 0], [], []>} : vector<32x32xbf16>, vector<32x32xbf16>, vector<32x32xf32> -> vector<32x32xf32>
    %197 = arith.addf %196, %22 : vector<32x32xf32>
    %cst_69 = arith.constant dense<0xFF800000> : vector<32xf32>
    %198 = vector.multi_reduction <maximumf>, %197, %cst_69 [1] : vector<32x32xf32> to vector<32xf32>
    %199 = vector.shape_cast %198 : vector<32xf32> to vector<32x1xf32>
    %200 = vector.broadcast %199 : vector<32x1xf32> to vector<32x32xf32>
    %201 = arith.subf %197, %200 : vector<32x32xf32>
    %202 = math.exp %201 : vector<32x32xf32>
    %cst_70 = arith.constant dense<0.000000e+00> : vector<32xf32>
    %203 = vector.multi_reduction <add>, %202, %cst_70 [1] : vector<32x32xf32> to vector<32xf32>
    %204 = vector.shape_cast %203 : vector<32xf32> to vector<32x1xf32>
    %205 = tpu.reciprocal %204 {approx = true} : vector<32x1xf32> -> vector<32x1xf32>
    %206 = vector.broadcast %205 : vector<32x1xf32> to vector<32x32xf32>
    %207 = arith.mulf %202, %206 : vector<32x32xf32>
    %208 = arith.truncf %207 : vector<32x32xf32> to vector<32x32xbf16>
    %209 = vector.extract_strided_slice %157 {offsets = [0, 64], sizes = [32, 32], strides = [1, 1]} : vector<32x128xbf16> to vector<32x32xbf16>
    %cst_71 = arith.constant dense<0.000000e+00> : vector<32x32xf32>
    %210 = tpu.matmul %208, %209, %cst_71 {dimension_numbers = #tpu.dot_dimension_numbers<[1], [0], [0], [1], [0, 0, 1, 1], [], []>} : vector<32x32xbf16>, vector<32x32xbf16>, vector<32x32xf32> -> vector<32x32xf32>
    %211 = arith.truncf %210 : vector<32x32xf32> to vector<32x32xbf16>
    %212 = vector.extract_strided_slice %148 {offsets = [0, 96], sizes = [32, 32], strides = [1, 1]} : vector<32x128xbf16> to vector<32x32xbf16>
    %213 = vector.extract_strided_slice %155 {offsets = [0, 96], sizes = [32, 32], strides = [1, 1]} : vector<32x128xbf16> to vector<32x32xbf16>
    %cst_72 = arith.constant dense<0.000000e+00> : vector<32x32xf32>
    %214 = tpu.matmul %212, %213, %cst_72 {dimension_numbers = #tpu.dot_dimension_numbers<[1], [1], [0], [0], [0, 0, 1, 0], [], []>} : vector<32x32xbf16>, vector<32x32xbf16>, vector<32x32xf32> -> vector<32x32xf32>
    %215 = arith.addf %214, %22 : vector<32x32xf32>
    %cst_73 = arith.constant dense<0xFF800000> : vector<32xf32>
    %216 = vector.multi_reduction <maximumf>, %215, %cst_73 [1] : vector<32x32xf32> to vector<32xf32>
    %217 = vector.shape_cast %216 : vector<32xf32> to vector<32x1xf32>
    %218 = vector.broadcast %217 : vector<32x1xf32> to vector<32x32xf32>
    %219 = arith.subf %215, %218 : vector<32x32xf32>
    %220 = math.exp %219 : vector<32x32xf32>
    %cst_74 = arith.constant dense<0.000000e+00> : vector<32xf32>
    %221 = vector.multi_reduction <add>, %220, %cst_74 [1] : vector<32x32xf32> to vector<32xf32>
    %222 = vector.shape_cast %221 : vector<32xf32> to vector<32x1xf32>
    %223 = tpu.reciprocal %222 {approx = true} : vector<32x1xf32> -> vector<32x1xf32>
    %224 = vector.broadcast %223 : vector<32x1xf32> to vector<32x32xf32>
    %225 = arith.mulf %220, %224 : vector<32x32xf32>
    %226 = arith.truncf %225 : vector<32x32xf32> to vector<32x32xbf16>
    %227 = vector.extract_strided_slice %157 {offsets = [0, 96], sizes = [32, 32], strides = [1, 1]} : vector<32x128xbf16> to vector<32x32xbf16>
    %cst_75 = arith.constant dense<0.000000e+00> : vector<32x32xf32>
    %228 = tpu.matmul %226, %227, %cst_75 {dimension_numbers = #tpu.dot_dimension_numbers<[1], [0], [0], [1], [0, 0, 1, 1], [], []>} : vector<32x32xbf16>, vector<32x32xbf16>, vector<32x32xf32> -> vector<32x32xf32>
    %229 = arith.truncf %228 : vector<32x32xf32> to vector<32x32xbf16>
    %230 = tpu.concatenate %175, %193, %211, %229 in 1 : vector<32x32xbf16>, vector<32x32xbf16>, vector<32x32xbf16>, vector<32x32xbf16> -> vector<32x128xbf16>
    %c0_76 = arith.constant 0 : index
    %c0_77 = arith.constant 0 : index
    %231 = vector.load %arg15[%c0_76, %c0_77] : memref<128x128xbf16, #tpu.memory_space<vmem>>, vector<128x128xbf16>
    %cst_78 = arith.constant dense<0.000000e+00> : vector<32x128xf32>
    %232 = tpu.matmul %230, %231, %cst_78 {dimension_numbers = #tpu.dot_dimension_numbers<[1], [0], [0], [1], [0, 0, 1, 1], [], []>} : vector<32x128xbf16>, vector<128x128xbf16>, vector<32x128xf32> -> vector<32x128xf32>
    %c0_79 = arith.constant 0 : index
    %c0_80 = arith.constant 0 : index
    %233 = vector.load %arg16[%c0_79, %c0_80] : memref<1x128xf32, #tpu.memory_space<vmem>>, vector<1x128xf32>
    %234 = vector.broadcast %233 : vector<1x128xf32> to vector<32x128xf32>
    %235 = arith.addf %232, %234 : vector<32x128xf32>
    %236 = arith.addf %141, %235 : vector<32x128xf32>
    %c1 = arith.constant 1 : index
    %c0_81 = arith.constant 0 : index
    %c0_82 = arith.constant 0 : index
    %237 = vector.load %arg17[%c1, %c0_81, %c0_82] : memref<3x1x128xf32, #tpu.memory_space<vmem>>, vector<1x1x128xf32>
    %238 = vector.shape_cast %237 : vector<1x1x128xf32> to vector<1x128xf32>
    %c1_83 = arith.constant 1 : index
    %c0_84 = arith.constant 0 : index
    %c0_85 = arith.constant 0 : index
    %239 = vector.load %arg18[%c1_83, %c0_84, %c0_85] : memref<3x1x128xf32, #tpu.memory_space<vmem>>, vector<1x1x128xf32>
    %240 = vector.shape_cast %239 : vector<1x1x128xf32> to vector<1x128xf32>
    %cst_86 = arith.constant dense<0.000000e+00> : vector<32xf32>
    %241 = vector.multi_reduction <add>, %236, %cst_86 [1] : vector<32x128xf32> to vector<32xf32>
    %242 = vector.shape_cast %241 : vector<32xf32> to vector<32x1xf32>
    %cst_87 = arith.constant 1.280000e+02 : f32
    %243 = vector.broadcast %cst_87 : f32 to vector<32x1xf32>
    %244 = arith.divf %242, %243 : vector<32x1xf32>
    %245 = vector.broadcast %244 : vector<32x1xf32> to vector<32x128xf32>
    %246 = arith.subf %236, %245 : vector<32x128xf32>
    %247 = arith.mulf %246, %246 : vector<32x128xf32>
    %cst_88 = arith.constant dense<0.000000e+00> : vector<32xf32>
    %248 = vector.multi_reduction <add>, %247, %cst_88 [1] : vector<32x128xf32> to vector<32xf32>
    %249 = vector.shape_cast %248 : vector<32xf32> to vector<32x1xf32>
    %cst_89 = arith.constant 1.280000e+02 : f32
    %250 = vector.broadcast %cst_89 : f32 to vector<32x1xf32>
    %251 = arith.divf %249, %250 : vector<32x1xf32>
    %cst_90 = arith.constant 9.99999974E-6 : f32
    %252 = vector.broadcast %cst_90 : f32 to vector<32x1xf32>
    %253 = arith.addf %251, %252 : vector<32x1xf32>
    %254 = math.rsqrt %253 : vector<32x1xf32>
    %255 = vector.broadcast %254 : vector<32x1xf32> to vector<32x128xf32>
    %256 = arith.mulf %246, %255 : vector<32x128xf32>
    %257 = vector.broadcast %238 : vector<1x128xf32> to vector<32x128xf32>
    %258 = arith.mulf %256, %257 : vector<32x128xf32>
    %259 = vector.broadcast %240 : vector<1x128xf32> to vector<32x128xf32>
    %260 = arith.addf %258, %259 : vector<32x128xf32>
    %261 = arith.truncf %260 : vector<32x128xf32> to vector<32x128xbf16>
    %c0_91 = arith.constant 0 : index
    %c0_92 = arith.constant 0 : index
    %262 = vector.load %arg19[%c0_91, %c0_92] : memref<128x256xbf16, #tpu.memory_space<vmem>>, vector<128x256xbf16>
    %cst_93 = arith.constant dense<0.000000e+00> : vector<32x256xf32>
    %263 = tpu.matmul %261, %262, %cst_93 {dimension_numbers = #tpu.dot_dimension_numbers<[1], [0], [0], [1], [0, 0, 1, 1], [], []>} : vector<32x128xbf16>, vector<128x256xbf16>, vector<32x256xf32> -> vector<32x256xf32>
    %c0_94 = arith.constant 0 : index
    %c0_95 = arith.constant 0 : index
    %264 = vector.load %arg20[%c0_94, %c0_95] : memref<1x256xf32, #tpu.memory_space<vmem>>, vector<1x256xf32>
    %265 = vector.broadcast %264 : vector<1x256xf32> to vector<32x256xf32>
    %266 = arith.addf %263, %265 : vector<32x256xf32>
    %cst_96 = arith.constant 0.000000e+00 : f32
    %267 = vector.broadcast %cst_96 : f32 to vector<32x256xf32>
    %268 = arith.maximumf %266, %267 : vector<32x256xf32>
    %269 = arith.truncf %268 : vector<32x256xf32> to vector<32x256xbf16>
    %c0_97 = arith.constant 0 : index
    %c0_98 = arith.constant 0 : index
    %270 = vector.load %arg21[%c0_97, %c0_98] : memref<256x128xbf16, #tpu.memory_space<vmem>>, vector<256x128xbf16>
    %cst_99 = arith.constant dense<0.000000e+00> : vector<32x128xf32>
    %271 = tpu.matmul %269, %270, %cst_99 {dimension_numbers = #tpu.dot_dimension_numbers<[1], [0], [0], [1], [0, 0, 1, 1], [], []>} : vector<32x256xbf16>, vector<256x128xbf16>, vector<32x128xf32> -> vector<32x128xf32>
    %c0_100 = arith.constant 0 : index
    %c0_101 = arith.constant 0 : index
    %272 = vector.load %arg22[%c0_100, %c0_101] : memref<1x128xf32, #tpu.memory_space<vmem>>, vector<1x128xf32>
    %273 = vector.broadcast %272 : vector<1x128xf32> to vector<32x128xf32>
    %274 = arith.addf %271, %273 : vector<32x128xf32>
    %275 = arith.addf %260, %274 : vector<32x128xf32>
    %c2 = arith.constant 2 : index
    %c0_102 = arith.constant 0 : index
    %c0_103 = arith.constant 0 : index
    %276 = vector.load %arg17[%c2, %c0_102, %c0_103] : memref<3x1x128xf32, #tpu.memory_space<vmem>>, vector<1x1x128xf32>
    %277 = vector.shape_cast %276 : vector<1x1x128xf32> to vector<1x128xf32>
    %c2_104 = arith.constant 2 : index
    %c0_105 = arith.constant 0 : index
    %c0_106 = arith.constant 0 : index
    %278 = vector.load %arg18[%c2_104, %c0_105, %c0_106] : memref<3x1x128xf32, #tpu.memory_space<vmem>>, vector<1x1x128xf32>
    %279 = vector.shape_cast %278 : vector<1x1x128xf32> to vector<1x128xf32>
    %cst_107 = arith.constant dense<0.000000e+00> : vector<32xf32>
    %280 = vector.multi_reduction <add>, %275, %cst_107 [1] : vector<32x128xf32> to vector<32xf32>
    %281 = vector.shape_cast %280 : vector<32xf32> to vector<32x1xf32>
    %cst_108 = arith.constant 1.280000e+02 : f32
    %282 = vector.broadcast %cst_108 : f32 to vector<32x1xf32>
    %283 = arith.divf %281, %282 : vector<32x1xf32>
    %284 = vector.broadcast %283 : vector<32x1xf32> to vector<32x128xf32>
    %285 = arith.subf %275, %284 : vector<32x128xf32>
    %286 = arith.mulf %285, %285 : vector<32x128xf32>
    %cst_109 = arith.constant dense<0.000000e+00> : vector<32xf32>
    %287 = vector.multi_reduction <add>, %286, %cst_109 [1] : vector<32x128xf32> to vector<32xf32>
    %288 = vector.shape_cast %287 : vector<32xf32> to vector<32x1xf32>
    %cst_110 = arith.constant 1.280000e+02 : f32
    %289 = vector.broadcast %cst_110 : f32 to vector<32x1xf32>
    %290 = arith.divf %288, %289 : vector<32x1xf32>
    %cst_111 = arith.constant 9.99999974E-6 : f32
    %291 = vector.broadcast %cst_111 : f32 to vector<32x1xf32>
    %292 = arith.addf %290, %291 : vector<32x1xf32>
    %293 = math.rsqrt %292 : vector<32x1xf32>
    %294 = vector.broadcast %293 : vector<32x1xf32> to vector<32x128xf32>
    %295 = arith.mulf %285, %294 : vector<32x128xf32>
    %296 = vector.broadcast %277 : vector<1x128xf32> to vector<32x128xf32>
    %297 = arith.mulf %295, %296 : vector<32x128xf32>
    %298 = vector.broadcast %279 : vector<1x128xf32> to vector<32x128xf32>
    %299 = arith.addf %297, %298 : vector<32x128xf32>
    %300 = arith.truncf %299 : vector<32x128xf32> to vector<32x128xbf16>
    %c0_112 = arith.constant 0 : index
    %c0_113 = arith.constant 0 : index
    %c0_114 = arith.constant 0 : index
    %301 = vector.load %arg23[%c0_112, %c0_113, %c0_114] : memref<1x32x128xbf16, #tpu.memory_space<vmem>>, vector<1x32x128xbf16>
    %302 = vector.shape_cast %301 : vector<1x32x128xbf16> to vector<32x128xbf16>
    %303 = vector.shape_cast %300 : vector<32x128xbf16> to vector<1x32x128xbf16>
    tpu.vector_store %arg23[%c0_112, %c0_113, %c0_114], %303 {strides = array<i32>} : memref<1x32x128xbf16, #tpu.memory_space<vmem>>, vector<1x32x128xbf16>,
    return
  }
  func.func @transform_0(%arg0: i32, %arg1: memref<2xi32, #tpu.memory_space<smem>>, %arg2: memref<2xi32, #tpu.memory_space<smem>>) -> (i32, i32, i32) {
    %c0_i32 = arith.constant 0 : i32
    %c0_i32_0 = arith.constant 0 : i32
    %c0_i32_1 = arith.constant 0 : i32
    return %arg0, %c0_i32, %c0_i32_0 : i32, i32, i32
  }
  func.func @transform_1(%arg0: i32, %arg1: memref<2xi32, #tpu.memory_space<smem>>, %arg2: memref<2xi32, #tpu.memory_space<smem>>) -> (i32, i32, i32) {
    %c0_i32 = arith.constant 0 : i32
    %c0_i32_0 = arith.constant 0 : i32
    %c0_i32_1 = arith.constant 0 : i32
    return %arg0, %c0_i32, %c0_i32_0 : i32, i32, i32
  }
  func.func @transform_2(%arg0: i32, %arg1: memref<2xi32, #tpu.memory_space<smem>>, %arg2: memref<2xi32, #tpu.memory_space<smem>>) -> (i32, i32) {
    %c0_i32 = arith.constant 0 : i32
    %c0_i32_0 = arith.constant 0 : i32
    %c0_i32_1 = arith.constant 0 : i32
    return %c0_i32, %c0_i32_0 : i32, i32
  }
  func.func @transform_3(%arg0: i32, %arg1: memref<2xi32, #tpu.memory_space<smem>>, %arg2: memref<2xi32, #tpu.memory_space<smem>>) -> (i32, i32) {
    %c0_i32 = arith.constant 0 : i32
    %c0_i32_0 = arith.constant 0 : i32
    %c0_i32_1 = arith.constant 0 : i32
    return %c0_i32, %c0_i32_0 : i32, i32
  }
  func.func @transform_4(%arg0: i32, %arg1: memref<2xi32, #tpu.memory_space<smem>>, %arg2: memref<2xi32, #tpu.memory_space<smem>>) -> (i32, i32) {
    %c0_i32 = arith.constant 0 : i32
    %c0_i32_0 = arith.constant 0 : i32
    %c0_i32_1 = arith.constant 0 : i32
    return %c0_i32, %c0_i32_0 : i32, i32
  }
  func.func @transform_5(%arg0: i32, %arg1: memref<2xi32, #tpu.memory_space<smem>>, %arg2: memref<2xi32, #tpu.memory_space<smem>>) -> (i32, i32) {
    %c0_i32 = arith.constant 0 : i32
    %c0_i32_0 = arith.constant 0 : i32
    %c0_i32_1 = arith.constant 0 : i32
    return %c0_i32, %c0_i32_0 : i32, i32
  }
  func.func @transform_6(%arg0: i32, %arg1: memref<2xi32, #tpu.memory_space<smem>>, %arg2: memref<2xi32, #tpu.memory_space<smem>>) -> (i32, i32) {
    %c0_i32 = arith.constant 0 : i32
    %c0_i32_0 = arith.constant 0 : i32
    %c0_i32_1 = arith.constant 0 : i32
    return %c0_i32, %c0_i32_0 : i32, i32
  }
  func.func @transform_7(%arg0: i32, %arg1: memref<2xi32, #tpu.memory_space<smem>>, %arg2: memref<2xi32, #tpu.memory_space<smem>>) -> (i32, i32) {
    %c0_i32 = arith.constant 0 : i32
    %c0_i32_0 = arith.constant 0 : i32
    %c0_i32_1 = arith.constant 0 : i32
    return %c0_i32, %c0_i32_0 : i32, i32
  }
  func.func @transform_8(%arg0: i32, %arg1: memref<2xi32, #tpu.memory_space<smem>>, %arg2: memref<2xi32, #tpu.memory_space<smem>>) -> (i32, i32) {
    %c0_i32 = arith.constant 0 : i32
    %c0_i32_0 = arith.constant 0 : i32
    %c0_i32_1 = arith.constant 0 : i32
    return %c0_i32, %c0_i32_0 : i32, i32
  }
  func.func @transform_9(%arg0: i32, %arg1: memref<2xi32, #tpu.memory_space<smem>>, %arg2: memref<2xi32, #tpu.memory_space<smem>>) -> (i32, i32) {
    %c0_i32 = arith.constant 0 : i32
    %c0_i32_0 = arith.constant 0 : i32
    %c0_i32_1 = arith.constant 0 : i32
    return %c0_i32, %c0_i32_0 : i32, i32
  }
  func.func @transform_10(%arg0: i32, %arg1: memref<2xi32, #tpu.memory_space<smem>>, %arg2: memref<2xi32, #tpu.memory_space<smem>>) -> (i32, i32) {
    %c0_i32 = arith.constant 0 : i32
    %c0_i32_0 = arith.constant 0 : i32
    %c0_i32_1 = arith.constant 0 : i32
    return %c0_i32, %c0_i32_0 : i32, i32
  }
  func.func @transform_11(%arg0: i32, %arg1: memref<2xi32, #tpu.memory_space<smem>>, %arg2: memref<2xi32, #tpu.memory_space<smem>>) -> (i32, i32) {
    %c0_i32 = arith.constant 0 : i32
    %c0_i32_0 = arith.constant 0 : i32
    %c0_i32_1 = arith.constant 0 : i32
    return %c0_i32, %c0_i32_0 : i32, i32
  }
  func.func @transform_12(%arg0: i32, %arg1: memref<2xi32, #tpu.memory_space<smem>>, %arg2: memref<2xi32, #tpu.memory_space<smem>>) -> (i32, i32) {
    %c0_i32 = arith.constant 0 : i32
    %c0_i32_0 = arith.constant 0 : i32
    %c0_i32_1 = arith.constant 0 : i32
    return %c0_i32, %c0_i32_0 : i32, i32
  }
  func.func @transform_13(%arg0: i32, %arg1: memref<2xi32, #tpu.memory_space<smem>>, %arg2: memref<2xi32, #tpu.memory_space<smem>>) -> (i32, i32) {
    %c0_i32 = arith.constant 0 : i32
    %c0_i32_0 = arith.constant 0 : i32
    %c0_i32_1 = arith.constant 0 : i32
    return %c0_i32, %c0_i32_0 : i32, i32
  }
  func.func @transform_14(%arg0: i32, %arg1: memref<2xi32, #tpu.memory_space<smem>>, %arg2: memref<2xi32, #tpu.memory_space<smem>>) -> (i32, i32, i32) {
    %c0_i32 = arith.constant 0 : i32
    %c0_i32_0 = arith.constant 0 : i32
    %c0_i32_1 = arith.constant 0 : i32
    %c0_i32_2 = arith.constant 0 : i32
    return %c0_i32, %c0_i32_0, %c0_i32_1 : i32, i32, i32
  }
  func.func @transform_15(%arg0: i32, %arg1: memref<2xi32, #tpu.memory_space<smem>>, %arg2: memref<2xi32, #tpu.memory_space<smem>>) -> (i32, i32, i32) {
    %c0_i32 = arith.constant 0 : i32
    %c0_i32_0 = arith.constant 0 : i32
    %c0_i32_1 = arith.constant 0 : i32
    %c0_i32_2 = arith.constant 0 : i32
    return %c0_i32, %c0_i32_0, %c0_i32_1 : i32, i32, i32
  }
  func.func @transform_16(%arg0: i32, %arg1: memref<2xi32, #tpu.memory_space<smem>>, %arg2: memref<2xi32, #tpu.memory_space<smem>>) -> (i32, i32) {
    %c0_i32 = arith.constant 0 : i32
    %c0_i32_0 = arith.constant 0 : i32
    %c0_i32_1 = arith.constant 0 : i32
    return %c0_i32, %c0_i32_0 : i32, i32
  }
  func.func @transform_17(%arg0: i32, %arg1: memref<2xi32, #tpu.memory_space<smem>>, %arg2: memref<2xi32, #tpu.memory_space<smem>>) -> (i32, i32) {
    %c0_i32 = arith.constant 0 : i32
    %c0_i32_0 = arith.constant 0 : i32
    %c0_i32_1 = arith.constant 0 : i32
    return %c0_i32, %c0_i32_0 : i32, i32
  }
  func.func @transform_18(%arg0: i32, %arg1: memref<2xi32, #tpu.memory_space<smem>>, %arg2: memref<2xi32, #tpu.memory_space<smem>>) -> (i32, i32) {
    %c0_i32 = arith.constant 0 : i32
    %c0_i32_0 = arith.constant 0 : i32
    %c0_i32_1 = arith.constant 0 : i32
    return %c0_i32, %c0_i32_0 : i32, i32
  }
  func.func @transform_19(%arg0: i32, %arg1: memref<2xi32, #tpu.memory_space<smem>>, %arg2: memref<2xi32, #tpu.memory_space<smem>>) -> (i32, i32) {
    %c0_i32 = arith.constant 0 : i32
    %c0_i32_0 = arith.constant 0 : i32
    %c0_i32_1 = arith.constant 0 : i32
    return %c0_i32, %c0_i32_0 : i32, i32
  }
  func.func @transform_20(%arg0: i32, %arg1: memref<2xi32, #tpu.memory_space<smem>>, %arg2: memref<2xi32, #tpu.memory_space<smem>>) -> (i32, i32, i32) {
    %c0_i32 = arith.constant 0 : i32
    %c0_i32_0 = arith.constant 0 : i32
    %c0_i32_1 = arith.constant 0 : i32
    return %arg0, %c0_i32, %c0_i32_0 : i32, i32, i32
  }
}

</mosaic_0001>

<bundles_post_ra>
// kernel: tpu_custom_call.1
= control target key start
LH: loop header
LB: loop body
LE: loop exit
PB: predicated region body
PF: predicated region fallthrough
CT: control target
= control target key end

     0   :  { %s6489_s0 = inlined_call_operand.hbm [shape: s32[2], index: 0, kind: input, shape index: {}]   ;;  %s6490_s2 = inlined_call_operand.hbm [shape: bf16[2,32,128], index: 2, kind: input, shape index: {}]   ;;  %s6491_s3 = inlined_call_operand.hbm [shape: bf16[2,32,128], index: 3, kind: input, shape index: {}]   ;;  %s6492_s4 = inlined_call_operand.hbm [shape: bf16[128,128], index: 4, kind: input, shape index: {}]   ;;  %s6493_s5 = inlined_call_operand.vmem [shape: f32[1,128], index: 5, kind: input, shape index: {}]   ;;  %s6494_s6 = inlined_call_operand.hbm [shape: bf16[128,256], index: 6, kind: input, shape index: {}]   ;;  %s6495_s7 = inlined_call_operand.vmem [shape: f32[1,256], index: 7, kind: input, shape index: {}]   ;;  %s6496_s8 = inlined_call_operand.hbm [shape: bf16[128,128], index: 8, kind: input, shape index: {}]   ;;  %s6497_s9 = inlined_call_operand.vmem [shape: f32[1,128], index: 9, kind: input, shape index: {}]   ;;  %s6498_s10 = inlined_call_operand.hbm [shape: bf16[128,128], index: 10, kind: input, shape index: {}]   ;;  %s6499_s11 = inlined_call_operand.vmem [shape: f32[1,128], index: 11, kind: input, shape index: {}]   ;;  %s6500_s12 = inlined_call_operand.hbm [shape: bf16[128,256], index: 12, kind: input, shape index: {}]   ;;  %s6501_s13 = inlined_call_operand.vmem [shape: f32[1,256], index: 13, kind: input, shape index: {}]   ;;  %s6502_s14 = inlined_call_operand.hbm [shape: bf16[128,128], index: 14, kind: input, shape index: {}]   ;;  %s6503_s15 = inlined_call_operand.vmem [shape: f32[1,128], index: 15, kind: input, shape index: {}]   ;;  %s6504_s16 = inlined_call_operand.vmem [shape: f32[3,1,128], index: 16, kind: input, shape index: {}]   ;;  %s6505_s17 = inlined_call_operand.vmem [shape: f32[3,1,128], index: 17, kind: input, shape index: {}]   ;;  %s6506_s18 = inlined_call_operand.hbm [shape: bf16[128,256], index: 18, kind: input, shape index: {}]   ;;  %s6507_s19 = inlined_call_operand.vmem [shape: f32[1,256], index: 19, kind: input, shape index: {}]   ;;  %s6508_s20 = inlined_call_operand.hbm [shape: bf16[256,128], index: 20, kind: input, shape index: {}]   ;;  %s6509_s21 = inlined_call_operand.vmem [shape: f32[1,128], index: 21, kind: input, shape index: {}]   ;;  %s6510_s22 = inlined_call_operand.hbm [shape: bf16[2,32,128], index: 22, kind: output, shape index: {}]   ;;  %s6511_s1 = inlined_call_operand.vmem [shape: s32[2], index: 1, kind: input, shape index: {}]  }
   0x1   :  { %6533 = sst [smem:[#allocation32_spill]] %s6489_s0 }
   0x2   :  { %6534 = sst [smem:[#allocation33_spill]] %s6490_s2  ;;  %s6554_s29 = sld [smem:[#allocation32_spill]] }
   0x3   :  { %6535 = sst [smem:[#allocation34_spill]] %s6491_s3 }
   0x4   :  { %6536 = sst [smem:[#allocation35_spill]] %s6492_s4 }
   0x5   :  { %6537 = sst [smem:[#allocation36_spill]] %s6493_s5 }
   0x6   :  { %6538 = sst [smem:[#allocation37_spill]] %s6494_s6 }
   0x7   :  { %6539 = sst [smem:[#allocation38_spill]] %s6495_s7 }
   0x8   :  { %6540 = sst [smem:[#allocation39_spill]] %s6496_s8 }
   0x9   :  { %6541 = sst [smem:[#allocation40_spill]] %s6498_s10 }
   0xa   :  { %6542 = sst [smem:[#allocation41_spill]] %s6499_s11 }
   0xb   :  { %6543 = sst [smem:[#allocation42_spill]] %s6500_s12 }
   0xc   :  { %6544 = sst [smem:[#allocation43_spill]] %s6501_s13 }
   0xd   :  { %6545 = sst [smem:[#allocation44_spill]] %s6502_s14 }
   0xe   :  { %6546 = sst [smem:[#allocation45_spill]] %s6503_s15  ;;  %s4935_s15 = scalar_lea.hbm %s6554_s29, 16 }
   0xf   :  { %6547 = sst [smem:[#allocation46_spill]] %s6504_s16  ;;  %p4936_p0 = scmp.ne.s32.totalorder %s6554_s29, %s4935_s15 }
  0x10   :  { %6548 = sst [smem:[#allocation47_spill]] %s6505_s17  ;;  %p4939_p1 = scmp.lt.u32.totalorder %s4935_s15, %s6554_s29 }
  0x11   :  { %6549 = sst [smem:[#allocation48_spill]] %s6506_s18 }
  0x12   :  { %6550 = sst [smem:[#allocation49_spill]] %s6507_s19  ;;  %p4941_p2 = pnand %p4939_p1, %p4936_p0 }
  0x13   :  { %6551 = sst [smem:[#allocation50_spill]] %s6508_s20 }
  0x14   :  { %6552 = sst [smem:[#allocation51_spill]] %s6509_s21 }
  0x15   :  { %6553 = sst [smem:[#allocation52_spill]] %s6510_s22 }
  0x16   :  { %4944 = shalt.err (!%p4941_p2)  }
  0x17   :  { %s5335_s2 = smov [#allocation3]   ;;  %s29_s26 = sshll.u32 %s6511_s1, 4  ;;  %s30_s26 = int_to_ptr.vmem [resolvable:$true] %s29_s26 }
  0x18   :  { %28 = dma.hbm_to_smem %s6554_s29, 16, %s5335_s2, [#allocation2] }
  0x19   :  { %s4945_s3 = scalar_lea.vmem %s30_s26, 16  ;;  %p4950_p4 = scmp.lt.s32.totalorder %s30_s26, %s30_s26 }
  0x1a   :  { %p4946_p3 = scmp.ne.s32.totalorder %s30_s26, %s4945_s3  ;;  %p4951_p5 = scmp.lt.s32.totalorder %s4945_s3, %s4945_s3 }
  0x1c   :  { %p4952_p6 = por %p4951_p5, %p4950_p4 }
  0x1e   :  { %p4953_p7 = pnand %p4952_p6, %p4946_p3 }
  0x20   :  { %4956 = shalt.err (!%p4953_p7)  }
  0x21   :  { %s5336_s15 = smov [#allocation4]  }
  0x22   :  { %32 = dma.vmem_to_smem %s30_s26, 16, %s5336_s15, [#allocation2] }
  0x23   :  { %5285 = dma.done.wait [#allocation2], 32 }
  0x24   :  { %5286 = vsyncadd [#allocation2], 4294967264 }
  0x25   :  { %34 = sfence }
  0x26   :  { %35 = vsyncpa [#allocation6], 0 }
  0x27   :  { %37 = vsyncpa [#allocation6 + $0x1], 0 }
  0x28   :  { %38 = vsyncpa [#allocation9], 0 }
  0x29   :  { %40 = vsyncpa [#allocation9 + $0x1], 0 }
  0x2a   :  { %41 = vsyncpa [#allocation12], 0 }
  0x2b   :  { %42 = vsyncpa [#allocation15], 0 }
  0x2c   :  { %43 = vsyncpa [#allocation18], 0 }
  0x2d   :  { %44 = vsyncpa [#allocation21], 0 }
  0x2e   :  { %45 = vsyncpa [#allocation7], 0 }
  0x2f   :  { %47 = vsyncpa [#allocation7 + $0x1], 0  ;;  %s5488_s1 = smov 0   ;;  %s5490_s27 = smov 0  }
  0x30   :  { %s5492_s4 = smov 0   ;;  %s5494_s28 = smov 0  }
  0x31 LB: > { %s5337_s29 = smov [#allocation10]   ;;  %s5509_s5 = sadd.s32 4294967295, %s5333_s28   ;;  %s5333_s28 = sphi %s5494_s28, %s6607_s28   ;;  %s5329_s4 = sphi %s5492_s4, %s6606_s4   ;;  %s5325_s27 = sphi %s5490_s27, %s6605_s27   ;;  %s5321_s1 = sphi %s5488_s1, %s6604_s1  }
  0x32   : > { %s526_s30 = sshll.u32 %s5337_s29, 4  ;;  %p3953_p8 = scmp.ge.s32.totalorder %s5333_s28, 1  ;;  %s5514_s30 = int_to_ptr.vmem [resolvable:$true] %s526_s30 }
  0x33   : > { %p6522_p9 = scmp.eq.s32.totalorder %s5509_s5, 0  ;;  %p514_p10 = scmp.lt.s32.totalorder %s5333_s28, 3 }
  0x34   : > { %s5338_s23 = smov [#allocation11]   ;;  %s5339_s24 = smov [#allocation14]  }
  0x35   : > { %p5516_p11 = pnand %p3953_p8, %p514_p10  ;;  %s542_s2 = sshll.u32 %s5338_s23, 4  ;;  %s5529_s2 = int_to_ptr.vmem [resolvable:$true] %s542_s2 }
  0x36   : > { %s5531_s7 = sshll.u32 %s5339_s24, 4  ;;  %s6557_s3 = sld [smem:[#allocation35_spill]]  ;;  %s575_s7 = int_to_ptr.vmem [resolvable:$true] %s5531_s7 }
  0x37   : > { %s6555_s0 = scalar_select %p5516_p11, 1, 0 }
  0x38   : > { %p4549_p13 = pneg %p5516_p11 }
  0x3a   : > { %p5525_p0 = pnand %p4549_p13, %p6522_p9 }
  0x3c   : > { %s4957_s15 = scalar_lea.hbm %s6557_s3, 1024  ;;  %p5541_p2 = pneg %p5525_p0 }
  0x3d   : > { %p4958_p1 = scmp.ne.s32.totalorder %s6557_s3, %s4957_s15  ;;  %p4964_p5 = scmp.lt.u32.totalorder %s4957_s15, %s6557_s3 }
  0x3f   : > { %p4960_p3 = pnand %p5541_p2, %p4958_p1 }
  0x41   : > { %p4961_p4 = pneg %p4960_p3 }
  0x43   : > { %p4966_p6 = pnand %p4964_p5, %p4961_p4 }
  0x45   : > { %4969 = shalt.err (!%p4966_p6)
}
  0x46   : > { %s4970_s22 = scalar_lea.vmem %s5514_s30, 1024  ;;  %p4978_p13 = scmp.lt.s32.totalorder %s5514_s30, %s5514_s30 }
  0x47   : > { %p4971_p7 = scmp.ne.s32.totalorder %s5514_s30, %s4970_s22  ;;  %p4979_p12 = scmp.lt.s32.totalorder %s4970_s22, %s4970_s22 }
  0x49   : > { %p4973_p8 = pnand %p4971_p7, %p5541_p2  ;;  %p4980_p1 = por %p4979_p12, %p4978_p13 }
  0x4b   : > { %p4974_p10 = pneg %p4973_p8 }
  0x4d   : > { %p4981_p3 = pnand %p4980_p1, %p4974_p10 }
  0x4f   : > { %4984 = shalt.err (!%p4981_p3)
}
  0x50   : > { %s6520_s25 = smov 64   ;;  %s6529_s21 = smov 4  }
  0x51   : > { %4552 = dma.hbm_to_vmem [thread:$0]  (!%p5525_p0), %s6557_s3, 1024, %s5514_s30, [#allocation9], %s6520_s25, %s6520_s25, %s6529_s21  }
  0x52   : > { %s6559_s19 = sld [smem:[#allocation37_spill]] }
  0x58   : > { %s4985_s22 = scalar_lea.hbm %s6559_s19, 2048 }
  0x59   : > { %p4986_p12 = scmp.ne.s32.totalorder %s6559_s19, %s4985_s22  ;;  %p4992_p6 = scmp.lt.u32.totalorder %s4985_s22, %s6559_s19 }
  0x5b   : > { %p4988_p4 = pnand %p4986_p12, %p5541_p2 }
  0x5d   : > { %p4989_p5 = pneg %p4988_p4 }
  0x5f   : > { %p4994_p7 = pnand %p4992_p6, %p4989_p5 }
  0x61   : > { %4997 = shalt.err (!%p4994_p7)
}
  0x62   : > { %s4998_s30 = scalar_lea.vmem %s5529_s2, 2048  ;;  %p5006_p1 = scmp.lt.s32.totalorder %s5529_s2, %s5529_s2 }
  0x63   : > { %p4999_p8 = scmp.ne.s32.totalorder %s5529_s2, %s4998_s30  ;;  %p5007_p3 = scmp.lt.s32.totalorder %s4998_s30, %s4998_s30 }
  0x65   : > { %p5001_p10 = pnand %p4999_p8, %p5541_p2  ;;  %p5008_p12 = por %p5007_p3, %p5006_p1 }
  0x67   : > { %p5002_p13 = pneg %p5001_p10 }
  0x69   : > { %p5009_p4 = pnand %p5008_p12, %p5002_p13 }
  0x6b   : > { %5012 = shalt.err (!%p5009_p4)
}
  0x6c   : > { %s6524_s11 = smov 128   ;;  %s6526_s13 = smov 8  }
  0x6d   : > { %4555 = dma.hbm_to_vmem [thread:$0]  (!%p5525_p0), %s6559_s19, 2048, %s5529_s2, [#allocation12], %s6524_s11, %s6524_s11, %s6526_s13  }
  0x6e   : > { %s6560_s10 = sld [smem:[#allocation40_spill]] }
  0x74   : > { %s5013_s29 = scalar_lea.hbm %s6560_s10, 1024 }
  0x75   : > { %p5014_p5 = scmp.ne.s32.totalorder %s6560_s10, %s5013_s29  ;;  %p5020_p8 = scmp.lt.u32.totalorder %s5013_s29, %s6560_s10 }
  0x77   : > { %p5016_p6 = pnand %p5014_p5, %p5541_p2 }
  0x79   : > { %p5017_p7 = pneg %p5016_p6 }
  0x7b   : > { %p5022_p10 = pnand %p5020_p8, %p5017_p7 }
  0x7d   : > { %5025 = shalt.err (!%p5022_p10)
}
  0x7e   : > { %s5026_s16 = scalar_lea.vmem %s575_s7, 1024  ;;  %p5034_p12 = scmp.lt.s32.totalorder %s575_s7, %s575_s7 }
  0x7f   : > { %p5027_p13 = scmp.ne.s32.totalorder %s575_s7, %s5026_s16  ;;  %p5035_p4 = scmp.lt.s32.totalorder %s5026_s16, %s5026_s16 }
  0x81   : > { %p5029_p1 = pnand %p5027_p13, %p5541_p2  ;;  %p5036_p9 = por %p5035_p4, %p5034_p12 }
  0x83   : > { %p5030_p3 = pneg %p5029_p1 }
  0x85   : > { %p5037_p11 = pnand %p5036_p9, %p5030_p3 }
  0x87   : > { %5040 = shalt.err (!%p5037_p11)
}
  0x88   : > { %s6561_s2 = smov 64   ;;  %s5344_s26 = smov [#allocation17]  }
  0x89   : > { %4561 = dma.hbm_to_vmem [thread:$0]  (!%p5525_p0), %s6560_s10, 1024, %s575_s7, [#allocation15], %s6561_s2, %s6561_s2, %s6529_s21  }
  0x8a   : > { %s606_s15 = sshll.u32 %s5344_s26, 4  ;;  %s5345_s29 = smov [#allocation13]   ;;  %s607_s15 = int_to_ptr.vmem [resolvable:$true] %s606_s15 }
  0x8b   : > { %s558_s24 = sshll.u32 %s5345_s29, 4  ;;  %s6562_s14 = sld [smem:[#allocation44_spill]]  ;;  %s559_s24 = int_to_ptr.vmem [resolvable:$true] %s558_s24 }
  0x91   : > { %s5041_s16 = scalar_lea.hbm %s6562_s14, 1024 }
  0x92   : > { %p5042_p9 = scmp.ne.s32.totalorder %s6562_s14, %s5041_s16  ;;  %p5048_p6 = scmp.lt.u32.totalorder %s5041_s16, %s6562_s14 }
  0x94   : > { %p5044_p11 = pnand %p5042_p9, %p5541_p2 }
  0x96   : > { %p5045_p5 = pneg %p5044_p11 }
  0x98   : > { %p5050_p7 = pnand %p5048_p6, %p5045_p5 }
  0x9a   : > { %5053 = shalt.err (!%p5050_p7)
}
  0x9b   : > { %s5054_s7 = scalar_lea.vmem %s607_s15, 1024  ;;  %p5062_p1 = scmp.lt.s32.totalorder %s607_s15, %s607_s15 }
  0x9c   : > { %p5055_p8 = scmp.ne.s32.totalorder %s607_s15, %s5054_s7  ;;  %p5063_p3 = scmp.lt.s32.totalorder %s5054_s7, %s5054_s7 }
  0x9e   : > { %p5057_p10 = pnand %p5055_p8, %p5541_p2  ;;  %p5064_p12 = por %p5063_p3, %p5062_p1 }
  0xa0   : > { %p5058_p13 = pneg %p5057_p10 }
  0xa2   : > { %p5065_p4 = pnand %p5064_p12, %p5058_p13 }
  0xa4   : > { %5068 = shalt.err (!%p5065_p4)
}
  0xa5   : > { %4567 = dma.hbm_to_vmem [thread:$0]  (!%p5525_p0), %s6562_s14, 1024, %s607_s15, [#allocation18], %s6561_s2, %s6561_s2, %s6529_s21  }
  0xa6   : > { %s6563_s8 = sld [smem:[#allocation39_spill]] }
  0xac   : > { %s5069_s26 = scalar_lea.hbm %s6563_s8, 1024 }
  0xad   : > { %p5070_p9 = scmp.ne.s32.totalorder %s6563_s8, %s5069_s26  ;;  %p5076_p6 = scmp.lt.u32.totalorder %s5069_s26, %s6563_s8 }
  0xaf   : > { %p5072_p11 = pnand %p5070_p9, %p5541_p2 }
  0xb1   : > { %p5073_p5 = pneg %p5072_p11 }
  0xb3   : > { %p5078_p7 = pnand %p5076_p6, %p5073_p5 }
  0xb5   : > { %5081 = shalt.err (!%p5078_p7)
}
  0xb6   : > { %s5082_s25 = scalar_lea.vmem %s559_s24, 1024  ;;  %p5090_p1 = scmp.lt.s32.totalorder %s559_s24, %s559_s24 }
  0xb7   : > { %p5083_p8 = scmp.ne.s32.totalorder %s559_s24, %s5082_s25  ;;  %p5091_p3 = scmp.lt.s32.totalorder %s5082_s25, %s5082_s25 }
  0xb9   : > { %p5085_p10 = pnand %p5083_p8, %p5541_p2  ;;  %p5092_p12 = por %p5091_p3, %p5090_p1 }
  0xbb   : > { %p5086_p13 = pneg %p5085_p10 }
  0xbd   : > { %p5093_p4 = pnand %p5092_p12, %p5086_p13 }
  0xbf   : > { %5096 = shalt.err (!%p5093_p4)
}
  0xc0   : > { %4558 = dma.hbm_to_vmem [thread:$0]  (!%p5525_p0), %s6563_s8, 1024, %s559_s24, [#allocation12], %s6561_s2, %s6561_s2, %s6529_s21  }
  0xc1   : > { %s5346_s3 = smov [#allocation16]   ;;  %s5347_s13 = smov [#allocation19]  }
  0xc2   : > { %s590_s11 = sshll.u32 %s5346_s3, 4  ;;  %s628_s17 = sshll.u32 %s5347_s13, 4  ;;  %s591_s11 = int_to_ptr.vmem [resolvable:$true] %s590_s11  ;;  %s629_s17 = int_to_ptr.vmem [resolvable:$true] %s628_s17 }
  0xc3   : > { %s6564_s12 = sld [smem:[#allocation42_spill]] }
  0xc9   : > { %s5097_s22 = scalar_lea.hbm %s6564_s12, 2048 }
  0xca   : > { %p5098_p9 = scmp.ne.s32.totalorder %s6564_s12, %s5097_s22  ;;  %p5104_p6 = scmp.lt.u32.totalorder %s5097_s22, %s6564_s12 }
  0xcc   : > { %p5100_p11 = pnand %p5098_p9, %p5541_p2 }
  0xce   : > { %p5101_p5 = pneg %p5100_p11 }
  0xd0   : > { %p5106_p7 = pnand %p5104_p6, %p5101_p5 }
  0xd2   : > { %5109 = shalt.err (!%p5106_p7)
}
  0xd3   : > { %s5110_s24 = scalar_lea.vmem %s591_s11, 2048  ;;  %p5118_p1 = scmp.lt.s32.totalorder %s591_s11, %s591_s11 }
  0xd4   : > { %p5111_p8 = scmp.ne.s32.totalorder %s591_s11, %s5110_s24  ;;  %p5119_p3 = scmp.lt.s32.totalorder %s5110_s24, %s5110_s24 }
  0xd6   : > { %p5113_p10 = pnand %p5111_p8, %p5541_p2  ;;  %p5120_p12 = por %p5119_p3, %p5118_p1 }
  0xd8   : > { %p5114_p13 = pneg %p5113_p10 }
  0xda   : > { %p5121_p4 = pnand %p5120_p12, %p5114_p13 }
  0xdc   : > { %5124 = shalt.err (!%p5121_p4)
}
  0xdd   : > { %s6565_s7 = smov 8   ;;  %s6566_s3 = smov 128  }
  0xde   : > { %4564 = dma.hbm_to_vmem [thread:$0]  (!%p5525_p0), %s6564_s12, 2048, %s591_s11, [#allocation15], %s6566_s3, %s6566_s3, %s6565_s7  }
  0xdf   : > { %s6567_s18 = sld [smem:[#allocation48_spill]] }
  0xe5   : > { %s5125_s30 = scalar_lea.hbm %s6567_s18, 2048 }
  0xe6   : > { %p5126_p9 = scmp.ne.s32.totalorder %s6567_s18, %s5125_s30  ;;  %p5132_p6 = scmp.lt.u32.totalorder %s5125_s30, %s6567_s18 }
  0xe8   : > { %p5128_p11 = pnand %p5126_p9, %p5541_p2 }
  0xea   : > { %p5129_p5 = pneg %p5128_p11 }
  0xec   : > { %p5134_p7 = pnand %p5132_p6, %p5129_p5 }
  0xee   : > { %5137 = shalt.err (!%p5134_p7)
}
  0xef   : > { %s5138_s13 = scalar_lea.vmem %s629_s17, 2048  ;;  %p5146_p1 = scmp.lt.s32.totalorder %s629_s17, %s629_s17 }
  0xf0   : > { %p5139_p8 = scmp.ne.s32.totalorder %s629_s17, %s5138_s13  ;;  %p5147_p3 = scmp.lt.s32.totalorder %s5138_s13, %s5138_s13 }
  0xf2   : > { %p5141_p10 = pnand %p5139_p8, %p5541_p2  ;;  %p5148_p12 = por %p5147_p3, %p5146_p1 }
  0xf4   : > { %p5142_p13 = pneg %p5141_p10 }
  0xf6   : > { %p5149_p4 = pnand %p5148_p12, %p5142_p13 }
  0xf8   : > { %5152 = shalt.err (!%p5149_p4)
}
  0xf9   : > { %4570 = dma.hbm_to_vmem [thread:$0]  (!%p5525_p0), %s6567_s18, 2048, %s629_s17, [#allocation18], %s6566_s3, %s6566_s3, %s6565_s7  }
  0xfa   : > { %s5348_s29 = smov [#allocation20]   ;;  %s6568_s20 = sld [smem:[#allocation50_spill]] }
  0xfb   : > { %s644_s22 = sshll.u32 %s5348_s29, 4  ;;  %s645_s22 = int_to_ptr.vmem [resolvable:$true] %s644_s22 }
 0x100   : > { %s5153_s25 = scalar_lea.hbm %s6568_s20, 2048 }
 0x101   : > { %p5154_p9 = scmp.ne.s32.totalorder %s6568_s20, %s5153_s25  ;;  %p5160_p6 = scmp.lt.u32.totalorder %s5153_s25, %s6568_s20 }
 0x103   : > { %p5156_p11 = pnand %p5154_p9, %p5541_p2 }
 0x105   : > { %p5157_p5 = pneg %p5156_p11 }
 0x107   : > { %p5162_p7 = pnand %p5160_p6, %p5157_p5 }
 0x109   : > { %5165 = shalt.err (!%p5162_p7)
}
 0x10a   : > { %s5166_s17 = scalar_lea.vmem %s645_s22, 2048  ;;  %p5174_p1 = scmp.lt.s32.totalorder %s645_s22, %s645_s22 }
 0x10b   : > { %p5167_p8 = scmp.ne.s32.totalorder %s645_s22, %s5166_s17  ;;  %p5175_p3 = scmp.lt.s32.totalorder %s5166_s17, %s5166_s17 }
 0x10d   : > { %p5169_p10 = pnand %p5167_p8, %p5541_p2  ;;  %p5176_p12 = por %p5175_p3, %p5174_p1 }
 0x10f   : > { %p5170_p13 = pneg %p5169_p10 }
 0x111   : > { %p5177_p4 = pnand %p5176_p12, %p5170_p13 }
 0x113   : > { %5180 = shalt.err (!%p5177_p4)
}
 0x114   : > { %s6569_s7 = smov 4   ;;  %s3952_s6 = sadd.s32 4294967294, %s5333_s28  }
 0x115   : > { %4573 = dma.hbm_to_vmem [thread:$0]  (!%p5525_p0), %s6568_s20, 2048, %s645_s22, [#allocation21], %s6561_s2, %s6561_s2, %s6569_s7  }
 0x116   : > { %s5720_s23 = sadd.s32 1, %s5333_s28   ;;  %s60_s26 = sadd.s32 1, %s5329_s4 }
 0x117   : > { %s57_s11 = ssub.s32 %s5333_s28, %s5720_s23  ;;  %p67_p9 = scmp.ne.s32.totalorder %s5329_s4, %s5325_s27 }
 0x118   : > { %p58_p2 = scmp.eq.s32.totalorder %s57_s11, 0  ;;  %p68_p11 = scmp.eq.s32.totalorder %s5333_s28, 0 }
 0x119   : > { %p73_p5 = scmp.ne.s32.totalorder %s5325_s27, %s5321_s1  ;;  %p6571_p7 = scmp.eq.s32.totalorder %s5509_s5, 0 }
 0x11a   : > { %s5731_s29 = scalar_select %p58_p2, %s5329_s4, %s60_s26  }
 0x11b   : > { %p5733_p6 = por %p68_p11, %p67_p9  ;;  %p5739_p0 = por %p6571_p7, %p73_p5 }
 0x11c   : > { %p501_p8 = scmp.eq.s32.totalorder %s5509_s5, 1  ;;  %p507_p10 = scmp.eq.s32.totalorder %s3952_s6, 1 }
 0x11d   : > { %p4593_p13 = scmp.lt.s32.totalorder %s5333_s28, 2  ;;  %s661_s16 = sand.u32 1, %s5329_s4  }
 0x11e   : > { %p5746_p1 = por %p501_p8, %p67_p9  ;;  %p5750_p3 = por %p507_p10, %p73_p5 }
 0x11f   : > { %s3963_s24 = sshll.u32 %s661_s16, 4  ;;  %s4137_s13 = sshll.u32 %s5333_s28, 8 }
 0x120   : > { %s6573_s25 = scalar_select %p5746_p1, 1, 0 }
 0x121   : > { %s6574_s15 = scalar_select %p5750_p3, 1, 0 }
 0x122   : > { %s6575_s3 = sld [smem:[#allocation33_spill]]  ;;  %s665_s6 = scalar_lea.vmem [#allocation5], %s3963_s24 }
 0x123   : > { %s672_s26 = sshll.u32 %s665_s6, 4  ;;  %p5764_p12 = pnand %p4593_p13, %p5733_p6  ;;  %s5760_s26 = int_to_ptr.vmem [resolvable:$true] %s672_s26 }
 0x124   : > { %s6577_s14 = sld [smem:[#allocation34_spill]]  ;;  %s686_s21 = scalar_lea.vmem [#allocation8], %s3963_s24 }
 0x125   : > { %s5773_s18 = sshll.u32 %s686_s21, 4  ;;  %s5775_s19 = scalar_lea.sflag [#allocation6], %s661_s16  ;;  %s5807_s18 = int_to_ptr.vmem [resolvable:$true] %s5773_s18 }
 0x126   : > { %p5183_p2 = pneg %p5764_p12 }
 0x128   : > { %s5758_s11 = scalar_lea.hbm %s6575_s3, %s4137_s13  ;;  %s5186_s10 = scalar_lea.hbm %s6575_s3, 512 }
 0x129   : > { %s5181_s6 = scalar_lea.hbm %s5758_s11, 256  ;;  %p5187_p5 = scmp.lt.u32.totalorder %s5758_s11, %s6575_s3 }
 0x12a   : > { %s5771_s17 = scalar_lea.hbm %s6577_s14, %s4137_s13  ;;  %p5182_p4 = scmp.ne.s32.totalorder %s5758_s11, %s5181_s6 }
 0x12b   : > { %p5188_p6 = scmp.lt.u32.totalorder %s5186_s10, %s5181_s6  ;;  %p5190_p8 = scmp.lt.u32.totalorder %s5181_s6, %s5758_s11 }
 0x12c   : > { %p5184_p9 = pnand %p5183_p2, %p5182_p4 }
 0x12d   : > { %p5189_p7 = por %p5188_p6, %p5187_p5 }
 0x12e   : > { %p5185_p11 = pneg %p5184_p9 }
 0x12f   : > { %p5191_p10 = por %p5190_p8, %p5189_p7 }
 0x131   : > { %p5192_p13 = pnand %p5191_p10, %p5185_p11 }
 0x133   : > { %5195 = shalt.err (!%p5192_p13)
}
 0x134   : > { %s5196_s16 = scalar_lea.vmem %s5760_s26, 256  ;;  %s5349_s20 = smov [#allocation5]  }
 0x135   : > { %p5197_p4 = scmp.ne.s32.totalorder %s5760_s26, %s5196_s16  ;;  %s5201_s24 = sshll.u32 %s5349_s20, 4  ;;  %s5202_s24 = int_to_ptr.vmem [resolvable:$false] %s5201_s24 }
 0x136   : > { %s5203_s21 = scalar_lea.vmem %s5202_s24, 512  ;;  %p5204_p1 = scmp.lt.s32.totalorder %s5760_s26, %s5202_s24 }
 0x137   : > { %p5199_p9 = pnand %p5197_p4, %p5183_p2  ;;  %p5205_p5 = scmp.lt.s32.totalorder %s5203_s21, %s5196_s16 }
 0x139   : > { %p5200_p3 = pneg %p5199_p9  ;;  %p5206_p6 = por %p5205_p5, %p5204_p1 }
 0x13b   : > { %p5207_p7 = pnand %p5206_p6, %p5200_p3 }
 0x13d   : > { %5210 = shalt.err (!%p5207_p7)
}
 0x13e   : > { %4577 = dma.hbm_to_vmem [thread:$0]  (!%p5764_p12), %s5758_s11, 256, %s5760_s26, %s5775_s19, %s6561_s2, %s6561_s2, %s6569_s7  }
 0x13f   : > { %s682_s6 = sand.u32 1, %s5333_s28   ;;  %s5211_s10 = scalar_lea.hbm %s5771_s17, 256 }
 0x140   : > { %s5810_s30 = scalar_lea.sflag [#allocation9], %s682_s6  ;;  %p5212_p1 = scmp.ne.s32.totalorder %s5771_s17, %s5211_s10 }
 0x141   : > { %s5216_s16 = scalar_lea.hbm %s6577_s14, 512  ;;  %p5217_p8 = scmp.lt.u32.totalorder %s5771_s17, %s6577_s14 }
 0x142   : > { %p5214_p3 = pnand %p5212_p1, %p5183_p2  ;;  %p5218_p10 = scmp.lt.u32.totalorder %s5216_s16, %s5211_s10 }
 0x143   : > { %p5220_p4 = scmp.lt.u32.totalorder %s5211_s10, %s5771_s17 }
 0x144   : > { %p5215_p11 = pneg %p5214_p3  ;;  %p5219_p13 = por %p5218_p10, %p5217_p8 }
 0x146   : > { %p5221_p9 = por %p5220_p4, %p5219_p13 }
 0x148   : > { %p5222_p5 = pnand %p5221_p9, %p5215_p11 }
 0x14a   : > { %5225 = shalt.err (!%p5222_p5)
}
 0x14b   : > { %s5226_s19 = scalar_lea.vmem %s5807_s18, 256  ;;  %s5350_s11 = smov [#allocation8]  }
 0x14c   : > { %p5227_p6 = scmp.ne.s32.totalorder %s5807_s18, %s5226_s19  ;;  %s5231_s26 = sshll.u32 %s5350_s11, 4  ;;  %s5232_s26 = int_to_ptr.vmem [resolvable:$false] %s5231_s26 }
 0x14d   : > { %s5233_s21 = scalar_lea.vmem %s5232_s26, 512  ;;  %p5234_p3 = scmp.lt.s32.totalorder %s5807_s18, %s5232_s26 }
 0x14e   : > { %p5229_p7 = pnand %p5227_p6, %p5183_p2  ;;  %p5235_p8 = scmp.lt.s32.totalorder %s5233_s21, %s5226_s19 }
 0x150   : > { %p5230_p1 = pneg %p5229_p7  ;;  %p5236_p10 = por %p5235_p8, %p5234_p3 }
 0x152   : > { %p5237_p13 = pnand %p5236_p10, %p5230_p1 }
 0x154   : > { %5240 = shalt.err (!%p5237_p13)
}
 0x155   : > { %4580 = dma.hbm_to_vmem [thread:$0]  (!%p5764_p12), %s5771_s17, 256, %s5807_s18, %s5810_s30, %s6561_s2, %s6561_s2, %s6569_s7  }
 0x156   : > { %p6578_p2 = scmp.ne.s32.totalorder %s6555_s0, 0 }
 0x157   : > { %s5842_s6 = sand.u32 (!%p6578_p2), 1, %s5325_s27  }
 0x158   : > { %705 = sbr.rel (%p6578_p2) target bundleno = 6868 (0x1ad4), region = 100  ;;  %s5845_s10 = sshll.u32 (!%p6578_p2), %s5842_s6, 4 }
 0x159   : > { %s708_s8 = scalar_lea.sflag (!%p6578_p2), [#allocation6], %s5842_s6  ;;  %s5849_s12 = scalar_lea.vmem (!%p6578_p2), [#allocation5], %s5845_s10 }
 0x15f   : > { %5288 = dma.done.wait (%p5739_p0), %s708_s8, 256  }
 0x160   : > { %5290 = vsyncadd (%p5739_p0), %s708_s8, 4294967040  ;;  %s716_s18 = sand.u32 1, %s5509_s5   ;;  %s720_s2 = scalar_lea.vmem [#allocation8], %s5845_s10 }
 0x161   : > { %s717_s0 = scalar_lea.sflag [#allocation9], %s716_s18 }
 0x162   : > { %5292 = dma.done.wait (%p5739_p0), %s717_s0, 256  }
 0x163   : > { %5294 = vsyncadd (%p5739_p0), %s717_s0, 4294967040  ;;  %p6579_p12 = scmp.eq.s32.totalorder %s5509_s5, 0 }
 0x165   : > { %5296 = dma.done.wait (%p6579_p12), [#allocation9], 1024   ;;  %p6580_p11 = pmov %p6579_p12 }
 0x167   : > { %5298 = vsyncadd (%p6580_p11), [#allocation9], 4294966272  ;;  %p6581_p4 = pmov %p6580_p11 }
 0x169   : > { %5300 = dma.done.wait (%p6581_p4), [#allocation12], 3072   ;;  %p6582_p9 = pmov %p6581_p4 }
 0x16a   : > { %p6583_p5 = pmov %p6581_p4 }
 0x16b   : > { %5302 = vsyncadd (%p6582_p9), [#allocation12], 4294964224 }
 0x16c   : > { %5304 = dma.done.wait (%p6583_p5), [#allocation15], 3072   ;;  %p6584_p6 = pmov %p6581_p4 }
 0x16d   : > { %p6585_p0 = pmov %p6581_p4 }
 0x16e   : > { %5306 = vsyncadd (%p6584_p6), [#allocation15], 4294964224 }
 0x16f   : > { %5308 = dma.done.wait (%p6585_p0), [#allocation18], 3072   ;;  %p6586_p7 = pmov %p6585_p0 }
 0x170   : > { %p6587_p1 = pmov %p6585_p0 }
 0x171   : > { %5310 = vsyncadd (%p6586_p7), [#allocation18], 4294964224 }
 0x172   : > { %5312 = dma.done.wait (%p6587_p1), [#allocation21], 2048   ;;  %p6588_p3 = pmov %p6585_p0 }
 0x173   : > { %v5351_v0 = vmov 0   ;;  %v4655_v1 = vld [vmem:[#allocation11 + $0x4] ss:$8 sps:$4 sm:$0xff]   ;;  %v4657_v2 = vld [vmem:[#allocation11] ss:$8 sps:$4 sm:$0xff]   ;;  %v4666_v8 = vld [vmem:[#allocation10 + $0x10] sm:$0xff]   ;;  %v825_v27 = vlaneseq }
 0x174   : > { %5314 = vsyncadd (%p6588_p3), [#allocation21], 4294965248  ;;  %1127 = vmatprep.mubr.bf16.mxu1 %v5351_v0  ;;  %1095 = vmatprep.subr.bf16.mxu1 %v4655_v1  ;;  %v4658_v3 = vld [vmem:[#allocation10] sm:$0xff]   ;;  %v4659_v4 = vld [vmem:[#allocation11 + $0x14] ss:$8 sps:$4 sm:$0xff]   ;;  %s6589_s17 = sld [smem:[#allocation38_spill]] }
 0x175   : > { %1096 = vmatpush1.bf16.msra.mxu1 %v4657_v2  ;;  %v4661_v5 = vld [vmem:[#allocation11 + $0x10] ss:$8 sps:$4 sm:$0xff]   ;;  %4287 = vmatprep.subr.bf16.mxu0 %v4658_v3  ;;  %v4662_v6 = vld [vmem:[#allocation10 + $0x8] sm:$0xff]   ;;  %v4667_v10 = vld [vmem:[#allocation11 + $0x34] ss:$8 sps:$4 sm:$0xff]   ;;  %v5886_v28 = vshrl.u32 %v825_v27, 7 }
 0x176   : > { %1097 = vmatprep.subr.bf16.mxu1 %v4659_v4  ;;  %4288 = vmatpush3.bf16.msra.mxu0 %v4658_v3  ;;  %v4663_v7 = vld [vmem:[#allocation11 + $0x24] ss:$8 sps:$4 sm:$0xff]   ;;  %v4665_v9 = vld [vmem:[#allocation11 + $0x20] ss:$8 sps:$4 sm:$0xff]   ;;  %v4670_v11 = vld [vmem:[#allocation10 + $0x18] sm:$0xff]   ;;  %s6590_s16 = sld [smem:[#allocation36_spill]] }
 0x177   : > { %4289 = vmatprep.subr.bf16.mxu0 %v4662_v6  ;;  %v4669_v12 = vld [vmem:[#allocation11 + $0x30] ss:$8 sps:$4 sm:$0xff]   ;;  %v4671_v13 = vld [vmem:[#allocation11 + $0x44] ss:$8 sps:$4 sm:$0xff]   ;;  %v4673_v15 = vld [vmem:[#allocation11 + $0x40] ss:$8 sps:$4 sm:$0xff]  }
 0x178   : > { %v4674_v14 = vld [vmem:[#allocation10 + $0x20] sm:$0xff]   ;;  %v4675_v16 = vld [vmem:[#allocation11 + $0x54] ss:$8 sps:$4 sm:$0xff]   ;;  %v4678_v17 = vld [vmem:[#allocation10 + $0x28] sm:$0xff]   ;;  %v5889_v29 = vsub.s32 0, %v5886_v28  ;;  %v5895_v31 = vsub.s32 1, %v5886_v28 }
 0x179   : > { %1098 = vmatpush1.bf16.msra.mxu1 %v4661_v5  ;;  %v815_v18 = vld [vmem:[%s5849_s12] sm:$0xff]   ;;  %v4686_v24 = vld [vmem:[#allocation10 + $0x38] sm:$0xff]   ;;  %vm1152_vm0 = vcmask 261120   ;;  %s5352_s20 = smov 96   ;;  %s823_s24 = sld [smem:[#allocation3 + %s5509_s5]]  ;;  %vm1881_vm10 = vcmask 523264  }
 0x17a   : > { %1099 = vmatprep.subr.bf16.mxu1 %v4663_v7  ;;  %4290 = vmatpush3.bf16.msra.mxu0 %v4662_v6  ;;  %v4677_v19 = vld [vmem:[#allocation11 + $0x50] ss:$8 sps:$4 sm:$0xff]   ;;  %v4679_v20 = vld [vmem:[#allocation11 + $0x64] ss:$8 sps:$4 sm:$0xff]   ;;  %v4681_v22 = vld [vmem:[#allocation11 + $0x60] ss:$8 sps:$4 sm:$0xff]  }
 0x17b   : > { %4291 = vmatprep.subr.bf16.mxu0 %v4666_v8  ;;  %v4682_v21 = vld [vmem:[#allocation10 + $0x30] sm:$0xff]   ;;  %4303 = vmatprep.mubr.bf16.mxu0 %v815_v18  ;;  %v817_v26 = vld [vmem:[%s5849_s12 + $0x8] sm:$0xff]   ;;  %s5354_s19 = smov 64   ;;  %s5355_s11 = smov 32   ;;  %vm1886_vm11 = vcmask 785408  }
 0x17c   : > { %v4683_v23 = vld [vmem:[#allocation11 + $0x74] ss:$8 sps:$4 sm:$0xff]   ;;  %v4685_v25 = vld [vmem:[#allocation11 + $0x70] ss:$8 sps:$4 sm:$0xff]   ;;  %s6593_s18 = sld [smem:[#allocation46_spill]]  ;;  %s6594_s7 = sld [smem:[#allocation47_spill]] }
 0x17d   : > { %1100 = vmatpush1.bf16.msra.mxu1 %v4665_v9  ;;  %v1003_v30 = vld [vmem:[%s6589_s17] sm:$0x3]  ;;  %s6595_s30 = sld [smem:[#allocation43_spill]]  ;;  %s6597_s21 = sld [smem:[#allocation45_spill]] }
 0x17e   : > { %1101 = vmatprep.subr.bf16.mxu1 %v4667_v10  ;;  %4292 = vmatpush3.bf16.msra.mxu0 %v4666_v8  ;;  %v1008_v32 = vrot.slane %v1003_v30, %v5889_v29  ;;  %v1012_v34 = vrot.slane %v1003_v30, %v5895_v31  ;;  %v3981_v36 = vld [vmem:[%s6590_s16] ss:$0 sm:$0xff]  ;;  %v5946_v10 = vand.u32 127, %v825_v27  ;;  %s824_s26 = sld [smem:[#allocation4 + %s5509_s5]]  ;;  %s813_s8 = scalar_lea.vmem [#allocation22], %s5845_s10 }
 0x17f   : > { %4293 = vmatprep.subr.bf16.mxu0 %v4670_v11  ;;  %s3780_s0 = sshll.u32 %s813_s8, 4  ;;  %s6600_s17 = sld [smem:[#allocation52_spill]]  ;;  %s6443_s0 = int_to_ptr.vmem [resolvable:$true] %s3780_s0 }
 0x180   : > { %vm832_vm2 = vcmp.le.s32.totalorder %v5946_v10, %v5886_v28  ;;  %s3767_s13 = scalar_lea.sflag [#allocation7], %s5842_s6  ;;  %s5241_s10 = scalar_lea.vmem %s6443_s0, 256 }
 0x181   : > { %1102 = vmatpush1.bf16.msra.mxu1 %v4669_v12  ;;  %v836_v12 = vstv %s823_s24  ;;  %s6596_s24 = sld [smem:[#allocation41_spill]]  ;;  %p5242_p8 = scmp.ne.s32.totalorder %s6443_s0, %s5241_s10 }
 0x182   : > { %1103 = vmatprep.subr.bf16.mxu1 %v4671_v13  ;;  %4294 = vmatpush3.bf16.msra.mxu0 %v4670_v11  ;;  %v828_v11 = vadd.s32 16, %v5886_v28  ;;  %v827_v13 = vadd.s32 8, %v5886_v28  ;;  %vm5951_vm1 = vcmp.lt.s32.totalorder %v5946_v10, %v836_v12  ;;  %p6601_p10 = scmp.ne.s32.totalorder %s6573_s25, 0 }
 0x183   : > { %4295 = vmatprep.subr.bf16.mxu0 %v4674_v14  ;;  %vm838_vm5 = vmand %vm832_vm2, %vm5951_vm1 }
 0x184   : > { %vm834_vm3 = vcmp.le.s32.totalorder %v5946_v10, %v828_v11  ;;  %vm833_vm4 = vcmp.le.s32.totalorder %v5946_v10, %v827_v13  ;;  %p5243_p13 = pnand %p5242_p8, %p6601_p10 }
 0x185   : > { %1104 = vmatpush1.bf16.msra.mxu1 %v4673_v15  ;;  %v829_v15 = vadd.s32 24, %v5886_v28  ;;  %vm840_vm6 = vmand %vm834_vm3, %vm5951_vm1 }
 0x186   : > { %1105 = vmatprep.subr.bf16.mxu1 %v4675_v16  ;;  %4296 = vmatpush3.bf16.msra.mxu0 %v4674_v14  ;;  %vm839_vm7 = vmand %vm833_vm4, %vm5951_vm1  ;;  %v5353_v16 = vmov -1e+09   ;;  %p5244_p2 = pneg %p5243_p13 }
 0x187   : > { %4297 = vmatprep.subr.bf16.mxu0 %v4678_v17  ;;  %vm835_vm8 = vcmp.le.s32.totalorder %v5946_v10, %v829_v15 }
 0x188   : > { %vm841_vm9 = vmand %vm835_vm8, %vm5951_vm1 }
 0x189   : > { %1106 = vmatpush1.bf16.msra.mxu1 %v4677_v19  ;;  %v5971_v19 = vsel %vm840_vm6, 0.0, %v5353_v16  ;;  %v5983_v28 = vsel %vm841_vm9, 0.0, %v5353_v16 }
 0x18a   : > { %1107 = vmatprep.subr.bf16.mxu1 %v4679_v20  ;;  %4298 = vmatpush3.bf16.msra.mxu0 %v4678_v17  ;;  %v5967_v17 = vsel %vm838_vm5, 0.0, %v5353_v16 }
 0x18b   : > { %4299 = vmatprep.subr.bf16.mxu0 %v4682_v21 }
 0x18d   : > { %1108 = vmatpush1.bf16.msra.mxu1 %v4681_v22 }
 0x18e   : > { %1109 = vmatprep.subr.bf16.mxu1 %v4683_v23  ;;  %4300 = vmatpush3.bf16.msra.mxu0 %v4682_v21  ;;  %v5974_v21 = vsel %vm839_vm7, 0.0, %v5353_v16 }
 0x18f   : > { %4301 = vmatprep.subr.bf16.mxu0 %v4686_v24 }
 0x191   : > { %1110 = vmatpush1.bf16.msra.mxu1 %v4685_v25 }
 0x192   : > { %4302 = vmatpush3.bf16.msra.mxu0 %v4686_v24 }
 0x194   : > { %1128 = vmatmul.mubr.bf16.vlgmr.msra.gmra.mrb[0].mxu1 %v815_v18 }
 0x195   : > { %1137 = vmatprep.mubr.bf16.mxu1 %v5351_v0  ;;  %4304 = vmatmul.mubr.bf16.vlgmr.msra.gmra.mrb[0].mxu0 %v817_v26 }
 0x19c   : > { %1138 = vmatmul.mubr.bf16.gmra.mrb[4].mxu1 %v817_v26 }
 0x267   : > { %v1129_v33 = vpop.f32.mrb[0].mxu1 }
 0x268   : > { %v1131_v35 = vpop.f32.mrb[1].mxu1  ;;  %v4305_v38 = vpop.f32.mrb[0].mxu0  ;;  %v1130_v39 = vadd.f32 %v1129_v33, %v1008_v32 }
 0x269   : > { %v1133_v37 = vpop.f32.mrb[2].mxu1  ;;  %v979_v42 = vadd.f32 %v4305_v38, %v3981_v36  ;;  %v970_v43 = vpop.f32.mrb[1].mxu0  ;;  %v1132_v44 = vadd.f32 %v1131_v35, %v1012_v34 }
 0x26a   : > { %v1134_v40 = vadd.f32 %v1133_v37, %v1008_v32  ;;  %v1135_v41 = vpop.f32.mrb[3].mxu1  ;;  %v971_v46 = vadd.f32 %v3981_v36, %v970_v43  ;;  %v4306_v47 = vpop.f32.mrb[2].mxu0 }
 0x26b   : > { %v1136_v45 = vadd.f32 %v1135_v41, %v1012_v34  ;;  %v982_v49 = vadd.f32 %v4306_v47, %v3981_v36  ;;  %v973_v50 = vpop.f32.mrb[3].mxu0 }
 0x26c   : > { %v5902_v48 = vpack.c.bf16 %v1134_v40, %v1130_v39  ;;  %v974_v52 = vadd.f32 %v3981_v36, %v973_v50 }
 0x26d   : > { %v5904_v51 = vpack.c.bf16 %v1136_v45, %v1132_v44  ;;  %v5906_v53 = vpack.c.bf16 %v982_v49, %v979_v42 }
 0x26e   : > { %1325 = vrot.lane.b32.xlu0 %v5902_v48, %s5352_s20  ;;  %4495 = vmatprep.subr.msk.bf16.mxu1 %vm1152_vm0, %v5902_v48  ;;  %v1160_v54 = vsel %vm1152_vm0, %v5902_v48, 0  ;;  %v5914_v55 = vpack.c.bf16 %v974_v52, %v971_v46 }
 0x26f   : > { %v1139_v56 = vpop.f32.mrb[4].mxu1  ;;  %4308 = vmatpush3.bf16.xpose.msra.mxu1 %v1160_v54 }
 0x270   : > { %v1141_v57 = vpop.f32.mrb[5].mxu1  ;;  %1319 = vrot.lane.b32.xlu1 %v5914_v55, %s5352_s20  ;;  %4311 = vmatprep.mubr.msk.bf16.mxu1 %vm1152_vm0, %v5914_v55  ;;  %v1140_v59 = vadd.f32 %v1139_v56, %v1008_v32 }
 0x271   : > { %v1143_v58 = vpop.f32.mrb[6].mxu1  ;;  %v1142_v62 = vadd.f32 %v1141_v57, %v1012_v34 }
 0x272   : > { %v1144_v60 = vadd.f32 %v1143_v58, %v1008_v32  ;;  %v1145_v61 = vpop.f32.mrb[7].mxu1 }
 0x273   : > { %v1146_v63 = vadd.f32 %v1145_v61, %v1012_v34 }
 0x274   : > { %v5920_v1 = vpack.c.bf16 %v1144_v60, %v1140_v59  ;;  %1321 = vrot.lane.b32.xlu1 %v5906_v53, %s5352_s20 }
 0x275   : > { %v5922_v2 = vpack.c.bf16 %v1146_v63, %v1142_v62 }
 0x276   : > { %1327 = vrot.lane.b32.xlu0 %v5920_v1, %s5352_s20  ;;  %4496 = vmatprep.subr.msk.bf16.mxu1 %vm1152_vm0, %v5920_v1  ;;  %v1163_v3 = vsel %vm1152_vm0, %v5920_v1, 0 }
 0x277   : > { %4310 = vmatpush3.bf16.xpose.msra.mxu1 %v1163_v3 }
 0x278   : > { %4315 = vmatprep.subr.bf16.mxu1 %v5904_v51 }
 0x27e   : > { %4312 = vmatmul.mubr.msk.bf16.vlgmr.msra.gmra.mrb[8].mxu1 %vm1152_vm0, %v5906_v53 }
 0x27f   : > { %4316 = vmatpush3.bf16.msra.mxu1 %v5904_v51 }
 0x280   : > { %4317 = vmatprep.subr.bf16.mxu1 %v5922_v2 }
 0x283   : > { %4318 = vmatpush3.bf16.msra.mxu1 %v5922_v2 }
 0x2e0   : > { %v1326_v4 = vpop.permute.xlu0 %1325 }
 0x2e1   : > { %4497 = vmatprep.subr.msk.bf16.mxu0 %vm1152_vm0, %v1326_v4  ;;  %v1336_v5 = vsel %vm1152_vm0, %v1326_v4, 0 }
 0x2e2   : > { %4324 = vmatpush3.bf16.xpose.msra.mxu0 %v1336_v5  ;;  %v1320_v6 = vpop.permute.xlu1 %1319 }
 0x2e3   : > { %4327 = vmatprep.mubr.msk.bf16.mxu0 %vm1152_vm0, %v1320_v6 }
 0x2e6   : > { %v1322_v9 = vpop.permute.xlu1 %1321 }
 0x2e8   : > { %v1328_v7 = vpop.permute.xlu0 %1327 }
 0x2e9   : > { %4498 = vmatprep.subr.msk.bf16.mxu0 %vm1152_vm0, %v1328_v7  ;;  %v1339_v8 = vsel %vm1152_vm0, %v1328_v7, 0 }
 0x2ea   : > { %4326 = vmatpush3.bf16.xpose.msra.mxu0 %v1339_v8 }
 0x2f1   : > { %4328 = vmatmul.mubr.msk.bf16.vlgmr.msra.gmra.mrb[4].mxu0 %vm1152_vm0, %v1322_v9 }
 0x351   : > { %v4313_v18 = vpop.f32.mrb[8].mxu1 }
 0x352   : > { %v1199_v20 = vpop.f32.mrb[9].mxu1  ;;  %v1208_v25 = vadd.f32 %v4313_v18, %v5971_v19 }
 0x353   : > { %v1200_v22 = vadd.f32 %v1199_v20, %v5967_v17  ;;  %v4314_v23 = vpop.f32.mrb[10].mxu1 }
 0x354   : > { %v1202_v24 = vpop.f32.mrb[11].mxu1  ;;  %v1211_v32 = vadd.f32 %v4314_v23, %v5983_v28  ;;  %v1220_v33 = vsel %vm1152_vm0, %v1208_v25, -inf }
 0x355   : > { %v1203_v26 = vadd.f32 %v1202_v24, %v5974_v21  ;;  %v1214_v27 = vsel %vm1152_vm0, %v1200_v22, -inf }
 0x356   : > { %1215 = vmax.xlane.f32.xlu0 %v1214_v27  ;;  %v1223_v34 = vsel %vm1152_vm0, %v1211_v32, -inf }
 0x357   : > { %v1217_v30 = vsel %vm1152_vm0, %v1203_v26, -inf }
 0x358   : > { %1218 = vmax.xlane.f32.xlu1 %v1217_v30 }
 0x35a   : > { %1221 = vmax.xlane.f32.xlu0 %v1220_v33 }
 0x35e   : > { %1224 = vmax.xlane.f32.xlu0 %v1223_v34 }
 0x3c4   : > { %v4329_v35 = vpop.f32.mrb[4].mxu0 }
 0x3c5   : > { %v1375_v36 = vpop.f32.mrb[5].mxu0  ;;  %v1384_v40 = vadd.f32 %v4329_v35, %v5971_v19 }
 0x3c6   : > { %v1376_v37 = vadd.f32 %v1375_v36, %v5967_v17  ;;  %v4330_v38 = vpop.f32.mrb[6].mxu0 }
 0x3c7   : > { %v1378_v39 = vpop.f32.mrb[7].mxu0  ;;  %v1387_v43 = vadd.f32 %v4330_v38, %v5983_v28  ;;  %v1396_v45 = vsel %vm1152_vm0, %v1384_v40, -inf }
 0x3c8   : > { %v1379_v41 = vadd.f32 %v1378_v39, %v5974_v21  ;;  %v1390_v42 = vsel %vm1152_vm0, %v1376_v37, -inf }
 0x3c9   : > { %1391 = vmax.xlane.f32.xlu1 %v1390_v42  ;;  %v1399_v46 = vsel %vm1152_vm0, %v1387_v43, -inf }
 0x3ca   : > { %v1393_v44 = vsel %vm1152_vm0, %v1379_v41, -inf }
 0x3cb   : > { %1394 = vmax.xlane.f32.xlu0 %v1393_v44 }
 0x3cd   : > { %1397 = vmax.xlane.f32.xlu1 %v1396_v45 }
 0x3cf   : > { %1400 = vmax.xlane.f32.xlu0 %v1399_v46 }
 0x3de   : > { %1438 = vrot.lane.b32.xlu1 %v5904_v51, %s5352_s20 }
 0x3e3   : > { %v1216_v47 = vpop.xlane.xlu0 %1215 }
 0x3e4   : > { %v1226_v60 = vsub.f32 %v1200_v22, %v1216_v47 }
 0x3e5   : > { %v1219_v49 = vpop.xlane.xlu1 %1218 }
 0x3e6   : > { %v1227_v52 = vsub.f32 %v1203_v26, %v1219_v49  ;;  %v1230_v62 = vmul.f32 1.442695, %v1226_v60 }
 0x3e7   : > { %v1222_v50 = vpop.xlane.xlu0 %1221 }
 0x3e8   : > { %v1228_v56 = vsub.f32 %v1208_v25, %v1222_v50  ;;  %v1232_v58 = vmul.f32 1.442695, %v1227_v52 }
 0x3ea   : > { %v1234_v61 = vmul.f32 1.442695, %v1228_v56 }
 0x3eb   : > { %v1225_v54 = vpop.xlane.xlu0 %1224 }
 0x3ec   : > { %v1229_v57 = vsub.f32 %v1211_v32, %v1225_v54 }
 0x3ee   : > { %v1236_v59 = vmul.f32 1.442695, %v1229_v57 }
 0x3f0   : > { %4781 = vpow2.f32 %v1236_v59 }
 0x3f1   : > { %4783 = vpow2.f32 %v1232_v58 }
 0x3f2   : > { %4785 = vpow2.f32 %v1234_v61 }
 0x3f3   : > { %4787 = vpow2.f32 %v1230_v62 }
 0x3fa   : > { %v5999_v63 = vpop.eup %4781 }
 0x3fb   : > { %v1247_v3 = vsel %vm1152_vm0, %v5999_v63, 0.0  ;;  %v4784_v4 = vpop.eup %4783 }
 0x3fc   : > { %1248 = vadd.xlane.f32.xlu0 %v1247_v3  ;;  %v4786_v5 = vpop.eup %4785  ;;  %v1241_v6 = vsel %vm1152_vm0, %v4784_v4, 0.0 }
 0x3fd   : > { %v1244_v7 = vsel %vm1152_vm0, %v4786_v5, 0.0  ;;  %v4788_v8 = vpop.eup %4787 }
 0x3fe   : > { %v1238_v9 = vsel %vm1152_vm0, %v4788_v8, 0.0 }
 0x400   : > { %1242 = vadd.xlane.f32.xlu0 %v1241_v6 }
 0x402   : > { %1245 = vadd.xlane.f32.xlu1 %v1244_v7 }
 0x406   : > { %1239 = vadd.xlane.f32.xlu1 %v1238_v9 }
 0x456   : > { %v1392_v11 = vpop.xlane.xlu1 %1391 }
 0x457   : > { %v1402_v12 = vsub.f32 %v1376_v37, %v1392_v11 }
 0x458   : > { %v1395_v13 = vpop.xlane.xlu0 %1394 }
 0x459   : > { %v1403_v15 = vsub.f32 %v1379_v41, %v1395_v13  ;;  %v1406_v20 = vmul.f32 1.442695, %v1402_v12 }
 0x45a   : > { %v1398_v14 = vpop.xlane.xlu1 %1397 }
 0x45b   : > { %v1404_v18 = vsub.f32 %v1384_v40, %v1398_v14  ;;  %v1408_v26 = vmul.f32 1.442695, %v1403_v15 }
 0x45c   : > { %v1401_v22 = vpop.xlane.xlu0 %1400 }
 0x45d   : > { %v1410_v23 = vmul.f32 1.442695, %v1404_v18  ;;  %v1405_v24 = vsub.f32 %v1387_v43, %v1401_v22 }
 0x45e   : > { %v1439_v25 = vpop.permute.xlu1 %1438 }
 0x45f   : > { %4789 = vpow2.f32 %v1410_v23  ;;  %v1412_v27 = vmul.f32 1.442695, %v1405_v24  ;;  %4331 = vmatprep.subr.bf16.mxu1 %v1439_v25 }
 0x460   : > { %4791 = vpow2.f32 %v1406_v20 }
 0x461   : > { %4793 = vpow2.f32 %v1412_v27 }
 0x462   : > { %4795 = vpow2.f32 %v1408_v26 }
 0x469   : > { %v4790_v30 = vpop.eup %4789 }
 0x46a   : > { %v4792_v32 = vpop.eup %4791  ;;  %v1420_v33 = vsel %vm1152_vm0, %v4790_v30, 0.0 }
 0x46b   : > { %v4794_v34 = vpop.eup %4793  ;;  %1421 = vadd.xlane.f32.xlu1 %v1420_v33  ;;  %v1414_v37 = vsel %vm1152_vm0, %v4792_v32, 0.0 }
 0x46c   : > { %v1423_v35 = vsel %vm1152_vm0, %v4794_v34, 0.0  ;;  %v4796_v36 = vpop.eup %4795 }
 0x46d   : > { %1424 = vadd.xlane.f32.xlu0 %v1423_v35  ;;  %v1417_v38 = vsel %vm1152_vm0, %v4796_v36, 0.0 }
 0x46f   : > { %1415 = vadd.xlane.f32.xlu1 %v1414_v37 }
 0x471   : > { %1418 = vadd.xlane.f32.xlu0 %v1417_v38 }
 0x480   : > { %1505 = vrot.lane.b32.xlu1 %v5902_v48, %s5354_s19 }
 0x484   : > { %1507 = vrot.lane.b32.xlu1 %v5920_v1, %s5354_s19 }
 0x487   : > { %1440 = vrot.lane.b32.xlu0 %v5922_v2, %s5352_s20 }
 0x488   : > { %1503 = vrot.lane.b32.xlu1 %v5906_v53, %s5354_s19 }
 0x489   : > { %v1249_v39 = vpop.xlane.xlu0 %1248 }
 0x48b   : > { %1501 = vrot.lane.b32.xlu0 %v5914_v55, %s5354_s19 }
 0x48d   : > { %v1243_v40 = vpop.xlane.xlu0 %1242 }
 0x48f   : > { %v1246_v41 = vpop.xlane.xlu1 %1245 }
 0x490   : > { %4797 = vrcp.f32 %v1246_v41 }
 0x491   : > { %4799 = vrcp.f32 %v1243_v40 }
 0x492   : > { %4801 = vrcp.f32 %v1249_v39 }
 0x493   : > { %v1240_v42 = vpop.xlane.xlu1 %1239 }
 0x494   : > { %4803 = vrcp.f32 %v1240_v42 }
 0x49a   : > { %v4798_v43 = vpop.eup %4797 }
 0x49b   : > { %v4800_v44 = vpop.eup %4799  ;;  %v1256_v47 = vmul.f32 %v4798_v43, %v4786_v5 }
 0x49c   : > { %v4802_v45 = vpop.eup %4801  ;;  %v1255_v50 = vmul.f32 %v4800_v44, %v4784_v4 }
 0x49d   : > { %v1257_v52 = vmul.f32 %v4802_v45, %v5999_v63 }
 0x49e   : > { %v4804_v46 = vpop.eup %4803 }
 0x49f   : > { %v1254_v49 = vmul.f32 %v4804_v46, %v4788_v8  ;;  %v1259_v56 = vpack.c.bf16 %v1257_v52, %v1256_v47 }
 0x4a1   : > { %v1258_v54 = vpack.c.bf16 %v1255_v50, %v1254_v49 }
 0x4a3   : > { %4319 = vmatprep.mubr.msk.bf16.mxu1 %vm1152_vm0, %v1258_v54 }
 0x4a4   : > { %4320 = vmatmul.mubr.msk.bf16.vlgmr.msra.gmra.mrb[12].mxu1 %vm1152_vm0, %v1259_v56 }
 0x4a5   : > { %4332 = vmatpush3.bf16.msra.mxu1 %v1439_v25 }
 0x4f8   : > { %v1422_v57 = vpop.xlane.xlu1 %1421 }
 0x4fa   : > { %v1425_v58 = vpop.xlane.xlu0 %1424 }
 0x4fb   : > { %4805 = vrcp.f32 %v1425_v58 }
 0x4fc   : > { %v1416_v59 = vpop.xlane.xlu1 %1415 }
 0x4fd   : > { %4807 = vrcp.f32 %v1416_v59 }
 0x4fe   : > { %4809 = vrcp.f32 %v1422_v57  ;;  %v1419_v60 = vpop.xlane.xlu0 %1418 }
 0x4ff   : > { %4811 = vrcp.f32 %v1419_v60 }
 0x500   : > { %v1506_v62 = vpop.permute.xlu1 %1505 }
 0x501   : > { %v1516_v14 = vsel %vm1152_vm0, %v1506_v62, 0 }
 0x502   : > { %v1441_v61 = vpop.permute.xlu0 %1440 }
 0x503   : > { %4333 = vmatprep.subr.bf16.mxu1 %v1441_v61 }
 0x504   : > { %4334 = vmatpush3.bf16.msra.mxu1 %v1441_v61  ;;  %v1508_v15 = vpop.permute.xlu1 %1507 }
 0x505   : > { %4499 = vmatprep.subr.msk.bf16.mxu1 %vm1152_vm0, %v1506_v62  ;;  %v4806_v63 = vpop.eup %4805  ;;  %v1519_v18 = vsel %vm1152_vm0, %v1508_v15, 0 }
 0x506   : > { %v1433_v6 = vmul.f32 %v4806_v63, %v4794_v34  ;;  %v1502_v13 = vpop.permute.xlu0 %1501 }
 0x507   : > { %v4808_v3 = vpop.eup %4807 }
 0x508   : > { %v4810_v4 = vpop.eup %4809  ;;  %v1430_v7 = vmul.f32 %v4808_v3, %v4792_v32  ;;  %v1504_v20 = vpop.permute.xlu1 %1503 }
 0x509   : > { %v4812_v5 = vpop.eup %4811  ;;  %v1432_v9 = vmul.f32 %v4810_v4, %v4790_v30 }
 0x50a   : > { %v1431_v8 = vmul.f32 %v4812_v5, %v4796_v36 }
 0x50b   : > { %v1435_v12 = vpack.c.bf16 %v1433_v6, %v1432_v9 }
 0x50c   : > { %v1434_v11 = vpack.c.bf16 %v1431_v8, %v1430_v7 }
 0x50e   : > { %4335 = vmatprep.mubr.msk.bf16.mxu1 %vm1152_vm0, %v1434_v11 }
 0x50f   : > { %4336 = vmatmul.mubr.msk.bf16.vlgmr.msra.gmra.mrb[16].mxu1 %vm1152_vm0, %v1435_v12 }
 0x510   : > { %4340 = vmatpush3.bf16.xpose.msra.mxu1 %v1516_v14  ;;  %4343 = vmatprep.mubr.msk.bf16.mxu1 %vm1152_vm0, %v1502_v13 }
 0x511   : > { %4500 = vmatprep.subr.msk.bf16.mxu1 %vm1152_vm0, %v1508_v15 }
 0x518   : > { %4342 = vmatpush3.bf16.xpose.msra.mxu1 %v1519_v18 }
 0x51f   : > { %4344 = vmatmul.mubr.msk.bf16.vlgmr.msra.gmra.mrb[20].mxu1 %vm1152_vm0, %v1504_v20 }
 0x577   : > { %v6031_v22 = vpop.f32.mrb[12].mxu1 }
 0x578   : > { %v6033_v23 = vpop.f32.mrb[13].mxu1 }
 0x579   : > { %v6035_v24 = vpop.f32.mrb[14].mxu1 }
 0x57a   : > { %v1316_v25 = vpack.c.bf16 %v6035_v24, %v6031_v22  ;;  %v6039_v26 = vpop.f32.mrb[15].mxu1  ;;  %v4024_v22 = vld [vmem:[%s6497_s9] ss:$0 sm:$0xff]  ;;  %v4933_v24 = vld [vmem:[%s5849_s12] sm:$0xff]  }
 0x57b   : > { %v1315_v27 = vpack.c.bf16 %v6039_v26, %v6033_v23 }
 0x5e2   : > { %v6043_v30 = vpop.f32.mrb[16].mxu1 }
 0x5e3   : > { %v6045_v32 = vpop.f32.mrb[17].mxu1 }
 0x5e4   : > { %v6047_v33 = vpop.f32.mrb[18].mxu1 }
 0x5e5   : > { %v1500_v34 = vpack.c.bf16 %v6047_v33, %v6043_v30  ;;  %v6051_v35 = vpop.f32.mrb[19].mxu1 }
 0x5e6   : > { %v1499_v36 = vpack.c.bf16 %v6051_v35, %v6045_v32 }
 0x5f2   : > { %v4345_v37 = vpop.f32.mrb[20].mxu1 }
 0x5f3   : > { %v1555_v38 = vpop.f32.mrb[21].mxu1  ;;  %v1564_v42 = vadd.f32 %v4345_v37, %v5971_v19 }
 0x5f4   : > { %v1556_v39 = vadd.f32 %v1555_v38, %v5967_v17  ;;  %v4346_v40 = vpop.f32.mrb[22].mxu1 }
 0x5f5   : > { %v1558_v41 = vpop.f32.mrb[23].mxu1  ;;  %v1567_v46 = vadd.f32 %v4346_v40, %v5983_v28  ;;  %v1576_v47 = vsel %vm1152_vm0, %v1564_v42, -inf }
 0x5f6   : > { %v1559_v43 = vadd.f32 %v1558_v41, %v5974_v21  ;;  %v1570_v44 = vsel %vm1152_vm0, %v1556_v39, -inf }
 0x5f7   : > { %1571 = vmax.xlane.f32.xlu0 %v1570_v44  ;;  %v1579_v49 = vsel %vm1152_vm0, %v1567_v46, -inf }
 0x5f8   : > { %v1573_v45 = vsel %vm1152_vm0, %v1559_v43, -inf }
 0x5f9   : > { %1574 = vmax.xlane.f32.xlu1 %v1573_v45 }
 0x5fb   : > { %1577 = vmax.xlane.f32.xlu0 %v1576_v47 }
 0x5ff   : > { %1580 = vmax.xlane.f32.xlu0 %v1579_v49 }
 0x60a   : > { %1616 = vrot.lane.b32.xlu1 %v5904_v51, %s5354_s19 }
 0x684   : > { %v1572_v50 = vpop.xlane.xlu0 %1571 }
 0x685   : > { %v1582_v54 = vsub.f32 %v1556_v39, %v1572_v50 }
 0x686   : > { %v1575_v52 = vpop.xlane.xlu1 %1574 }
 0x687   : > { %v1586_v59 = vmul.f32 1.442695, %v1582_v54  ;;  %v1583_v60 = vsub.f32 %v1559_v43, %v1575_v52 }
 0x688   : > { %v1578_v56 = vpop.xlane.xlu0 %1577 }
 0x689   : > { %v1584_v57 = vsub.f32 %v1564_v42, %v1578_v56  ;;  %v1588_v3 = vmul.f32 1.442695, %v1583_v60 }
 0x68a   : > { %v1617_v58 = vpop.permute.xlu1 %1616 }
 0x68b   : > { %v1590_v61 = vmul.f32 1.442695, %v1584_v57  ;;  %4347 = vmatprep.subr.bf16.mxu0 %v1617_v58 }
 0x68c   : > { %4348 = vmatpush3.bf16.msra.mxu0 %v1617_v58  ;;  %v1581_v62 = vpop.xlane.xlu0 %1580 }
 0x68d   : > { %4813 = vpow2.f32 %v1590_v61  ;;  %v1585_v63 = vsub.f32 %v1567_v46, %v1581_v62 }
 0x68e   : > { %4815 = vpow2.f32 %v1586_v59 }
 0x68f   : > { %v1592_v4 = vmul.f32 1.442695, %v1585_v63 }
 0x691   : > { %4817 = vpow2.f32 %v1592_v4 }
 0x692   : > { %4819 = vpow2.f32 %v1588_v3 }
 0x697   : > { %v4814_v5 = vpop.eup %4813 }
 0x698   : > { %v1600_v6 = vsel %vm1152_vm0, %v4814_v5, 0.0  ;;  %v4816_v7 = vpop.eup %4815 }
 0x699   : > { %1601 = vadd.xlane.f32.xlu1 %v1600_v6  ;;  %v1594_v9 = vsel %vm1152_vm0, %v4816_v7, 0.0 }
 0x69b   : > { %v4818_v8 = vpop.eup %4817 }
 0x69c   : > { %v1603_v11 = vsel %vm1152_vm0, %v4818_v8, 0.0  ;;  %v4820_v12 = vpop.eup %4819 }
 0x69d   : > { %1595 = vadd.xlane.f32.xlu1 %v1594_v9  ;;  %1604 = vadd.xlane.f32.xlu0 %v1603_v11  ;;  %v1597_v13 = vsel %vm1152_vm0, %v4820_v12, 0.0 }
 0x6a1   : > { %1598 = vadd.xlane.f32.xlu0 %v1597_v13 }
 0x6ae   : > { %1683 = vrot.lane.b32.xlu1 %v5902_v48, %s5355_s11 }
 0x6b2   : > { %1685 = vrot.lane.b32.xlu1 %v5920_v1, %s5355_s11 }
 0x6b6   : > { %1681 = vrot.lane.b32.xlu1 %v5906_v53, %s5355_s11 }
 0x6b7   : > { %1618 = vrot.lane.b32.xlu0 %v5922_v2, %s5354_s19 }
 0x6bb   : > { %1679 = vrot.lane.b32.xlu0 %v5914_v55, %s5355_s11 }
 0x726   : > { %v1602_v14 = vpop.xlane.xlu1 %1601 }
 0x72a   : > { %v1596_v15 = vpop.xlane.xlu1 %1595  ;;  %v1605_v18 = vpop.xlane.xlu0 %1604 }
 0x72b   : > { %4821 = vrcp.f32 %v1605_v18 }
 0x72c   : > { %4823 = vrcp.f32 %v1596_v15 }
 0x72d   : > { %4825 = vrcp.f32 %v1602_v14 }
 0x72e   : > { %v1599_v20 = vpop.xlane.xlu0 %1598  ;;  %v1684_v1 = vpop.permute.xlu1 %1683 }
 0x72f   : > { %4827 = vrcp.f32 %v1599_v20  ;;  %v1694_v46 = vsel %vm1152_vm0, %v1684_v1, 0 }
 0x732   : > { %v1619_v48 = vpop.permute.xlu0 %1618  ;;  %v1686_v47 = vpop.permute.xlu1 %1685 }
 0x733   : > { %4349 = vmatprep.subr.bf16.mxu0 %v1619_v48  ;;  %v1697_v49 = vsel %vm1152_vm0, %v1686_v47, 0 }
 0x734   : > { %4350 = vmatpush3.bf16.msra.mxu0 %v1619_v48 }
 0x735   : > { %4501 = vmatprep.subr.msk.bf16.mxu0 %vm1152_vm0, %v1684_v1  ;;  %v4822_v53 = vpop.eup %4821 }
 0x736   : > { %v4824_v37 = vpop.eup %4823  ;;  %v1613_v40 = vmul.f32 %v4822_v53, %v4818_v8  ;;  %v1680_v45 = vpop.permute.xlu0 %1679 }
 0x737   : > { %v4826_v38 = vpop.eup %4825  ;;  %v1610_v55 = vmul.f32 %v4824_v37, %v4816_v7  ;;  %v1682_v50 = vpop.permute.xlu1 %1681 }
 0x738   : > { %v1612_v42 = vmul.f32 %v4826_v38, %v4814_v5 }
 0x739   : > { %v4828_v39 = vpop.eup %4827 }
 0x73a   : > { %v1611_v41 = vmul.f32 %v4828_v39, %v4820_v12  ;;  %v1615_v44 = vpack.c.bf16 %v1613_v40, %v1612_v42 }
 0x73c   : > { %v1614_v43 = vpack.c.bf16 %v1611_v41, %v1610_v55 }
 0x73e   : > { %4351 = vmatprep.mubr.msk.bf16.mxu0 %vm1152_vm0, %v1614_v43 }
 0x73f   : > { %4352 = vmatmul.mubr.msk.bf16.vlgmr.msra.gmra.mrb[8].mxu0 %vm1152_vm0, %v1615_v44 }
 0x740   : > { %4356 = vmatpush3.bf16.xpose.msra.mxu0 %v1694_v46  ;;  %4359 = vmatprep.mubr.msk.bf16.mxu0 %vm1152_vm0, %v1680_v45 }
 0x741   : > { %4502 = vmatprep.subr.msk.bf16.mxu0 %vm1152_vm0, %v1686_v47 }
 0x748   : > { %4358 = vmatpush3.bf16.xpose.msra.mxu0 %v1697_v49 }
 0x74f   : > { %4360 = vmatmul.mubr.msk.bf16.vlgmr.msra.gmra.mrb[12].mxu0 %vm1152_vm0, %v1682_v50 }
 0x812   : > { %v4353_v52 = vpop.f32.mrb[8].mxu0 }
 0x813   : > { %v1662_v54 = vpop.f32.mrb[9].mxu0 }
 0x814   : > { %v4354_v56 = vpop.f32.mrb[10].mxu0 }
 0x815   : > { %v1678_v57 = vpack.c.bf16 %v4354_v56, %v4353_v52  ;;  %v1665_v58 = vpop.f32.mrb[11].mxu0  ;;  %v4690_v56 = vld [vmem:[#allocation13 + $0x8] sm:$0xff]  }
 0x816   : > { %v1677_v59 = vpack.c.bf16 %v1665_v58, %v1662_v54  ;;  %v4689_v54 = vld [vmem:[#allocation13] sm:$0xff]   ;;  %v4692_v58 = vld [vmem:[#allocation13 + $0x18] sm:$0xff]  }
 0x822   : > { %v4361_v60 = vpop.f32.mrb[12].mxu0 }
 0x823   : > { %v1733_v61 = vpop.f32.mrb[13].mxu0  ;;  %v1742_v4 = vadd.f32 %v4361_v60, %v5971_v19  ;;  %v4694_v60 = vld [vmem:[#allocation13 + $0x28] sm:$0xff]  }
 0x824   : > { %v1734_v62 = vadd.f32 %v1733_v61, %v5967_v17  ;;  %v4362_v63 = vpop.f32.mrb[14].mxu0  ;;  %v4695_v61 = vld [vmem:[#allocation13 + $0x30] sm:$0xff]  }
 0x825   : > { %v1736_v3 = vpop.f32.mrb[15].mxu0  ;;  %v1745_v8 = vadd.f32 %v4362_v63, %v5983_v28  ;;  %v1754_v9 = vsel %vm1152_vm0, %v1742_v4, -inf }
 0x826   : > { %v1737_v5 = vadd.f32 %v1736_v3, %v5974_v21  ;;  %v1748_v6 = vsel %vm1152_vm0, %v1734_v62, -inf }
 0x827   : > { %1749 = vmax.xlane.f32.xlu0 %v1748_v6  ;;  %v1757_v11 = vsel %vm1152_vm0, %v1745_v8, -inf }
 0x828   : > { %v1751_v7 = vsel %vm1152_vm0, %v1737_v5, -inf }
 0x829   : > { %1752 = vmax.xlane.f32.xlu1 %v1751_v7 }
 0x82b   : > { %1755 = vmax.xlane.f32.xlu0 %v1754_v9 }
 0x82f   : > { %1758 = vmax.xlane.f32.xlu0 %v1757_v11 }
 0x8b4   : > { %v1750_v17 = vpop.xlane.xlu0 %1749 }
 0x8b5   : > { %v1760_v12 = vsub.f32 %v1734_v62, %v1750_v17  ;;  %v4696_v62 = vld [vmem:[#allocation13 + $0x38] sm:$0xff]  }
 0x8b6   : > { %v1753_v13 = vpop.xlane.xlu1 %1752 }
 0x8b7   : > { %v1764_v21 = vmul.f32 1.442695, %v1760_v12  ;;  %v1761_v15 = vsub.f32 %v1737_v5, %v1753_v13 }
 0x8b8   : > { %v1756_v19 = vpop.xlane.xlu0 %1755 }
 0x8b9   : > { %v1762_v14 = vsub.f32 %v1742_v4, %v1756_v19  ;;  %v1766_v1 = vmul.f32 1.442695, %v1761_v15 }
 0x8bb   : > { %v1768_v18 = vmul.f32 1.442695, %v1762_v14 }
 0x8bc   : > { %v1759_v20 = vpop.xlane.xlu0 %1758 }
 0x8bd   : > { %4829 = vpow2.f32 %v1768_v18  ;;  %v1763_v48 = vsub.f32 %v1745_v8, %v1759_v20 }
 0x8be   : > { %4831 = vpow2.f32 %v1764_v21 }
 0x8bf   : > { %v1770_v28 = vmul.f32 1.442695, %v1763_v48 }
 0x8c1   : > { %4833 = vpow2.f32 %v1770_v28 }
 0x8c2   : > { %4835 = vpow2.f32 %v1766_v1  ;;  %v850_v1 = vunpack.c.h.bf16 %v4933_v24 }
 0x8c7   : > { %v4830_v53 = vpop.eup %4829 }
 0x8c8   : > { %v1778_v37 = vsel %vm1152_vm0, %v4830_v53, 0.0  ;;  %v4832_v38 = vpop.eup %4831 }
 0x8c9   : > { %1779 = vadd.xlane.f32.xlu1 %v1778_v37  ;;  %v1772_v40 = vsel %vm1152_vm0, %v4832_v38, 0.0 }
 0x8cb   : > { %v4834_v39 = vpop.eup %4833 }
 0x8cc   : > { %v1781_v55 = vsel %vm1152_vm0, %v4834_v39, 0.0  ;;  %v4836_v41 = vpop.eup %4835 }
 0x8cd   : > { %1773 = vadd.xlane.f32.xlu1 %v1772_v40  ;;  %1782 = vadd.xlane.f32.xlu0 %v1781_v55  ;;  %v1775_v42 = vsel %vm1152_vm0, %v4836_v41, 0.0 }
 0x8d1   : > { %1776 = vadd.xlane.f32.xlu0 %v1775_v42 }
 0x8de   : > { %1794 = vrot.lane.b32.xlu1 %v5904_v51, %s5355_s11 }
 0x8e2   : > { %1859 = vrot.lane.b32.xlu1 %v1499_v36, %s5355_s11 }
 0x8e6   : > { %1861 = vrot.lane.b32.xlu1 %v1500_v34, %s5355_s11 }
 0x8e7   : > { %1796 = vrot.lane.b32.xlu0 %v5922_v2, %s5355_s11 }
 0x8ea   : > { %1867 = vrot.lane.b32.xlu1 %v1678_v57, %s5354_s19  ;;  %v4691_v57 = vld [vmem:[#allocation13 + $0x10] sm:$0xff]  }
 0x8eb   : > { %1865 = vrot.lane.b32.xlu0 %v1677_v59, %s5354_s19  ;;  %v4693_v59 = vld [vmem:[#allocation13 + $0x20] sm:$0xff]  }
 0x956   : > { %v1780_v43 = vpop.xlane.xlu1 %1779 }
 0x95a   : > { %v1774_v44 = vpop.xlane.xlu1 %1773  ;;  %v1783_v51 = vpop.xlane.xlu0 %1782 }
 0x95b   : > { %4837 = vrcp.f32 %v1783_v51  ;;  %v4697_v51 = vld [vmem:[#allocation16] ss:$8 sps:$4 sm:$0xff]  }
 0x95c   : > { %4839 = vrcp.f32 %v1774_v44 }
 0x95d   : > { %4841 = vrcp.f32 %v1780_v43 }
 0x95e   : > { %v1795_v32 = vpop.permute.xlu1 %1794  ;;  %v1777_v35 = vpop.xlane.xlu0 %1776 }
 0x95f   : > { %4843 = vrcp.f32 %v1777_v35  ;;  %4363 = vmatprep.subr.bf16.mxu1 %v1795_v32  ;;  %v4702_v35 = vld [vmem:[#allocation16 + $0x14] ss:$8 sps:$4 sm:$0xff]  }
 0x960   : > { %4364 = vmatpush3.bf16.msra.mxu1 %v1795_v32  ;;  %v4699_v32 = vld [vmem:[#allocation16 + $0x4] ss:$8 sps:$4 sm:$0xff]  }
 0x962   : > { %v1797_v30 = vpop.permute.xlu0 %1796  ;;  %v1860_v8 = vpop.permute.xlu1 %1859 }
 0x963   : > { %4365 = vmatprep.subr.bf16.mxu1 %v1797_v30  ;;  %v1877_v12 = vsel %vm1152_vm0, %v1315_v27, %v1860_v8 }
 0x964   : > { %4366 = vmatpush3.bf16.msra.mxu1 %v1797_v30  ;;  %v4700_v30 = vld [vmem:[#allocation16 + $0x10] ss:$8 sps:$4 sm:$0xff]  }
 0x965   : > { %v4838_v33 = vpop.eup %4837  ;;  %4371 = vmatprep.subr.bf16.mxu1 %v4689_v54 }
 0x966   : > { %v4840_v2 = vpop.eup %4839  ;;  %v1791_v45 = vmul.f32 %v4838_v33, %v4834_v39  ;;  %v1862_v9 = vpop.permute.xlu1 %1861  ;;  %v4934_v39 = vld [vmem:[%s5849_s12 + $0x8] sm:$0xff]   ;;  %s4143_s12 = sshll.u32 %s5509_s5, 8  ;;  %s5356_s5 = smov [#allocation22]  }
 0x967   : > { %v4842_v34 = vpop.eup %4841  ;;  %v1788_v46 = vmul.f32 %v4840_v2, %v4832_v38  ;;  %v1866_v17 = vpop.permute.xlu0 %1865  ;;  %v1880_v19 = vsel %vm1152_vm0, %v1316_v25, %v1862_v9  ;;  %v849_v25 = vunpack.c.l.bf16 %v4933_v24  ;;  %v851_v40 = vunpack.c.l.bf16 %v4934_v39  ;;  %v4705_v33 = vld [vmem:[#allocation16 + $0x24] ss:$8 sps:$4 sm:$0xff]   ;;  %s5245_s16 = sshll.u32 %s5356_s5, 4  ;;  %s5246_s16 = int_to_ptr.vmem [resolvable:$false] %s5245_s16 }
 0x968   : > { %v1790_v49 = vmul.f32 %v4842_v34, %v4830_v53  ;;  %v1883_v14 = vsel %vm1881_vm10, %v1877_v12, %v1866_v17  ;;  %v852_v43 = vunpack.c.h.bf16 %v4934_v39  ;;  %v4718_v2 = vld [vmem:[#allocation14] sm:$0xff]   ;;  %v4721_v17 = vld [vmem:[#allocation16 + $0x74] ss:$8 sps:$4 sm:$0xff]   ;;  %v4719_v12 = vld [vmem:[#allocation16 + $0x70] ss:$8 sps:$4 sm:$0xff]   ;;  %p5248_p12 = scmp.lt.s32.totalorder %s6443_s0, %s5246_s16 }
 0x969   : > { %v4844_v36 = vpop.eup %4843  ;;  %4391 = vmatprep.subr.bf16.mxu0 %v4718_v2  ;;  %v4703_v34 = vld [vmem:[#allocation16 + $0x20] ss:$8 sps:$4 sm:$0xff]  }
 0x96a   : > { %v1789_v47 = vmul.f32 %v4844_v36, %v4836_v41  ;;  %v1793_v52 = vpack.c.bf16 %v1791_v45, %v1790_v49  ;;  %v1868_v11 = vpop.permute.xlu1 %1867  ;;  %4392 = vmatpush3.bf16.msra.mxu0 %v4718_v2  ;;  %v4708_v36 = vld [vmem:[#allocation16 + $0x34] ss:$8 sps:$4 sm:$0xff]   ;;  %v4706_v45 = vld [vmem:[#allocation16 + $0x30] ss:$8 sps:$4 sm:$0xff]  }
 0x96b   : > { %v1885_v15 = vsel %vm1881_vm10, %v1880_v19, %v1868_v11  ;;  %v4714_v49 = vld [vmem:[#allocation16 + $0x54] ss:$8 sps:$4 sm:$0xff]  }
 0x96c   : > { %v1792_v50 = vpack.c.bf16 %v1789_v47, %v1788_v46  ;;  %v4711_v46 = vld [vmem:[#allocation16 + $0x44] ss:$8 sps:$4 sm:$0xff]   ;;  %v4709_v47 = vld [vmem:[#allocation16 + $0x40] ss:$8 sps:$4 sm:$0xff]  }
 0x96d   : > { %v4723_v19 = vld [vmem:[%s720_s2] sm:$0xff]  }
 0x96e   : > { %4367 = vmatprep.mubr.msk.bf16.mxu1 %vm1152_vm0, %v1792_v50  ;;  %v4712_v50 = vld [vmem:[#allocation16 + $0x50] ss:$8 sps:$4 sm:$0xff]  }
 0x96f   : > { %4368 = vmatmul.mubr.msk.bf16.vlgmr.msra.gmra.mrb[24].mxu1 %vm1152_vm0, %v1793_v52  ;;  %v4717_v52 = vld [vmem:[#allocation16 + $0x64] ss:$8 sps:$4 sm:$0xff]  }
 0x970   : > { %4372 = vmatpush3.bf16.msra.mxu1 %v4689_v54  ;;  %v4715_v54 = vld [vmem:[#allocation16 + $0x60] ss:$8 sps:$4 sm:$0xff]  }
 0x971   : > { %4373 = vmatprep.subr.bf16.mxu1 %v4690_v56 }
 0x974   : > { %4374 = vmatpush3.bf16.msra.mxu1 %v4690_v56 }
 0x975   : > { %4375 = vmatprep.subr.bf16.mxu1 %v4691_v57 }
 0x978   : > { %4376 = vmatpush3.bf16.msra.mxu1 %v4691_v57 }
 0x979   : > { %4377 = vmatprep.subr.bf16.mxu1 %v4692_v58 }
 0x97c   : > { %4378 = vmatpush3.bf16.msra.mxu1 %v4692_v58 }
 0x97d   : > { %4379 = vmatprep.subr.bf16.mxu1 %v4693_v59 }
 0x980   : > { %4380 = vmatpush3.bf16.msra.mxu1 %v4693_v59 }
 0x981   : > { %4381 = vmatprep.subr.bf16.mxu1 %v4694_v60 }
 0x984   : > { %4382 = vmatpush3.bf16.msra.mxu1 %v4694_v60 }
 0x985   : > { %4383 = vmatprep.subr.bf16.mxu1 %v4695_v61 }
 0x988   : > { %4384 = vmatpush3.bf16.msra.mxu1 %v4695_v61 }
 0x989   : > { %4385 = vmatprep.subr.bf16.mxu1 %v4696_v62 }
 0x98c   : > { %4386 = vmatpush3.bf16.msra.mxu1 %v4696_v62 }
 0x98d   : > { %2328 = vmatprep.subr.bf16.mxu1 %v4699_v32 }
 0xa42   : > { %v4369_v63 = vpop.f32.mrb[24].mxu1 }
 0xa43   : > { %v1840_v3 = vpop.f32.mrb[25].mxu1 }
 0xa44   : > { %v4370_v4 = vpop.f32.mrb[26].mxu1 }
 0xa45   : > { %v1856_v5 = vpack.c.bf16 %v4370_v4, %v4369_v63  ;;  %v1843_v6 = vpop.f32.mrb[27].mxu1 }
 0xa46   : > { %v1855_v7 = vpack.c.bf16 %v1843_v6, %v1840_v3 }
 0xa47   : > { %1873 = vrot.lane.b32.xlu1 %v1856_v5, %s5352_s20 }
 0xa48   : > { %1871 = vrot.lane.b32.xlu0 %v1855_v7, %s5352_s20 }
 0xab9   : > { %v1874_v13 = vpop.permute.xlu1 %1873 }
 0xaba   : > { %v1872_v21 = vpop.permute.xlu0 %1871  ;;  %v1891_v20 = vsel %vm1886_vm11, %v1885_v15, %v1874_v13  ;;  %v4722_v13 = vld [vmem:[#allocation14 + $0x8] sm:$0xff]  }
 0xabb   : > { %v1888_v18 = vsel %vm1886_vm11, %v1883_v14, %v1872_v21  ;;  %4393 = vmatprep.subr.bf16.mxu0 %v4722_v13  ;;  %v4724_v14 = vld [vmem:[#allocation14 + $0x10] sm:$0xff]   ;;  %v4725_v21 = vld [vmem:[#allocation14 + $0x18] sm:$0xff]  }
 0xabc   : > { %4387 = vmatprep.mubr.bf16.mxu1 %v1888_v18  ;;  %4394 = vmatpush3.bf16.msra.mxu0 %v4722_v13  ;;  %v4726_v15 = vld [vmem:[%s720_s2 + $0x8] sm:$0xff]   ;;  %v4727_v18 = vld [vmem:[#allocation14 + $0x20] sm:$0xff]  }
 0xabd   : > { %4388 = vmatmul.mubr.bf16.vlgmr.msra.gmra.mrb[28].mxu1 %v1891_v20  ;;  %4395 = vmatprep.subr.bf16.mxu0 %v4724_v14  ;;  %v4728_v20 = vld [vmem:[#allocation14 + $0x28] sm:$0xff]  }
 0xabe   : > { %2360 = vmatprep.mubr.bf16.mxu1 %v5351_v0  ;;  %2329 = vmatpush1.bf16.msra.mxu1 %v4697_v51 }
 0xabf   : > { %2330 = vmatprep.subr.bf16.mxu1 %v4702_v35  ;;  %v4034_v35 = vld [vmem:[%s6594_s7] ss:$0 sm:$0xff] }
 0xac0   : > { %4396 = vmatpush3.bf16.msra.mxu0 %v4724_v14 }
 0xac1   : > { %4397 = vmatprep.subr.bf16.mxu0 %v4725_v21 }
 0xac2   : > { %2331 = vmatpush1.bf16.msra.mxu1 %v4700_v30 }
 0xac3   : > { %2332 = vmatprep.subr.bf16.mxu1 %v4705_v33 }
 0xac4   : > { %4398 = vmatpush3.bf16.msra.mxu0 %v4725_v21 }
 0xac5   : > { %4399 = vmatprep.subr.bf16.mxu0 %v4727_v18 }
 0xac6   : > { %2333 = vmatpush1.bf16.msra.mxu1 %v4703_v34 }
 0xac7   : > { %2334 = vmatprep.subr.bf16.mxu1 %v4708_v36 }
 0xac8   : > { %4400 = vmatpush3.bf16.msra.mxu0 %v4727_v18 }
 0xac9   : > { %4401 = vmatprep.subr.bf16.mxu0 %v4728_v20 }
 0xaca   : > { %2335 = vmatpush1.bf16.msra.mxu1 %v4706_v45 }
 0xacb   : > { %2336 = vmatprep.subr.bf16.mxu1 %v4711_v46 }
 0xacc   : > { %4402 = vmatpush3.bf16.msra.mxu0 %v4728_v20 }
 0xace   : > { %2337 = vmatpush1.bf16.msra.mxu1 %v4709_v47 }
 0xacf   : > { %2338 = vmatprep.subr.bf16.mxu1 %v4714_v49 }
 0xad2   : > { %2339 = vmatpush1.bf16.msra.mxu1 %v4712_v50 }
 0xad3   : > { %2340 = vmatprep.subr.bf16.mxu1 %v4717_v52 }
 0xad6   : > { %2341 = vmatpush1.bf16.msra.mxu1 %v4715_v54 }
 0xad7   : > { %2342 = vmatprep.subr.bf16.mxu1 %v4721_v17 }
 0xada   : > { %2343 = vmatpush1.bf16.msra.mxu1 %v4719_v12 }
 0xadd   : > { %2361 = vmatmul.mubr.bf16.vlgmr.msra.gmra.mrb[32].mxu1 %v4723_v19 }
 0xade   : > { %2370 = vmatprep.mubr.bf16.mxu1 %v5351_v0 }
 0xae5   : > { %2371 = vmatmul.mubr.bf16.gmra.mrb[36].mxu1 %v4726_v15 }
 0xb90   : > { %v4389_v23 = vpop.f32.mrb[28].mxu1 }
 0xb91   : > { %v1998_v26 = vpop.f32.mrb[29].mxu1  ;;  %v2007_v53 = vadd.f32 %v4389_v23, %v4024_v22  ;;  %v4730_v23 = vld [vmem:[#allocation14 + $0x38] sm:$0xff]  }
 0xb92   : > { %v1999_v27 = vadd.f32 %v4024_v22, %v1998_v26  ;;  %v4390_v48 = vpop.f32.mrb[30].mxu1 }
 0xb93   : > { %v2001_v28 = vpop.f32.mrb[31].mxu1  ;;  %v2010_v41 = vadd.f32 %v4390_v48, %v4024_v22  ;;  %v2015_v42 = vadd.f32 %v2007_v53, %v851_v40 }
 0xb94   : > { %v2002_v37 = vadd.f32 %v4024_v22, %v2001_v28  ;;  %v2013_v38 = vadd.f32 %v1999_v27, %v849_v25  ;;  %v4729_v22 = vld [vmem:[#allocation14 + $0x30] sm:$0xff]  }
 0xb95   : > { %v2016_v44 = vadd.f32 %v2010_v41, %v852_v43  ;;  %4403 = vmatprep.subr.bf16.mxu0 %v4729_v22  ;;  %v4033_v41 = vld [vmem:[%s6593_s18] ss:$0 sm:$0xff] }
 0xb96   : > { %2019 = vadd.xlane.f32.xlu0 %v2013_v38  ;;  %v2014_v55 = vadd.f32 %v2002_v37, %v850_v1  ;;  %4404 = vmatpush3.bf16.msra.mxu0 %v4729_v22 }
 0xb97   : > { %4405 = vmatprep.subr.bf16.mxu0 %v4730_v23 }
 0xb98   : > { %2021 = vadd.xlane.f32.xlu1 %v2014_v55 }
 0xb9a   : > { %2023 = vadd.xlane.f32.xlu0 %v2015_v42  ;;  %4406 = vmatpush3.bf16.msra.mxu0 %v4730_v23  ;;  %v4035_v23 = vld [vmem:[%s6596_s24] ss:$0 sm:$0xff]  ;;  %s6599_s24 = sld [smem:[#allocation51_spill]] }
 0xb9e   : > { %2025 = vadd.xlane.f32.xlu0 %v2016_v44 }
 0xc23   : > { %v2020_v56 = vpop.xlane.xlu0 %2019 }
 0xc24   : > { %v2028_v57 = vmul.f32 0.0078125, %v2020_v56  ;;  %v2224_v56 = vld [vmem:[%s6595_s30] sm:$0x3]  ;;  %s6598_s30 = sld [smem:[#allocation49_spill]] }
 0xc25   : > { %v2022_v58 = vpop.xlane.xlu1 %2021 }
 0xc26   : > { %v6135_v59 = vsub.f32 %v2013_v38, %v2028_v57  ;;  %v2029_v60 = vmul.f32 0.0078125, %v2022_v58  ;;  %v2229_v57 = vrot.slane %v2224_v56, %v5889_v29  ;;  %v2233_v58 = vrot.slane %v2224_v56, %v5895_v31 }
 0xc27   : > { %v2024_v61 = vpop.xlane.xlu0 %2023 }
 0xc28   : > { %v6137_v62 = vsub.f32 %v2014_v55, %v2029_v60  ;;  %v2030_v63 = vmul.f32 0.0078125, %v2024_v61  ;;  %v2036_v3 = vmul.f32 %v6135_v59, %v6135_v59 }
 0xc2a   : > { %v6141_v4 = vsub.f32 %v2015_v42, %v2030_v63  ;;  %2040 = vadd.xlane.f32.xlu1 %v2036_v3  ;;  %v2037_v5 = vmul.f32 %v6137_v62, %v6137_v62 }
 0xc2b   : > { %v2026_v6 = vpop.xlane.xlu0 %2025 }
 0xc2c   : > { %v2031_v7 = vmul.f32 0.0078125, %v2026_v6  ;;  %2042 = vadd.xlane.f32.xlu0 %v2037_v5  ;;  %v2038_v8 = vmul.f32 %v6141_v4, %v6141_v4 }
 0xc2e   : > { %v6147_v9 = vsub.f32 %v2016_v44, %v2031_v7  ;;  %2044 = vadd.xlane.f32.xlu1 %v2038_v8 }
 0xc30   : > { %v2039_v11 = vmul.f32 %v6147_v9, %v6147_v9 }
 0xc32   : > { %2046 = vadd.xlane.f32.xlu0 %v2039_v11 }
 0xcb7   : > { %v2041_v24 = vpop.xlane.xlu1 %2040 }
 0xcb8   : > { %v2048_v25 = vmul.f32 0.0078125, %v2041_v24 }
 0xcb9   : > { %v2043_v26 = vpop.xlane.xlu0 %2042 }
 0xcba   : > { %v2052_v27 = vadd.f32 1e-05, %v2048_v25  ;;  %v2049_v48 = vmul.f32 0.0078125, %v2043_v26 }
 0xcbb   : > { %v2045_v1 = vpop.xlane.xlu1 %2044 }
 0xcbc   : > { %4845 = vrsqrt.f32 %v2052_v27  ;;  %v2053_v28 = vadd.f32 1e-05, %v2049_v48  ;;  %v2050_v53 = vmul.f32 0.0078125, %v2045_v1 }
 0xcbe   : > { %4847 = vrsqrt.f32 %v2053_v28  ;;  %v2054_v37 = vadd.f32 1e-05, %v2050_v53 }
 0xcbf   : > { %v2047_v38 = vpop.xlane.xlu0 %2046 }
 0xcc0   : > { %4849 = vrsqrt.f32 %v2054_v37  ;;  %v2051_v39 = vmul.f32 0.0078125, %v2047_v38  ;;  %v846_v38 = vstv %s824_s26 }
 0xcc1   : > { %vm847_vm12 = vcmp.lt.s32.totalorder %v5946_v10, %v846_v38 }
 0xcc2   : > { %v2055_v40 = vadd.f32 1e-05, %v2051_v39  ;;  %v6217_v39 = vsel %vm847_vm12, 0.0, %v5353_v16 }
 0xcc4   : > { %4851 = vrsqrt.f32 %v2055_v40 }
 0xcc6   : > { %v4846_v55 = vpop.eup %4845 }
 0xcc7   : > { %v2060_v42 = vmul.f32 %v4846_v55, %v6135_v59  ;;  %v2362_v59 = vpop.f32.mrb[32].mxu1 }
 0xcc8   : > { %v4848_v43 = vpop.eup %4847  ;;  %v2363_v60 = vadd.f32 %v2362_v59, %v2229_v57  ;;  %v2364_v61 = vpop.f32.mrb[33].mxu1 }
 0xcc9   : > { %v2061_v44 = vmul.f32 %v4848_v43, %v6137_v62  ;;  %v2070_v51 = vmul.f32 %v4033_v41, %v2060_v42  ;;  %v2365_v62 = vadd.f32 %v2364_v61, %v2233_v58  ;;  %v2366_v63 = vpop.f32.mrb[34].mxu1 }
 0xcca   : > { %v4850_v32 = vpop.eup %4849  ;;  %v2367_v3 = vadd.f32 %v2366_v63, %v2229_v57 }
 0xccb   : > { %v2062_v30 = vmul.f32 %v4850_v32, %v6141_v4  ;;  %v2071_v33 = vmul.f32 %v4033_v41, %v2061_v44  ;;  %v6165_v2 = vadd.f32 %v4034_v35, %v2070_v51  ;;  %v2368_v4 = vpop.f32.mrb[35].mxu1 }
 0xccc   : > { %v2369_v5 = vadd.f32 %v2368_v4, %v2233_v58  ;;  %v6183_v6 = vpack.c.bf16 %v2367_v3, %v2363_v60 }
 0xccd   : > { %v6167_v34 = vadd.f32 %v4034_v35, %v2071_v33  ;;  %v2072_v47 = vmul.f32 %v4033_v41, %v2062_v30 }
 0xcce   : > { %v4852_v36 = vpop.eup %4851  ;;  %v6185_v7 = vpack.c.bf16 %v2369_v5, %v2365_v62  ;;  %4503 = vmatprep.subr.msk.bf16.mxu0 %vm1152_vm0, %v6183_v6  ;;  %v2392_v8 = vsel %vm1152_vm0, %v6183_v6, 0 }
 0xccf   : > { %v2063_v45 = vmul.f32 %v4852_v36, %v6147_v9  ;;  %v2084_v46 = vpack.c.bf16 %v6167_v34, %v6165_v2  ;;  %v6172_v50 = vadd.f32 %v4034_v35, %v2072_v47  ;;  %v2372_v9 = vpop.f32.mrb[36].mxu1 }
 0xcd0   : > { %v2373_v11 = vadd.f32 %v2372_v9, %v2229_v57  ;;  %v2374_v17 = vpop.f32.mrb[37].mxu1 }
 0xcd1   : > { %4407 = vmatprep.mubr.bf16.mxu0 %v2084_v46  ;;  %v2073_v49 = vmul.f32 %v4033_v41, %v2063_v45  ;;  %v2375_v12 = vadd.f32 %v2374_v17, %v2233_v58  ;;  %v2376_v13 = vpop.f32.mrb[38].mxu1 }
 0xcd2   : > { %v2377_v19 = vadd.f32 %v2376_v13, %v2229_v57  ;;  %v2378_v14 = vpop.f32.mrb[39].mxu1 }
 0xcd3   : > { %v6174_v52 = vadd.f32 %v4034_v35, %v2073_v49  ;;  %v2379_v21 = vadd.f32 %v2378_v14, %v2233_v58 }
 0xcd4   : > { %v6191_v15 = vpack.c.bf16 %v2377_v19, %v2373_v11 }
 0xcd5   : > { %v2085_v54 = vpack.c.bf16 %v6174_v52, %v6172_v50  ;;  %v6193_v18 = vpack.c.bf16 %v2379_v21, %v2375_v12 }
 0xcd6   : > { %v2395_v20 = vsel %vm1152_vm0, %v6191_v15, 0 }
 0xcd7   : > { %4408 = vmatmul.mubr.bf16.vlgmr.msra.gmra.mrb[16].mxu0 %v2085_v54 }
 0xcd8   : > { %4412 = vmatpush3.bf16.xpose.msra.mxu0 %v2392_v8 }
 0xcd9   : > { %4504 = vmatprep.subr.msk.bf16.mxu0 %vm1152_vm0, %v6191_v15 }
 0xce0   : > { %4414 = vmatpush3.bf16.xpose.msra.mxu0 %v2395_v20 }
 0xce1   : > { %4419 = vmatprep.subr.bf16.mxu0 %v6185_v7 }
 0xdaa   : > { %v4409_v22 = vpop.f32.mrb[16].mxu0 }
 0xdab   : > { %v2191_v24 = vpop.f32.mrb[17].mxu0  ;;  %v2200_v26 = vadd.f32 %v4409_v22, %v4035_v23 }
 0xdac   : > { %v4410_v25 = vpop.f32.mrb[18].mxu0  ;;  %v2192_v1 = vadd.f32 %v4035_v23, %v2191_v24 }
 0xdad   : > { %v2203_v27 = vadd.f32 %v4410_v25, %v4035_v23  ;;  %v2194_v48 = vpop.f32.mrb[19].mxu0 }
 0xdae   : > { %v2195_v28 = vadd.f32 %v4035_v23, %v2194_v48 }
 0xdaf   : > { %v6203_v53 = vpack.c.bf16 %v2203_v27, %v2200_v26 }
 0xdb0   : > { %v6205_v37 = vpack.c.bf16 %v2195_v28, %v2192_v1 }
 0xdb2   : > { %4415 = vmatprep.mubr.msk.bf16.mxu0 %vm1152_vm0, %v6205_v37 }
 0xdb3   : > { %4416 = vmatmul.mubr.msk.bf16.vlgmr.msra.gmra.mrb[20].mxu0 %vm1152_vm0, %v6203_v53 }
 0xdb4   : > { %4420 = vmatpush3.bf16.msra.mxu0 %v6185_v7 }
 0xdb5   : > { %4421 = vmatprep.subr.bf16.mxu0 %v6193_v18 }
 0xdb8   : > { %4422 = vmatpush3.bf16.msra.mxu0 %v6193_v18 }
 0xe86   : > { %v4417_v40 = vpop.f32.mrb[20].mxu0 }
 0xe87   : > { %v2431_v55 = vpop.f32.mrb[21].mxu0  ;;  %v2440_v44 = vadd.f32 %v4417_v40, %v6217_v39 }
 0xe88   : > { %v2432_v41 = vadd.f32 %v2431_v55, %v6217_v39  ;;  %v4418_v42 = vpop.f32.mrb[22].mxu0 }
 0xe89   : > { %v2434_v43 = vpop.f32.mrb[23].mxu0  ;;  %v2443_v35 = vadd.f32 %v4418_v42, %v6217_v39  ;;  %v2452_v16 = vsel %vm1152_vm0, %v2440_v44, -inf }
 0xe8a   : > { %v2435_v51 = vadd.f32 %v2434_v43, %v6217_v39  ;;  %v2446_v32 = vsel %vm1152_vm0, %v2432_v41, -inf }
 0xe8b   : > { %2447 = vmax.xlane.f32.xlu1 %v2446_v32  ;;  %v2455_v30 = vsel %vm1152_vm0, %v2443_v35, -inf }
 0xe8c   : > { %v2449_v10 = vsel %vm1152_vm0, %v2435_v51, -inf }
 0xe8d   : > { %2450 = vmax.xlane.f32.xlu0 %v2449_v10 }
 0xe8f   : > { %2453 = vmax.xlane.f32.xlu1 %v2452_v16 }
 0xe91   : > { %2456 = vmax.xlane.f32.xlu0 %v2455_v30 }
 0xf18   : > { %v2448_v33 = vpop.xlane.xlu1 %2447 }
 0xf19   : > { %v2458_v36 = vsub.f32 %v2432_v41, %v2448_v33 }
 0xf1a   : > { %v2451_v45 = vpop.xlane.xlu0 %2450 }
 0xf1b   : > { %v2459_v46 = vsub.f32 %v2435_v51, %v2451_v45  ;;  %v2462_v56 = vmul.f32 1.442695, %v2458_v36 }
 0xf1c   : > { %v2454_v47 = vpop.xlane.xlu1 %2453 }
 0xf1d   : > { %v2464_v49 = vmul.f32 1.442695, %v2459_v46  ;;  %v2460_v54 = vsub.f32 %v2440_v44, %v2454_v47 }
 0xf1e   : > { %v2457_v57 = vpop.xlane.xlu0 %2456 }
 0xf1f   : > { %4853 = vpow2.f32 %v2464_v49  ;;  %v2466_v58 = vmul.f32 1.442695, %v2460_v54  ;;  %v2461_v59 = vsub.f32 %v2443_v35, %v2457_v57 }
 0xf21   : > { %4855 = vpow2.f32 %v2466_v58  ;;  %v2468_v60 = vmul.f32 1.442695, %v2461_v59 }
 0xf22   : > { %4857 = vpow2.f32 %v2462_v56 }
 0xf23   : > { %4859 = vpow2.f32 %v2468_v60 }
 0xf29   : > { %v4854_v61 = vpop.eup %4853 }
 0xf2a   : > { %v2473_v62 = vsel %vm1152_vm0, %v4854_v61, 0.0 }
 0xf2b   : > { %v4856_v63 = vpop.eup %4855  ;;  %2474 = vadd.xlane.f32.xlu0 %v2473_v62 }
 0xf2c   : > { %v4858_v3 = vpop.eup %4857  ;;  %v2476_v4 = vsel %vm1152_vm0, %v4856_v63, 0.0 }
 0xf2d   : > { %v4860_v5 = vpop.eup %4859  ;;  %2477 = vadd.xlane.f32.xlu1 %v2476_v4  ;;  %v2470_v9 = vsel %vm1152_vm0, %v4858_v3, 0.0 }
 0xf2e   : > { %v2479_v8 = vsel %vm1152_vm0, %v4860_v5, 0.0 }
 0xf2f   : > { %2480 = vadd.xlane.f32.xlu0 %v2479_v8 }
 0xf31   : > { %2471 = vadd.xlane.f32.xlu1 %v2470_v9 }
 0xf42   : > { %2557 = vrot.lane.b32.xlu1 %v6183_v6, %s5352_s20 }
 0xf45   : > { %2559 = vrot.lane.b32.xlu0 %v6191_v15, %s5352_s20 }
 0xf46   : > { %2551 = vrot.lane.b32.xlu1 %v6205_v37, %s5352_s20 }
 0xf49   : > { %2553 = vrot.lane.b32.xlu0 %v6203_v53, %s5352_s20 }
 0xf4a   : > { %2737 = vrot.lane.b32.xlu1 %v6183_v6, %s5354_s19 }
 0xf4d   : > { %2733 = vrot.lane.b32.xlu0 %v6205_v37, %s5354_s19 }
 0xf4e   : > { %2739 = vrot.lane.b32.xlu1 %v6191_v15, %s5354_s19 }
 0xf52   : > { %2735 = vrot.lane.b32.xlu1 %v6203_v53, %s5354_s19 }
 0xfb8   : > { %v2475_v11 = vpop.xlane.xlu0 %2474 }
 0xfb9   : > { %4861 = vrcp.f32 %v2475_v11 }
 0xfba   : > { %v2478_v17 = vpop.xlane.xlu1 %2477 }
 0xfbc   : > { %v2481_v12 = vpop.xlane.xlu0 %2480 }
 0xfbd   : > { %4863 = vrcp.f32 %v2481_v12 }
 0xfbe   : > { %4865 = vrcp.f32 %v2478_v17  ;;  %v2472_v13 = vpop.xlane.xlu1 %2471 }
 0xfbf   : > { %4867 = vrcp.f32 %v2472_v13 }
 0xfc0   : > { %v2560_v38 = vpop.permute.xlu0 %2559 }
 0xfc1   : > { %v2571_v40 = vsel %vm1152_vm0, %v2560_v38, 0 }
 0xfc2   : > { %v2558_v19 = vpop.permute.xlu1 %2557 }
 0xfc3   : > { %4505 = vmatprep.subr.msk.bf16.mxu0 %vm1152_vm0, %v2558_v19  ;;  %v4862_v14 = vpop.eup %4861  ;;  %v2568_v1 = vsel %vm1152_vm0, %v2558_v19, 0 }
 0xfc4   : > { %v2487_v25 = vmul.f32 %v4862_v14, %v4854_v61  ;;  %v2554_v41 = vpop.permute.xlu0 %2553 }
 0xfc6   : > { %v2552_v28 = vpop.permute.xlu1 %2551 }
 0xfc7   : > { %v4864_v21 = vpop.eup %4863 }
 0xfc8   : > { %v4866_v20 = vpop.eup %4865  ;;  %v2489_v23 = vmul.f32 %v4864_v21, %v4860_v5  ;;  %v2734_v42 = vpop.permute.xlu0 %2733 }
 0xfc9   : > { %v4868_v22 = vpop.eup %4867  ;;  %v2488_v26 = vmul.f32 %v4866_v20, %v4856_v63 }
 0xfca   : > { %v2486_v24 = vmul.f32 %v4868_v22, %v4858_v3  ;;  %v2738_v55 = vpop.permute.xlu1 %2737 }
 0xfcb   : > { %v2491_v48 = vpack.c.bf16 %v2489_v23, %v2488_v26  ;;  %v2748_v43 = vsel %vm1152_vm0, %v2738_v55, 0 }
 0xfcc   : > { %v2490_v27 = vpack.c.bf16 %v2487_v25, %v2486_v24 }
 0xfce   : > { %4423 = vmatprep.mubr.msk.bf16.mxu0 %vm1152_vm0, %v2490_v27  ;;  %v2740_v44 = vpop.permute.xlu1 %2739 }
 0xfcf   : > { %4424 = vmatmul.mubr.msk.bf16.vlgmr.msra.gmra.mrb[24].mxu0 %vm1152_vm0, %v2491_v48  ;;  %v2751_v51 = vsel %vm1152_vm0, %v2740_v44, 0 }
 0xfd0   : > { %4428 = vmatpush3.bf16.xpose.msra.mxu0 %v2568_v1  ;;  %4431 = vmatprep.mubr.msk.bf16.mxu0 %vm1152_vm0, %v2552_v28 }
 0xfd1   : > { %4506 = vmatprep.subr.msk.bf16.mxu0 %vm1152_vm0, %v2560_v38 }
 0xfd2   : > { %v2736_v32 = vpop.permute.xlu1 %2735 }
 0xfd8   : > { %4430 = vmatpush3.bf16.xpose.msra.mxu0 %v2571_v40 }
 0xfd9   : > { %4507 = vmatprep.subr.msk.bf16.mxu0 %vm1152_vm0, %v2738_v55 }
 0xfdf   : > { %4432 = vmatmul.mubr.msk.bf16.vlgmr.msra.gmra.mrb[28].mxu0 %vm1152_vm0, %v2554_v41 }
 0xfe0   : > { %4444 = vmatpush3.bf16.xpose.msra.mxu0 %v2748_v43  ;;  %4447 = vmatprep.mubr.msk.bf16.mxu0 %vm1152_vm0, %v2734_v42 }
 0xfe1   : > { %4508 = vmatprep.subr.msk.bf16.mxu0 %vm1152_vm0, %v2740_v44 }
 0xfe8   : > { %4446 = vmatpush3.bf16.xpose.msra.mxu0 %v2751_v51 }
 0xfef   : > { %4448 = vmatmul.mubr.msk.bf16.vlgmr.msra.gmra.mrb[32].mxu0 %vm1152_vm0, %v2736_v32 }
0x10a2   : > { %v6261_v35 = vpop.f32.mrb[24].mxu0 }
0x10a3   : > { %v6263_v10 = vpop.f32.mrb[25].mxu0 }
0x10a4   : > { %v6265_v16 = vpop.f32.mrb[26].mxu0 }
0x10a5   : > { %v2548_v30 = vpack.c.bf16 %v6265_v16, %v6261_v35  ;;  %v6269_v33 = vpop.f32.mrb[27].mxu0 }
0x10a6   : > { %v2547_v36 = vpack.c.bf16 %v6269_v33, %v6263_v10  ;;  %v4078_v10 = vld [vmem:[%s6597_s21] ss:$0 sm:$0xff] }
0x10b2   : > { %v4433_v45 = vpop.f32.mrb[28].mxu0 }
0x10b3   : > { %v2616_v46 = vadd.f32 %v4433_v45, %v6217_v39  ;;  %v2607_v47 = vpop.f32.mrb[29].mxu0 }
0x10b4   : > { %v4434_v49 = vpop.f32.mrb[30].mxu0  ;;  %v2608_v54 = vadd.f32 %v2607_v47, %v6217_v39 }
0x10b5   : > { %v2610_v56 = vpop.f32.mrb[31].mxu0  ;;  %v2628_v57 = vsel %vm1152_vm0, %v2616_v46, -inf  ;;  %v2619_v60 = vadd.f32 %v4434_v49, %v6217_v39 }
0x10b6   : > { %v2611_v58 = vadd.f32 %v2610_v56, %v6217_v39  ;;  %2629 = vmax.xlane.f32.xlu0 %v2628_v57  ;;  %v2622_v61 = vsel %vm1152_vm0, %v2608_v54, -inf }
0x10b7   : > { %v2631_v62 = vsel %vm1152_vm0, %v2619_v60, -inf }
0x10b8   : > { %v2625_v59 = vsel %vm1152_vm0, %v2611_v58, -inf }
0x10b9   : > { %2626 = vmax.xlane.f32.xlu1 %v2625_v59 }
0x10ba   : > { %2623 = vmax.xlane.f32.xlu0 %v2622_v61 }
0x10be   : > { %2632 = vmax.xlane.f32.xlu0 %v2631_v62 }
0x10c2   : > { %v4449_v63 = vpop.f32.mrb[32].mxu0 }
0x10c3   : > { %v2796_v3 = vadd.f32 %v4449_v63, %v6217_v39  ;;  %v2787_v4 = vpop.f32.mrb[33].mxu0 }
0x10c4   : > { %v4450_v5 = vpop.f32.mrb[34].mxu0  ;;  %v2788_v8 = vadd.f32 %v2787_v4, %v6217_v39 }
0x10c5   : > { %v2790_v9 = vpop.f32.mrb[35].mxu0  ;;  %v2808_v11 = vsel %vm1152_vm0, %v2796_v3, -inf  ;;  %v2799_v12 = vadd.f32 %v4450_v5, %v6217_v39 }
0x10c6   : > { %v2791_v17 = vadd.f32 %v2790_v9, %v6217_v39  ;;  %2809 = vmax.xlane.f32.xlu1 %v2808_v11  ;;  %v2802_v19 = vsel %vm1152_vm0, %v2788_v8, -inf }
0x10c7   : > { %v2811_v14 = vsel %vm1152_vm0, %v2799_v12, -inf }
0x10c8   : > { %v2805_v13 = vsel %vm1152_vm0, %v2791_v17, -inf }
0x10c9   : > { %2806 = vmax.xlane.f32.xlu0 %v2805_v13 }
0x10ca   : > { %2803 = vmax.xlane.f32.xlu1 %v2802_v19 }
0x10cd   : > { %2812 = vmax.xlane.f32.xlu0 %v2811_v14 }
0x10db   : > { %2670 = vrot.lane.b32.xlu1 %v6185_v7, %s5352_s20 }
0x1143   : > { %v2630_v21 = vpop.xlane.xlu0 %2629 }
0x1144   : > { %v2636_v20 = vsub.f32 %v2616_v46, %v2630_v21 }
0x1146   : > { %v2642_v22 = vmul.f32 1.442695, %v2636_v20  ;;  %v2627_v23 = vpop.xlane.xlu1 %2626 }
0x1147   : > { %v2624_v24 = vpop.xlane.xlu0 %2623  ;;  %v2635_v26 = vsub.f32 %v2611_v58, %v2627_v23 }
0x1148   : > { %4869 = vpow2.f32 %v2642_v22  ;;  %v2634_v25 = vsub.f32 %v2608_v54, %v2624_v24 }
0x1149   : > { %v2640_v28 = vmul.f32 1.442695, %v2635_v26 }
0x114a   : > { %v2638_v27 = vmul.f32 1.442695, %v2634_v25 }
0x114b   : > { %v2633_v48 = vpop.xlane.xlu0 %2632 }
0x114c   : > { %4871 = vpow2.f32 %v2638_v27  ;;  %v2637_v1 = vsub.f32 %v2619_v60, %v2633_v48 }
0x114e   : > { %v2644_v38 = vmul.f32 1.442695, %v2637_v1 }
0x1150   : > { %4873 = vpow2.f32 %v2644_v38 }
0x1151   : > { %4875 = vpow2.f32 %v2640_v28 }
0x1152   : > { %v6291_v40 = vpop.eup %4869 }
0x1153   : > { %v2810_v55 = vpop.xlane.xlu1 %2809  ;;  %v2652_v41 = vsel %vm1152_vm0, %v6291_v40, 0.0 }
0x1154   : > { %2653 = vadd.xlane.f32.xlu1 %v2652_v41  ;;  %v2816_v54 = vsub.f32 %v2796_v3, %v2810_v55 }
0x1156   : > { %v6295_v42 = vpop.eup %4871  ;;  %v2807_v49 = vpop.xlane.xlu0 %2806  ;;  %v2822_v56 = vmul.f32 1.442695, %v2816_v54 }
0x1157   : > { %v2804_v43 = vpop.xlane.xlu1 %2803  ;;  %v2646_v44 = vsel %vm1152_vm0, %v6295_v42, 0.0  ;;  %v2815_v61 = vsub.f32 %v2791_v17, %v2807_v49 }
0x1158   : > { %2647 = vadd.xlane.f32.xlu1 %v2646_v44  ;;  %v2814_v57 = vsub.f32 %v2788_v8, %v2804_v43  ;;  %4877 = vpow2.f32 %v2822_v56 }
0x1159   : > { %v2820_v63 = vmul.f32 1.442695, %v2815_v61 }
0x115a   : > { %v4874_v51 = vpop.eup %4873  ;;  %v2813_v58 = vpop.xlane.xlu0 %2812  ;;  %v2818_v59 = vmul.f32 1.442695, %v2814_v57 }
0x115b   : > { %v2671_v32 = vpop.permute.xlu1 %2670  ;;  %v2655_v45 = vsel %vm1152_vm0, %v4874_v51, 0.0  ;;  %v4876_v46 = vpop.eup %4875  ;;  %v2817_v60 = vsub.f32 %v2799_v12, %v2813_v58 }
0x115c   : > { %2656 = vadd.xlane.f32.xlu0 %v2655_v45  ;;  %4435 = vmatprep.subr.bf16.mxu1 %v2671_v32  ;;  %v2649_v47 = vsel %vm1152_vm0, %v4876_v46, 0.0  ;;  %4879 = vpow2.f32 %v2818_v59 }
0x115d   : > { %4436 = vmatpush3.bf16.msra.mxu1 %v2671_v32  ;;  %v2824_v62 = vmul.f32 1.442695, %v2817_v60 }
0x115f   : > { %4881 = vpow2.f32 %v2824_v62 }
0x1160   : > { %2650 = vadd.xlane.f32.xlu0 %v2649_v47  ;;  %4883 = vpow2.f32 %v2820_v63 }
0x1162   : > { %v6305_v4 = vpop.eup %4877 }
0x1163   : > { %v2832_v5 = vsel %vm1152_vm0, %v6305_v4, 0.0 }
0x1166   : > { %v4880_v9 = vpop.eup %4879 }
0x1167   : > { %v2826_v3 = vsel %vm1152_vm0, %v4880_v9, 0.0 }
0x1169   : > { %2848 = vrot.lane.b32.xlu1 %v6185_v7, %s5354_s19  ;;  %v4882_v8 = vpop.eup %4881 }
0x116a   : > { %v2835_v11 = vsel %vm1152_vm0, %v4882_v8, 0.0  ;;  %v4884_v12 = vpop.eup %4883 }
0x116b   : > { %v2829_v17 = vsel %vm1152_vm0, %v4884_v12, 0.0 }
0x1176   : > { %2672 = vrot.lane.b32.xlu0 %v6193_v18, %s5352_s20 }
0x118d   : > { %2833 = vadd.xlane.f32.xlu1 %v2832_v5 }
0x1191   : > { %2827 = vadd.xlane.f32.xlu1 %v2826_v3 }
0x1195   : > { %2836 = vadd.xlane.f32.xlu0 %v2835_v11 }
0x1199   : > { %2830 = vadd.xlane.f32.xlu0 %v2829_v17 }
0x11a2   : > { %2850 = vrot.lane.b32.xlu1 %v6193_v18, %s5354_s19 }
0x11a6   : > { %2917 = vrot.lane.b32.xlu1 %v6191_v15, %s5355_s11 }
0x11aa   : > { %2913 = vrot.lane.b32.xlu1 %v6203_v53, %s5355_s11 }
0x11af   : > { %2915 = vrot.lane.b32.xlu0 %v6183_v6, %s5355_s11 }
0x11b3   : > { %2911 = vrot.lane.b32.xlu0 %v6205_v37, %s5355_s11 }
0x11e1   : > { %v2654_v13 = vpop.xlane.xlu1 %2653 }
0x11e5   : > { %v2648_v19 = vpop.xlane.xlu1 %2647 }
0x11e9   : > { %v2657_v14 = vpop.xlane.xlu0 %2656  ;;  %v2849_v15 = vpop.permute.xlu1 %2848 }
0x11ea   : > { %4885 = vrcp.f32 %v2657_v14 }
0x11eb   : > { %4887 = vrcp.f32 %v2648_v19 }
0x11ec   : > { %4889 = vrcp.f32 %v2654_v13 }
0x11ed   : > { %v2651_v21 = vpop.xlane.xlu0 %2650 }
0x11ee   : > { %4891 = vrcp.f32 %v2651_v21 }
0x11f1   : > { %v2673_v20 = vpop.permute.xlu0 %2672 }
0x11f2   : > { %4437 = vmatprep.subr.bf16.mxu1 %v2673_v20 }
0x11f3   : > { %4438 = vmatpush3.bf16.msra.mxu1 %v2673_v20 }
0x11f4   : > { %4451 = vmatprep.subr.bf16.mxu1 %v2849_v15  ;;  %v4886_v53 = vpop.eup %4885 }
0x11f5   : > { %v4888_v22 = vpop.eup %4887  ;;  %v2665_v24 = vmul.f32 %v4886_v53, %v4874_v51 }
0x11f6   : > { %v4890_v23 = vpop.eup %4889  ;;  %v2662_v37 = vmul.f32 %v4888_v22, %v6295_v42 }
0x11f7   : > { %v2664_v26 = vmul.f32 %v4890_v23, %v6291_v40 }
0x11f8   : > { %v4892_v6 = vpop.eup %4891 }
0x11f9   : > { %v2663_v25 = vmul.f32 %v4892_v6, %v4876_v46  ;;  %v2667_v48 = vpack.c.bf16 %v2665_v24, %v2664_v26 }
0x11fb   : > { %v2666_v27 = vpack.c.bf16 %v2663_v25, %v2662_v37 }
0x11fd   : > { %4439 = vmatprep.mubr.msk.bf16.mxu1 %vm1152_vm0, %v2666_v27 }
0x11fe   : > { %4440 = vmatmul.mubr.msk.bf16.vlgmr.msra.gmra.mrb[40].mxu1 %vm1152_vm0, %v2667_v48 }
0x11ff   : > { %4452 = vmatpush3.bf16.msra.mxu1 %v2849_v15 }
0x121a   : > { %v2834_v1 = vpop.xlane.xlu1 %2833 }
0x121e   : > { %v2828_v28 = vpop.xlane.xlu1 %2827 }
0x1222   : > { %v2837_v38 = vpop.xlane.xlu0 %2836  ;;  %v2851_v55 = vpop.permute.xlu1 %2850 }
0x1223   : > { %4453 = vmatprep.subr.bf16.mxu1 %v2851_v55  ;;  %4893 = vrcp.f32 %v2837_v38 }
0x1224   : > { %4454 = vmatpush3.bf16.msra.mxu1 %v2851_v55  ;;  %4895 = vrcp.f32 %v2828_v28 }
0x1225   : > { %4897 = vrcp.f32 %v2834_v1 }
0x1226   : > { %v2831_v41 = vpop.xlane.xlu0 %2830  ;;  %v2918_v58 = vpop.permute.xlu1 %2917 }
0x1227   : > { %4899 = vrcp.f32 %v2831_v41  ;;  %v2929_v59 = vsel %vm1152_vm0, %v2918_v58, 0 }
0x122a   : > { %v2916_v42 = vpop.permute.xlu0 %2915  ;;  %v2914_v60 = vpop.permute.xlu1 %2913 }
0x122b   : > { %4509 = vmatprep.subr.msk.bf16.mxu1 %vm1152_vm0, %v2916_v42  ;;  %v2926_v56 = vsel %vm1152_vm0, %v2916_v42, 0 }
0x122d   : > { %v4894_v40 = vpop.eup %4893 }
0x122e   : > { %v4896_v43 = vpop.eup %4895  ;;  %v2845_v32 = vmul.f32 %v4894_v40, %v4882_v8  ;;  %v2912_v57 = vpop.permute.xlu0 %2911 }
0x122f   : > { %v4898_v44 = vpop.eup %4897  ;;  %v2842_v45 = vmul.f32 %v4896_v43, %v4880_v9 }
0x1230   : > { %v2844_v47 = vmul.f32 %v4898_v44, %v6305_v4 }
0x1231   : > { %v4900_v51 = vpop.eup %4899 }
0x1232   : > { %v2843_v46 = vmul.f32 %v4900_v51, %v4884_v12  ;;  %v2847_v54 = vpack.c.bf16 %v2845_v32, %v2844_v47 }
0x1234   : > { %v2846_v49 = vpack.c.bf16 %v2843_v46, %v2842_v45 }
0x1236   : > { %4455 = vmatprep.mubr.msk.bf16.mxu1 %vm1152_vm0, %v2846_v49 }
0x1237   : > { %4456 = vmatmul.mubr.msk.bf16.vlgmr.msra.gmra.mrb[44].mxu1 %vm1152_vm0, %v2847_v54 }
0x1238   : > { %4460 = vmatpush3.bf16.xpose.msra.mxu1 %v2926_v56  ;;  %4463 = vmatprep.mubr.msk.bf16.mxu1 %vm1152_vm0, %v2912_v57 }
0x1239   : > { %4510 = vmatprep.subr.msk.bf16.mxu1 %vm1152_vm0, %v2918_v58 }
0x1240   : > { %4462 = vmatpush3.bf16.xpose.msra.mxu1 %v2929_v59 }
0x1247   : > { %4464 = vmatmul.mubr.msk.bf16.vlgmr.msra.gmra.mrb[48].mxu1 %vm1152_vm0, %v2914_v60 }
0x1248   : > { %3457 = vmatprep.mubr.bf16.mxu1 %v5351_v0 }
0x12d1   : > { %v4441_v61 = vpop.f32.mrb[40].mxu1 }
0x12d2   : > { %v2716_v62 = vpop.f32.mrb[41].mxu1 }
0x12d3   : > { %v4442_v63 = vpop.f32.mrb[42].mxu1 }
0x12d4   : > { %v2732_v4 = vpack.c.bf16 %v4442_v63, %v4441_v61  ;;  %v2719_v5 = vpop.f32.mrb[43].mxu1 }
0x12d5   : > { %v2731_v9 = vpack.c.bf16 %v2719_v5, %v2716_v62 }
0x130a   : > { %v4457_v3 = vpop.f32.mrb[44].mxu1 }
0x130b   : > { %v2894_v8 = vpop.f32.mrb[45].mxu1 }
0x130c   : > { %v4458_v11 = vpop.f32.mrb[46].mxu1 }
0x130d   : > { %v2910_v12 = vpack.c.bf16 %v4458_v11, %v4457_v3  ;;  %v2897_v17 = vpop.f32.mrb[47].mxu1 }
0x130e   : > { %v2909_v13 = vpack.c.bf16 %v2897_v17, %v2894_v8  ;;  %v4732_v17 = vld [vmem:[#allocation17 + $0x8] sm:$0xff]  }
0x131a   : > { %v4465_v19 = vpop.f32.mrb[48].mxu1 }
0x131b   : > { %v2965_v14 = vpop.f32.mrb[49].mxu1  ;;  %v2974_v53 = vadd.f32 %v4465_v19, %v6217_v39  ;;  %v4734_v19 = vld [vmem:[#allocation17 + $0x18] sm:$0xff]  }
0x131c   : > { %v2966_v21 = vadd.f32 %v2965_v14, %v6217_v39  ;;  %v4466_v20 = vpop.f32.mrb[50].mxu1  ;;  %v4735_v14 = vld [vmem:[#allocation17 + $0x20] sm:$0xff]  }
0x131d   : > { %v2968_v15 = vpop.f32.mrb[51].mxu1  ;;  %v2977_v24 = vadd.f32 %v4466_v20, %v6217_v39  ;;  %v2986_v37 = vsel %vm1152_vm0, %v2974_v53, -inf  ;;  %v4737_v20 = vld [vmem:[#allocation17 + $0x30] sm:$0xff]  }
0x131e   : > { %v2969_v22 = vadd.f32 %v2968_v15, %v6217_v39  ;;  %v2980_v23 = vsel %vm1152_vm0, %v2966_v21, -inf  ;;  %v4738_v15 = vld [vmem:[#allocation17 + $0x38] sm:$0xff]  }
0x131f   : > { %2981 = vmax.xlane.f32.xlu0 %v2980_v23  ;;  %v2989_v25 = vsel %vm1152_vm0, %v2977_v24, -inf }
0x1320   : > { %v2983_v6 = vsel %vm1152_vm0, %v2969_v22, -inf }
0x1321   : > { %2984 = vmax.xlane.f32.xlu1 %v2983_v6 }
0x1323   : > { %2987 = vmax.xlane.f32.xlu0 %v2986_v37 }
0x1327   : > { %2990 = vmax.xlane.f32.xlu0 %v2989_v25 }
0x13ac   : > { %v2982_v26 = vpop.xlane.xlu0 %2981 }
0x13ad   : > { %v2992_v27 = vsub.f32 %v2966_v21, %v2982_v26  ;;  %v4736_v21 = vld [vmem:[#allocation17 + $0x28] sm:$0xff]  }
0x13ae   : > { %v2985_v48 = vpop.xlane.xlu1 %2984 }
0x13af   : > { %v2996_v38 = vmul.f32 1.442695, %v2992_v27  ;;  %v2993_v55 = vsub.f32 %v2969_v22, %v2985_v48 }
0x13b0   : > { %v2988_v1 = vpop.xlane.xlu0 %2987 }
0x13b1   : > { %v2994_v28 = vsub.f32 %v2974_v53, %v2988_v1  ;;  %v2998_v43 = vmul.f32 1.442695, %v2993_v55 }
0x13b3   : > { %v3000_v41 = vmul.f32 1.442695, %v2994_v28 }
0x13b4   : > { %v2991_v42 = vpop.xlane.xlu0 %2990 }
0x13b5   : > { %4901 = vpow2.f32 %v3000_v41  ;;  %v2995_v40 = vsub.f32 %v2977_v24, %v2991_v42 }
0x13b6   : > { %4903 = vpow2.f32 %v2996_v38 }
0x13b7   : > { %v3002_v39 = vmul.f32 1.442695, %v2995_v40 }
0x13b9   : > { %4905 = vpow2.f32 %v3002_v39 }
0x13ba   : > { %4907 = vpow2.f32 %v2998_v43 }
0x13bf   : > { %v4902_v44 = vpop.eup %4901 }
0x13c0   : > { %v3010_v51 = vsel %vm1152_vm0, %v4902_v44, 0.0  ;;  %v4904_v32 = vpop.eup %4903 }
0x13c1   : > { %3011 = vadd.xlane.f32.xlu1 %v3010_v51  ;;  %v3004_v46 = vsel %vm1152_vm0, %v4904_v32, 0.0 }
0x13c3   : > { %v4906_v45 = vpop.eup %4905 }
0x13c4   : > { %v3013_v47 = vsel %vm1152_vm0, %v4906_v45, 0.0  ;;  %v4908_v49 = vpop.eup %4907 }
0x13c5   : > { %3005 = vadd.xlane.f32.xlu1 %v3004_v46  ;;  %3014 = vadd.xlane.f32.xlu0 %v3013_v47  ;;  %v3007_v54 = vsel %vm1152_vm0, %v4908_v49, 0.0 }
0x13c9   : > { %3008 = vadd.xlane.f32.xlu0 %v3007_v54  ;;  %v4741_v54 = vld [vmem:[#allocation19 + $0x4] ss:$8 sps:$4 sm:$0xff]  }
0x13ca   : > { %3425 = vmatprep.subr.bf16.mxu1 %v4741_v54  ;;  %v4090_v54 = vld [vmem:[%s6594_s7 + $0x1] ss:$0 sm:$0xff] }
0x13d6   : > { %3026 = vrot.lane.b32.xlu1 %v6185_v7, %s5355_s11 }
0x13da   : > { %3091 = vrot.lane.b32.xlu1 %v2731_v9, %s5355_s11 }
0x13de   : > { %3093 = vrot.lane.b32.xlu1 %v2732_v4, %s5355_s11 }
0x13df   : > { %3028 = vrot.lane.b32.xlu0 %v6193_v18, %s5355_s11 }
0x13e2   : > { %3099 = vrot.lane.b32.xlu1 %v2910_v12, %s5354_s19  ;;  %v4731_v12 = vld [vmem:[#allocation17] sm:$0xff]  }
0x13e3   : > { %3097 = vrot.lane.b32.xlu0 %v2909_v13, %s5354_s19  ;;  %v4733_v13 = vld [vmem:[#allocation17 + $0x10] sm:$0xff]  }
0x144e   : > { %v3012_v56 = vpop.xlane.xlu1 %3011 }
0x1452   : > { %v3006_v57 = vpop.xlane.xlu1 %3005  ;;  %v3015_v58 = vpop.xlane.xlu0 %3014 }
0x1453   : > { %4909 = vrcp.f32 %v3015_v58 }
0x1454   : > { %4911 = vrcp.f32 %v3006_v57  ;;  %v4742_v57 = vld [vmem:[#allocation19 + $0x10] ss:$8 sps:$4 sm:$0xff]  }
0x1455   : > { %4913 = vrcp.f32 %v3012_v56  ;;  %v4744_v56 = vld [vmem:[#allocation19 + $0x14] ss:$8 sps:$4 sm:$0xff]  }
0x1456   : > { %v3027_v59 = vpop.permute.xlu1 %3026  ;;  %v3009_v60 = vpop.xlane.xlu0 %3008 }
0x1457   : > { %4915 = vrcp.f32 %v3009_v60  ;;  %4467 = vmatprep.subr.bf16.mxu0 %v3027_v59 }
0x1458   : > { %4468 = vmatpush3.bf16.msra.mxu0 %v3027_v59 }
0x145a   : > { %v3029_v7 = vpop.permute.xlu0 %3028  ;;  %v3092_v25 = vpop.permute.xlu1 %3091 }
0x145b   : > { %4469 = vmatprep.subr.bf16.mxu0 %v3029_v7  ;;  %v3109_v1 = vsel %vm1152_vm0, %v2547_v36, %v3092_v25  ;;  %v4767_v25 = vld [vmem:[#allocation20 + $0x50] sm:$0xff]  }
0x145c   : > { %4470 = vmatpush3.bf16.msra.mxu0 %v3029_v7 }
0x145d   : > { %v4910_v61 = vpop.eup %4909  ;;  %4475 = vmatprep.subr.bf16.mxu0 %v4731_v12 }
0x145e   : > { %v4912_v18 = vpop.eup %4911  ;;  %v3023_v4 = vmul.f32 %v4910_v61, %v4906_v45  ;;  %v3094_v26 = vpop.permute.xlu1 %3093 }
0x145f   : > { %v4914_v62 = vpop.eup %4913  ;;  %v3020_v5 = vmul.f32 %v4912_v18, %v4904_v32  ;;  %v3098_v48 = vpop.permute.xlu0 %3097  ;;  %v3112_v38 = vsel %vm1152_vm0, %v2548_v30, %v3094_v26  ;;  %v4768_v26 = vld [vmem:[#allocation20 + $0x10] sm:$0xff]  }
0x1460   : > { %v3022_v3 = vmul.f32 %v4914_v62, %v4902_v44  ;;  %v3114_v55 = vsel %vm1881_vm10, %v3109_v1, %v3098_v48  ;;  %v4770_v48 = vld [vmem:[#allocation20 + $0x18] sm:$0xff]   ;;  %v4771_v1 = vld [vmem:[#allocation20 + $0x60] sm:$0xff]  }
0x1461   : > { %v4916_v63 = vpop.eup %4915 }
0x1462   : > { %v3021_v9 = vmul.f32 %v4916_v63, %v4908_v49  ;;  %v3025_v11 = vpack.c.bf16 %v3023_v4, %v3022_v3  ;;  %v3100_v27 = vpop.permute.xlu1 %3099  ;;  %v4739_v49 = vld [vmem:[#allocation19] ss:$8 sps:$4 sm:$0xff]  }
0x1463   : > { %v3116_v42 = vsel %vm1881_vm10, %v3112_v38, %v3100_v27  ;;  %3426 = vmatpush1.bf16.msra.mxu1 %v4739_v49  ;;  %v4769_v27 = vld [vmem:[#allocation20 + $0x58] sm:$0xff]   ;;  %v4773_v38 = vld [vmem:[#allocation20 + $0x68] sm:$0xff]  }
0x1464   : > { %v3024_v8 = vpack.c.bf16 %v3021_v9, %v3020_v5  ;;  %3427 = vmatprep.subr.bf16.mxu1 %v4744_v56 }
0x1466   : > { %4471 = vmatprep.mubr.msk.bf16.mxu0 %vm1152_vm0, %v3024_v8  ;;  %v4747_v8 = vld [vmem:[#allocation19 + $0x24] ss:$8 sps:$4 sm:$0xff]  }
0x1467   : > { %4472 = vmatmul.mubr.msk.bf16.vlgmr.msra.gmra.mrb[36].mxu0 %vm1152_vm0, %v3025_v11  ;;  %3428 = vmatpush1.bf16.msra.mxu1 %v4742_v57  ;;  %v4745_v11 = vld [vmem:[#allocation19 + $0x20] ss:$8 sps:$4 sm:$0xff]  }
0x1468   : > { %4476 = vmatpush3.bf16.msra.mxu0 %v4731_v12  ;;  %3429 = vmatprep.subr.bf16.mxu1 %v4747_v8  ;;  %v4750_v12 = vld [vmem:[#allocation19 + $0x34] ss:$8 sps:$4 sm:$0xff]  }
0x1469   : > { %4477 = vmatprep.subr.bf16.mxu0 %v4732_v17 }
0x146b   : > { %3430 = vmatpush1.bf16.msra.mxu1 %v4745_v11 }
0x146c   : > { %4478 = vmatpush3.bf16.msra.mxu0 %v4732_v17  ;;  %v4748_v17 = vld [vmem:[#allocation19 + $0x30] ss:$8 sps:$4 sm:$0xff]   ;;  %3431 = vmatprep.subr.bf16.mxu1 %v4750_v12 }
0x146d   : > { %4479 = vmatprep.subr.bf16.mxu0 %v4733_v13 }
0x146f   : > { %3432 = vmatpush1.bf16.msra.mxu1 %v4748_v17 }
0x1470   : > { %4480 = vmatpush3.bf16.msra.mxu0 %v4733_v13  ;;  %v4753_v13 = vld [vmem:[#allocation19 + $0x44] ss:$8 sps:$4 sm:$0xff]  }
0x1471   : > { %4481 = vmatprep.subr.bf16.mxu0 %v4734_v19  ;;  %3433 = vmatprep.subr.bf16.mxu1 %v4753_v13 }
0x1474   : > { %4482 = vmatpush3.bf16.msra.mxu0 %v4734_v19  ;;  %v4751_v19 = vld [vmem:[#allocation19 + $0x40] ss:$8 sps:$4 sm:$0xff]  }
0x1475   : > { %4483 = vmatprep.subr.bf16.mxu0 %v4735_v14  ;;  %3434 = vmatpush1.bf16.msra.mxu1 %v4751_v19 }
0x1478   : > { %4484 = vmatpush3.bf16.msra.mxu0 %v4735_v14  ;;  %v4756_v14 = vld [vmem:[#allocation19 + $0x54] ss:$8 sps:$4 sm:$0xff]  }
0x1479   : > { %4485 = vmatprep.subr.bf16.mxu0 %v4736_v21  ;;  %3435 = vmatprep.subr.bf16.mxu1 %v4756_v14 }
0x147c   : > { %4486 = vmatpush3.bf16.msra.mxu0 %v4736_v21  ;;  %v4754_v21 = vld [vmem:[#allocation19 + $0x50] ss:$8 sps:$4 sm:$0xff]  }
0x147d   : > { %4487 = vmatprep.subr.bf16.mxu0 %v4737_v20  ;;  %3436 = vmatpush1.bf16.msra.mxu1 %v4754_v21 }
0x1480   : > { %4488 = vmatpush3.bf16.msra.mxu0 %v4737_v20  ;;  %v4759_v20 = vld [vmem:[#allocation19 + $0x64] ss:$8 sps:$4 sm:$0xff]  }
0x1481   : > { %4489 = vmatprep.subr.bf16.mxu0 %v4738_v15  ;;  %3437 = vmatprep.subr.bf16.mxu1 %v4759_v20 }
0x1484   : > { %4490 = vmatpush3.bf16.msra.mxu0 %v4738_v15  ;;  %v4757_v15 = vld [vmem:[#allocation19 + $0x60] ss:$8 sps:$4 sm:$0xff]  }
0x1485   : > { %3438 = vmatpush1.bf16.msra.mxu1 %v4757_v15 }
0x153a   : > { %v4473_v53 = vpop.f32.mrb[36].mxu0 }
0x153b   : > { %v3072_v22 = vpop.f32.mrb[37].mxu0 }
0x153c   : > { %v4474_v23 = vpop.f32.mrb[38].mxu0 }
0x153d   : > { %v3088_v6 = vpack.c.bf16 %v4474_v23, %v4473_v53  ;;  %v3075_v24 = vpop.f32.mrb[39].mxu0  ;;  %v4762_v53 = vld [vmem:[#allocation19 + $0x74] ss:$8 sps:$4 sm:$0xff]   ;;  %v4763_v23 = vld [vmem:[#allocation20 + $0x40] sm:$0xff]  }
0x153e   : > { %v3087_v37 = vpack.c.bf16 %v3075_v24, %v3072_v22  ;;  %v4760_v22 = vld [vmem:[#allocation19 + $0x70] ss:$8 sps:$4 sm:$0xff]   ;;  %3439 = vmatprep.subr.bf16.mxu1 %v4762_v53  ;;  %v4765_v24 = vld [vmem:[#allocation20 + $0x48] sm:$0xff]   ;;  %4259 = vmatprep.subr.bf16.mxu0 %v4763_v23 }
0x153f   : > { %3105 = vrot.lane.b32.xlu1 %v3088_v6, %s5352_s20  ;;  %3440 = vmatpush1.bf16.msra.mxu1 %v4760_v22  ;;  %v4764_v6 = vld [vmem:[#allocation20] sm:$0xff]  }
0x1540   : > { %3103 = vrot.lane.b32.xlu0 %v3087_v37, %s5352_s20  ;;  %v4766_v37 = vld [vmem:[#allocation20 + $0x8] sm:$0xff]  }
0x15b1   : > { %v3106_v28 = vpop.permute.xlu1 %3105 }
0x15b2   : > { %v3104_v41 = vpop.permute.xlu0 %3103  ;;  %v3121_v43 = vsel %vm1886_vm11, %v3116_v42, %v3106_v28  ;;  %v4772_v28 = vld [vmem:[#allocation20 + $0x20] sm:$0xff]  }
0x15b3   : > { %v3118_v40 = vsel %vm1886_vm11, %v3114_v55, %v3104_v41 }
0x15b4   : > { %4491 = vmatprep.mubr.bf16.mxu0 %v3118_v40 }
0x15b5   : > { %4492 = vmatmul.mubr.bf16.vlgmr.msra.gmra.mrb[40].mxu0 %v3121_v43 }
0x15b6   : > { %4260 = vmatpush3.bf16.msra.mxu0 %v4764_v6 }
0x15b7   : > { %4261 = vmatprep.subr.bf16.mxu0 %v4765_v24 }
0x15ba   : > { %4262 = vmatpush3.bf16.msra.mxu0 %v4766_v37 }
0x15bb   : > { %4263 = vmatprep.subr.bf16.mxu0 %v4767_v25 }
0x15be   : > { %4264 = vmatpush3.bf16.msra.mxu0 %v4768_v26 }
0x15bf   : > { %4265 = vmatprep.subr.bf16.mxu0 %v4769_v27 }
0x15c2   : > { %4266 = vmatpush3.bf16.msra.mxu0 %v4770_v48 }
0x15c3   : > { %4267 = vmatprep.subr.bf16.mxu0 %v4771_v1 }
0x15c6   : > { %4268 = vmatpush3.bf16.msra.mxu0 %v4772_v28 }
0x15c7   : > { %4269 = vmatprep.subr.bf16.mxu0 %v4773_v38 }
0x1688   : > { %v4493_v33 = vpop.f32.mrb[40].mxu0 }
0x1689   : > { %v3228_v36 = vpop.f32.mrb[41].mxu0  ;;  %v3237_v39 = vadd.f32 %v4493_v33, %v4078_v10 }
0x168a   : > { %v3229_v35 = vadd.f32 %v4078_v10, %v3228_v36  ;;  %v4494_v16 = vpop.f32.mrb[42].mxu0 }
0x168b   : > { %v3231_v30 = vpop.f32.mrb[43].mxu0  ;;  %v3245_v45 = vadd.f32 %v3237_v39, %v6172_v50  ;;  %v3240_v46 = vadd.f32 %v4494_v16, %v4078_v10 }
0x168c   : > { %v3243_v44 = vadd.f32 %v3229_v35, %v6165_v2  ;;  %v3232_v51 = vadd.f32 %v4078_v10, %v3231_v30 }
0x168d   : > { %v3246_v47 = vadd.f32 %v3240_v46, %v6174_v52 }
0x168e   : > { %v3244_v32 = vadd.f32 %v3232_v51, %v6167_v34  ;;  %3251 = vadd.xlane.f32.xlu0 %v3243_v44  ;;  %v4089_v51 = vld [vmem:[%s6593_s18 + $0x1] ss:$0 sm:$0xff] }
0x1690   : > { %3253 = vadd.xlane.f32.xlu1 %v3244_v32 }
0x1692   : > { %3255 = vadd.xlane.f32.xlu0 %v3245_v45 }
0x1696   : > { %3257 = vadd.xlane.f32.xlu0 %v3246_v47 }
0x171b   : > { %v3252_v2 = vpop.xlane.xlu0 %3251 }
0x171c   : > { %v3259_v58 = vmul.f32 0.0078125, %v3252_v2 }
0x171d   : > { %v3254_v34 = vpop.xlane.xlu1 %3253 }
0x171e   : > { %v6379_v59 = vsub.f32 %v3243_v44, %v3259_v58  ;;  %v3260_v50 = vmul.f32 0.0078125, %v3254_v34 }
0x171f   : > { %v3256_v60 = vpop.xlane.xlu0 %3255 }
0x1720   : > { %v6381_v7 = vsub.f32 %v3244_v32, %v3260_v50  ;;  %v3261_v61 = vmul.f32 0.0078125, %v3256_v60  ;;  %v3267_v52 = vmul.f32 %v6379_v59, %v6379_v59 }
0x1722   : > { %v6385_v18 = vsub.f32 %v3245_v45, %v3261_v61  ;;  %3271 = vadd.xlane.f32.xlu1 %v3267_v52  ;;  %v3268_v62 = vmul.f32 %v6381_v7, %v6381_v7 }
0x1723   : > { %v3258_v63 = vpop.xlane.xlu0 %3257 }
0x1724   : > { %v3262_v4 = vmul.f32 0.0078125, %v3258_v63  ;;  %3273 = vadd.xlane.f32.xlu0 %v3268_v62  ;;  %v3269_v5 = vmul.f32 %v6385_v18, %v6385_v18  ;;  %v4775_v63 = vld [vmem:[#allocation20 + $0x70] sm:$0xff]  }
0x1726   : > { %v6391_v9 = vsub.f32 %v3246_v47, %v3262_v4  ;;  %3275 = vadd.xlane.f32.xlu1 %v3269_v5  ;;  %v4776_v4 = vld [vmem:[#allocation20 + $0x30] sm:$0xff]   ;;  %v4777_v5 = vld [vmem:[#allocation20 + $0x78] sm:$0xff]  }
0x1728   : > { %v3270_v3 = vmul.f32 %v6391_v9, %v6391_v9 }
0x172a   : > { %3277 = vadd.xlane.f32.xlu0 %v3270_v3 }
0x17af   : > { %v3272_v55 = vpop.xlane.xlu1 %3271 }
0x17b0   : > { %v3279_v41 = vmul.f32 0.0078125, %v3272_v55 }
0x17b1   : > { %v3274_v42 = vpop.xlane.xlu0 %3273 }
0x17b2   : > { %v3283_v40 = vadd.f32 1e-05, %v3279_v41  ;;  %v3280_v43 = vmul.f32 0.0078125, %v3274_v42 }
0x17b3   : > { %v3276_v10 = vpop.xlane.xlu1 %3275 }
0x17b4   : > { %4917 = vrsqrt.f32 %v3283_v40  ;;  %v3284_v33 = vadd.f32 1e-05, %v3280_v43  ;;  %v3281_v36 = vmul.f32 0.0078125, %v3276_v10  ;;  %v4107_v10 = vld [vmem:[%s6599_s24] ss:$0 sm:$0xff]  ;;  %s5247_s24 = scalar_lea.vmem %s5246_s16, 512 }
0x17b5   : > { %p5249_p11 = scmp.lt.s32.totalorder %s5247_s24, %s5241_s10 }
0x17b6   : > { %4919 = vrsqrt.f32 %v3284_v33  ;;  %v3285_v35 = vadd.f32 1e-05, %v3281_v36 }
0x17b7   : > { %v3278_v16 = vpop.xlane.xlu0 %3277  ;;  %p5250_p4 = por %p5249_p11, %p5248_p12 }
0x17b8   : > { %4921 = vrsqrt.f32 %v3285_v35  ;;  %v3282_v30 = vmul.f32 0.0078125, %v3278_v16 }
0x17b9   : > { %p5251_p9 = pnand %p5250_p4, %p5244_p2 }
0x17ba   : > { %v3286_v39 = vadd.f32 1e-05, %v3282_v30 }
0x17bc   : > { %4923 = vrsqrt.f32 %v3286_v39 }
0x17be   : > { %v4918_v44 = vpop.eup %4917 }
0x17bf   : > { %v3291_v32 = vmul.f32 %v4918_v44, %v6379_v59 }
0x17c0   : > { %v4920_v45 = vpop.eup %4919 }
0x17c1   : > { %v3292_v46 = vmul.f32 %v4920_v45, %v6381_v7  ;;  %v3301_v47 = vmul.f32 %v4089_v51, %v3291_v32 }
0x17c2   : > { %v4922_v49 = vpop.eup %4921 }
0x17c3   : > { %v3302_v56 = vmul.f32 %v4089_v51, %v3292_v46  ;;  %v6403_v57 = vadd.f32 %v4090_v54, %v3301_v47  ;;  %v3293_v58 = vmul.f32 %v4922_v49, %v6385_v18  ;;  %v4774_v18 = vld [vmem:[#allocation20 + $0x28] sm:$0xff]  }
0x17c4   : > { %4270 = vmatpush3.bf16.msra.mxu0 %v4774_v18 }
0x17c5   : > { %v6405_v2 = vadd.f32 %v4090_v54, %v3302_v56  ;;  %v3303_v60 = vmul.f32 %v4089_v51, %v3293_v58  ;;  %4271 = vmatprep.subr.bf16.mxu0 %v4775_v63 }
0x17c6   : > { %v4924_v34 = vpop.eup %4923 }
0x17c7   : > { %v3315_v59 = vpack.c.bf16 %v6405_v2, %v6403_v57  ;;  %v3294_v50 = vmul.f32 %v4924_v34, %v6391_v9  ;;  %v6414_v52 = vadd.f32 %v4090_v54, %v3303_v60  ;;  %v4778_v9 = vld [vmem:[#allocation20 + $0x38] sm:$0xff]  }
0x17c8   : > { %4272 = vmatpush3.bf16.msra.mxu0 %v4776_v4 }
0x17c9   : > { %3458 = vmatmul.mubr.bf16.vlgmr.msra.gmra.mrb[52].mxu1 %v3315_v59  ;;  %v3304_v7 = vmul.f32 %v4089_v51, %v3294_v50  ;;  %4273 = vmatprep.subr.bf16.mxu0 %v4777_v5 }
0x17ca   : > { %3467 = vmatprep.mubr.bf16.mxu1 %v5351_v0  ;;  %v3333_v0 = vld [vmem:[%s6598_s30] sm:$0x3]  ;;  %s6441_s30 = scalar_lea.hbm %s6600_s17, %s4143_s12 }
0x17cb   : > { %v6412_v61 = vadd.f32 %v4090_v54, %v3304_v7  ;;  %v3338_v3 = vrot.slane %v3333_v0, %v5889_v29  ;;  %v3342_v8 = vrot.slane %v3333_v0, %v5895_v31 }
0x17cc   : > { %4274 = vmatpush3.bf16.msra.mxu0 %v4778_v9 }
0x17cd   : > { %v3316_v62 = vpack.c.bf16 %v6412_v61, %v6414_v52 }
0x17d1   : > { %3468 = vmatmul.mubr.bf16.gmra.mrb[56].mxu1 %v3316_v62 }
0x189c   : > { %v3459_v11 = vpop.f32.mrb[52].mxu1 }
0x189d   : > { %v3460_v12 = vadd.f32 %v3459_v11, %v3338_v3  ;;  %v3461_v17 = vpop.f32.mrb[53].mxu1 }
0x189e   : > { %v3462_v13 = vadd.f32 %v3461_v17, %v3342_v8  ;;  %v3463_v19 = vpop.f32.mrb[54].mxu1 }
0x189f   : > { %v3464_v14 = vadd.f32 %v3463_v19, %v3338_v3  ;;  %v3465_v21 = vpop.f32.mrb[55].mxu1  ;;  %v3478_v15 = vmax.f32 %v3460_v12, 0.0 }
0x18a0   : > { %v3466_v20 = vadd.f32 %v3465_v21, %v3342_v8  ;;  %v3479_v22 = vmax.f32 %v3462_v13, 0.0 }
0x18a1   : > { %v3480_v53 = vmax.f32 %v3464_v14, 0.0 }
0x18a2   : > { %v3481_v23 = vmax.f32 %v3466_v20, 0.0 }
0x18a3   : > { %v3486_v6 = vpack.c.bf16 %v3480_v53, %v3478_v15 }
0x18a4   : > { %v3487_v24 = vpack.c.bf16 %v3481_v23, %v3479_v22  ;;  %v3469_v37 = vpop.f32.mrb[56].mxu1 }
0x18a5   : > { %v3470_v25 = vadd.f32 %v3469_v37, %v3338_v3  ;;  %v3471_v26 = vpop.f32.mrb[57].mxu1  ;;  %v4126_v37 = vld [vmem:[%s6593_s18 + $0x2] ss:$0 sm:$0xff] }
0x18a6   : > { %v3472_v29 = vadd.f32 %v3471_v26, %v3342_v8  ;;  %v3473_v27 = vpop.f32.mrb[58].mxu1  ;;  %3657 = vmatprep.mubr.bf16.mxu0 %v3487_v24 }
0x18a7   : > { %v3474_v31 = vadd.f32 %v3473_v27, %v3338_v3  ;;  %v3475_v48 = vpop.f32.mrb[59].mxu1  ;;  %3658 = vmatmul.mubr.bf16.vlgmr.msra.gmra.mrb[44].mxu0 %v3486_v6  ;;  %v3482_v28 = vmax.f32 %v3470_v25, 0.0 }
0x18a8   : > { %v3476_v1 = vadd.f32 %v3475_v48, %v3342_v8  ;;  %v3483_v55 = vmax.f32 %v3472_v29, 0.0 }
0x18a9   : > { %v3484_v38 = vmax.f32 %v3474_v31, 0.0  ;;  %v4127_v31 = vld [vmem:[%s6594_s7 + $0x2] ss:$0 sm:$0xff] }
0x18aa   : > { %v3485_v41 = vmax.f32 %v3476_v1, 0.0 }
0x18ab   : > { %v3488_v42 = vpack.c.bf16 %v3484_v38, %v3482_v28 }
0x18ac   : > { %v3489_v40 = vpack.c.bf16 %v3485_v41, %v3483_v55 }
0x18ae   : > { %3665 = vmatprep.mubr.bf16.mxu0 %v3489_v40 }
0x18af   : > { %3666 = vmatmul.mubr.bf16.gmra.mrb[48].mxu0 %v3488_v42 }
0x197a   : > { %v4275_v43 = vpop.f32.mrb[44].mxu0 }
0x197b   : > { %v4276_v33 = vpop.f32.mrb[45].mxu0 }
0x197c   : > { %v4277_v36 = vadd.f32 %v4276_v33, %v4275_v43  ;;  %v4278_v35 = vpop.f32.mrb[46].mxu0 }
0x197d   : > { %v4279_v16 = vpop.f32.mrb[47].mxu0 }
0x197e   : > { %v3660_v30 = vadd.f32 %v4277_v36, %v4107_v10  ;;  %v4280_v39 = vadd.f32 %v4279_v16, %v4278_v35 }
0x1980   : > { %v3663_v44 = vadd.f32 %v4280_v39, %v4107_v10  ;;  %v3674_v51 = vadd.f32 %v3660_v30, %v6403_v57 }
0x1982   : > { %3682 = vadd.xlane.f32.xlu1 %v3674_v51  ;;  %v4281_v32 = vpop.f32.mrb[48].mxu0  ;;  %v3675_v45 = vadd.f32 %v3663_v44, %v6405_v2 }
0x1983   : > { %v4282_v46 = vpop.f32.mrb[49].mxu0 }
0x1984   : > { %v4283_v47 = vadd.f32 %v4282_v46, %v4281_v32  ;;  %3684 = vadd.xlane.f32.xlu0 %v3675_v45  ;;  %v4284_v49 = vpop.f32.mrb[50].mxu0 }
0x1985   : > { %v4285_v54 = vpop.f32.mrb[51].mxu0 }
0x1986   : > { %v3668_v56 = vadd.f32 %v4283_v47, %v4107_v10  ;;  %v4286_v58 = vadd.f32 %v4285_v54, %v4284_v49 }
0x1988   : > { %v3671_v34 = vadd.f32 %v4286_v58, %v4107_v10  ;;  %v3676_v59 = vadd.f32 %v3668_v56, %v6414_v52 }
0x198a   : > { %3686 = vadd.xlane.f32.xlu1 %v3676_v59  ;;  %v3677_v50 = vadd.f32 %v3671_v34, %v6412_v61 }
0x198c   : > { %3688 = vadd.xlane.f32.xlu0 %v3677_v50 }
0x1a0f   : > { %v3683_v60 = vpop.xlane.xlu1 %3682 }
0x1a10   : > { %v3690_v57 = vmul.f32 0.0078125, %v3683_v60 }
0x1a11   : > { %v3685_v7 = vpop.xlane.xlu0 %3684 }
0x1a12   : > { %v3694_v62 = vsub.f32 %v3674_v51, %v3690_v57  ;;  %v3691_v18 = vmul.f32 0.0078125, %v3685_v7 }
0x1a14   : > { %v3695_v2 = vsub.f32 %v3675_v45, %v3691_v18  ;;  %v3698_v63 = vmul.f32 %v3694_v62, %v3694_v62 }
0x1a16   : > { %3702 = vadd.xlane.f32.xlu1 %v3698_v63  ;;  %v3699_v4 = vmul.f32 %v3695_v2, %v3695_v2 }
0x1a17   : > { %v3687_v5 = vpop.xlane.xlu1 %3686 }
0x1a18   : > { %v3692_v9 = vmul.f32 0.0078125, %v3687_v5  ;;  %3704 = vadd.xlane.f32.xlu0 %v3699_v4 }
0x1a19   : > { %v3689_v0 = vpop.xlane.xlu0 %3688 }
0x1a1a   : > { %v3696_v3 = vsub.f32 %v3676_v59, %v3692_v9  ;;  %v3693_v8 = vmul.f32 0.0078125, %v3689_v0 }
0x1a1c   : > { %v3697_v52 = vsub.f32 %v3677_v50, %v3693_v8  ;;  %v3700_v11 = vmul.f32 %v3696_v3, %v3696_v3 }
0x1a1e   : > { %3706 = vadd.xlane.f32.xlu1 %v3700_v11  ;;  %v3701_v61 = vmul.f32 %v3697_v52, %v3697_v52 }
0x1a20   : > { %3708 = vadd.xlane.f32.xlu0 %v3701_v61 }
0x1aa3   : > { %v3703_v12 = vpop.xlane.xlu1 %3702 }
0x1aa4   : > { %v3710_v17 = vmul.f32 0.0078125, %v3703_v12 }
0x1aa5   : > { %v3705_v13 = vpop.xlane.xlu0 %3704 }
0x1aa6   : > { %v3714_v19 = vadd.f32 1e-05, %v3710_v17  ;;  %v3711_v14 = vmul.f32 0.0078125, %v3705_v13 }
0x1aa8   : > { %4925 = vrsqrt.f32 %v3714_v19  ;;  %v3715_v21 = vadd.f32 1e-05, %v3711_v14 }
0x1aaa   : > { %4927 = vrsqrt.f32 %v3715_v21 }
0x1aab   : > { %v3707_v20 = vpop.xlane.xlu1 %3706 }
0x1aac   : > { %v3712_v15 = vmul.f32 0.0078125, %v3707_v20 }
0x1aad   : > { %v3709_v53 = vpop.xlane.xlu0 %3708 }
0x1aae   : > { %v3716_v22 = vadd.f32 1e-05, %v3712_v15  ;;  %v3713_v23 = vmul.f32 0.0078125, %v3709_v53 }
0x1ab0   : > { %4929 = vrsqrt.f32 %v3716_v22  ;;  %v3717_v6 = vadd.f32 1e-05, %v3713_v23 }
0x1ab2   : > { %v4926_v24 = vpop.eup %4925  ;;  %4931 = vrsqrt.f32 %v3717_v6 }
0x1ab3   : > { %v3722_v25 = vmul.f32 %v4926_v24, %v3694_v62 }
0x1ab4   : > { %v4928_v26 = vpop.eup %4927 }
0x1ab5   : > { %v3732_v29 = vmul.f32 %v4126_v37, %v3722_v25  ;;  %v3723_v27 = vmul.f32 %v4928_v26, %v3695_v2 }
0x1ab7   : > { %v3733_v48 = vmul.f32 %v4126_v37, %v3723_v27  ;;  %v3742_v1 = vadd.f32 %v4127_v31, %v3732_v29 }
0x1ab9   : > { %v3743_v28 = vadd.f32 %v4127_v31, %v3733_v48 }
0x1aba   : > { %v4930_v38 = vpop.eup %4929 }
0x1abb   : > { %v4147_v55 = vpack.c.bf16 %v3743_v28, %v3742_v1  ;;  %v3724_v41 = vmul.f32 %v4930_v38, %v3696_v3 }
0x1abc   : > { %v4932_v42 = vpop.eup %4931 }
0x1abd   : > { %v3734_v40 = vmul.f32 %v4126_v37, %v3724_v41  ;;  %v3725_v43 = vmul.f32 %v4932_v42, %v3697_v52  ;;  %4148 = vst [vmem:[%s813_s8] sm:$0xff] %v4147_v55  }
0x1abf   : > { %v3735_v10 = vmul.f32 %v4126_v37, %v3725_v43  ;;  %v3744_v33 = vadd.f32 %v4127_v31, %v3734_v40 }
0x1ac1   : > { %v3745_v36 = vadd.f32 %v4127_v31, %v3735_v10 }
0x1ac3   : > { %v4152_v35 = vpack.c.bf16 %v3745_v36, %v3744_v33 }
0x1ac5   : > { %4154 = vst [vmem:[%s813_s8 + $0x8] sm:$0xff] %v4152_v35  }
0x1ac6   : > { %5254 = shalt.err (!%p5251_p9)
}
0x1ac7   : > { %s5255_s26 = scalar_lea.hbm %s6441_s30, 256  ;;  %s5259_s21 = scalar_lea.hbm %s6600_s17, 512 }
0x1ac8   : > { %p5256_p5 = scmp.ne.s32.totalorder %s6441_s30, %s5255_s26  ;;  %p5260_p7 = scmp.lt.u32.totalorder %s6441_s30, %s6600_s17 }
0x1ac9   : > { %p5261_p1 = scmp.lt.u32.totalorder %s5259_s21, %s5255_s26  ;;  %p5263_p8 = scmp.lt.u32.totalorder %s5255_s26, %s6441_s30 }
0x1aca   : > { %p5257_p6 = pnand %p5256_p5, %p6601_p10 }
0x1acb   : > { %p5262_p3 = por %p5261_p1, %p5260_p7 }
0x1acc   : > { %p5258_p0 = pneg %p5257_p6 }
0x1acd   : > { %p5264_p13 = por %p5263_p8, %p5262_p3 }
0x1acf   : > { %p5265_p2 = pnand %p5264_p13, %p5258_p0 }
0x1ad1   : > { %5268 = shalt.err (!%p5265_p2)
}
0x1ad2   : > { %s5357_s2 = smov 4  }
0x1ad3   : > { %4547 = dma.vmem_to_hbm [thread:$0]  (%p6601_p10), %s6443_s0, 256, %s6441_s30, %s3767_s13, %s5354_s19, %s5354_s19, %s5357_s2  }
0x1ad4 PF: > { %s3795_s22 = sand.u32 1, %s5321_s1   ;;  %p6602_p12 = scmp.ne.s32.totalorder %s6574_s15, 0 }
0x1ad5   : > { %p6603_p11 = scmp.ge.s32.totalorder %s5333_s28, 2  ;;  %s3796_s10 = scalar_lea.sflag [#allocation7], %s3795_s22 }
0x1ad7   : > { %p4582_p4 = pnand %p6603_p11, %p6602_p12 }
0x1ad9   : > { %5316 = dma.done.wait (!%p4582_p4), %s3796_s10, 256  }
0x1ada   : > { %5318 = vsyncadd (!%p4582_p4), %s3796_s10, 4294967040  ;;  %p50_p9 = scmp.ge.s32.totalorder %s5720_s23, 4   ;;  %s6604_s1 = smov %s5325_s27 }
0x1adb   : > { %s6605_s27 = smov %s5329_s4  ;;  %s6606_s4 = smov %s5731_s29 }
0x1adc   : > { %s6607_s28 = smov %s5720_s23  ;;  %52 = sbr.rel (!%p50_p9) target bundleno = 49 (0x31), region = 194 }
0x1ae3   :  { %3801 = vsyncpa [#allocation6], 1 }
0x1ae4   :  { %3803 = vsyncpa [#allocation6 + $0x1], 1 }
0x1ae5   :  { %3804 = vsyncpa [#allocation9], 1 }
0x1ae6   :  { %3806 = vsyncpa [#allocation9 + $0x1], 1 }
0x1ae7   :  { %3807 = vsyncpa [#allocation12], 1 }
0x1ae8   :  { %3808 = vsyncpa [#allocation15], 1 }
0x1ae9   :  { %3809 = vsyncpa [#allocation18], 1 }
0x1aea   :  { %3810 = vsyncpa [#allocation21], 1 }
0x1aeb   :  { %3811 = vsyncpa [#allocation7], 1 }
0x1aec   :  { %3813 = vsyncpa [#allocation7 + $0x1], 1 }

</bundles_post_ra>
